<compile_context>
chip_gen: v7x
topology: tpu7x:2x2x1
jax: 0.10.0
libtpu: 0.0.40
codegen_flags: <defaults>
</compile_context>

<pallas_src>
import numpy as np
import jax
import jax.numpy as jnp
from jax.experimental import pallas as pl
from jax.experimental.pallas import tpu as pltpu

DISTANCE_BUCKETS = [0, 1, 2, 3, 4, 5, 7, 10, 14, 20, 30, 64]
DISTANCE_EMBEDDING_DIM = 128
NEG_SLOPE = 0.01

ROW_TILE = 256          # rows per grid step (multiple of 16 -> ok for f32 & bf16)
LANE = 128              # TPU lane width


def bucket_distance(d):
    for i, b in enumerate(DISTANCE_BUCKETS):
        if d <= b:
            return i
    return len(DISTANCE_BUCKETS)


def _leaky_relu(v):
    return jnp.where(v > 0, v, NEG_SLOPE * v)


# ----------------------------------------------------------------------------
# Pallas kernel: linear1..linear3 with LeakyReLU + residuals, then the output
# projection.  Dropout is identity (eval mode).  Activations / residual adds /
# accumulation stay f32; matmul operands use the dtype of x/W (f32 or bf16).
# ----------------------------------------------------------------------------
def triplet_mlp_kernel(x_ref, w1_ref, b1_ref, w2_ref, b2_ref,
                       w3_ref, b3_ref, wo_ref, bo_ref, out_ref):
    op_dtype = x_ref.dtype

    def to_op(v):                       # no-op when op_dtype == f32
        return v.astype(op_dtype)

    # Hoist bias reads once per tile.
    b1 = b1_ref[...]
    b2 = b2_ref[...]
    b3 = b3_ref[...]
    bo = bo_ref[...]

    x = x_ref[...]                                                      # (Tn, IN)

    h1 = _leaky_relu(
        jnp.dot(x, w1_ref[...], preferred_element_type=jnp.float32) + b1
    )                                                                   # (Tn, H) f32
    h2 = _leaky_relu(
        jnp.dot(to_op(h1), w2_ref[...], preferred_element_type=jnp.float32) + b2
    ) + h1
    h3 = _leaky_relu(
        jnp.dot(to_op(h2), w3_ref[...], preferred_element_type=jnp.float32) + b3
    ) + h2

    out_ref[...] = (
        jnp.dot(to_op(h3), wo_ref[...], preferred_element_type=jnp.float32) + bo
    )                                                                   # (Tn, 128)


def triplet_mlp_pallas(x, params, num_classes, use_bf16=False, tile_n=ROW_TILE):
    """x: (N, in_dim) float32. Returns logits (N, num_classes) float32."""
    w1, b1, w2, b2, w3, b3, wo, bo = params
    n, in_dim = x.shape
    hidden = w1.shape[1]

    # --- lane-dense output: pad classifier dim to a multiple of 128 lanes ---
    out_lanes = max(LANE, ((num_classes + LANE - 1) // LANE) * LANE)
    if wo.shape[1] != out_lanes:
        wo = jnp.pad(wo, ((0, 0), (0, out_lanes - wo.shape[1])))
        bo = jnp.pad(bo, ((0, 0), (0, out_lanes - bo.shape[1])))

    # --- pad feature dim to a multiple of 128 lanes (zero rows of w1) --------
    in_pad = ((in_dim + LANE - 1) // LANE) * LANE
    if in_pad != in_dim:
        x = jnp.pad(x, ((0, 0), (0, in_pad - in_dim)))
        w1 = jnp.pad(w1, ((0, in_pad - in_dim), (0, 0)))

    # --- pad rows to a multiple of the row tile ------------------------------
    n_pad = max(tile_n, ((n + tile_n - 1) // tile_n) * tile_n)
    if n_pad != n:
        x = jnp.pad(x, ((0, n_pad - n), (0, 0)))

    # --- operand dtype: bf16 MXU operands (v6e/v7x), f32 accumulation --------
    op_dtype = jnp.bfloat16 if use_bf16 else jnp.float32
    x = x.astype(op_dtype)
    w1, w2, w3, wo = (w.astype(op_dtype) for w in (w1, w2, w3, wo))
    # biases stay f32 (added to the f32 accumulator)

    grid = (n_pad // tile_n,)

    def resident(shape):
        return pl.BlockSpec(shape, lambda i: (0, 0))

    logits = pl.pallas_call(
        triplet_mlp_kernel,
        out_shape=jax.ShapeDtypeStruct((n_pad, out_lanes), jnp.float32),
        grid=grid,
        in_specs=[
            pl.BlockSpec((tile_n, in_pad), lambda i: (i, 0)),   # x row tile
            resident((in_pad, hidden)),  resident((1, hidden)),
            resident((hidden, hidden)),  resident((1, hidden)),
            resident((hidden, hidden)),  resident((1, hidden)),
            resident((hidden, out_lanes)), resident((1, out_lanes)),
        ],
        out_specs=pl.BlockSpec((tile_n, out_lanes), lambda i: (i, 0)),
        compiler_params=pltpu.CompilerParams(
            # row tiles are independent -> shard across TensorCores on v7x
            dimension_semantics=("parallel",)),
    )(x, w1, b1, w2, b2, w3, b3, wo, bo)

    return logits[:n, :num_classes]


def reference_mlp(x, params):
    """Pure-JAX reference of the MLP (also used as the tiny-batch fast path)."""
    w1, b1, w2, b2, w3, b3, wo, bo = params
    h1 = _leaky_relu(x @ w1 + b1)
    h2 = _leaky_relu(h1 @ w2 + b2) + h1
    h3 = _leaky_relu(h2 @ w3 + b3) + h2
    return h3 @ wo + bo


def triplet_mlp(x, params, num_classes, use_bf16=False, force_pallas=False,
                small_n_threshold=64):
    if x.shape[0] == 0:
        return jnp.zeros((0, num_classes), jnp.float32)
    if not force_pallas and x.shape[0] <= small_n_threshold:
        # tiny batches are launch/padding bound; XLA-fused dense is at least as fast
        return reference_mlp(x.astype(jnp.float32), params)
    return triplet_mlp_pallas(x, params, num_classes, use_bf16=use_bf16)


# ----------------------------------------------------------------------------
# Parameter construction (deterministic, xavier-normal-ish) and glue code.
# ----------------------------------------------------------------------------
def xavier_normal(key, fan_in, fan_out):
    std = (2.0 / (fan_in + fan_out)) ** 0.5
    # stored as (in, out) so the kernel does x @ W
    return std * jax.random.normal(key, (fan_in, fan_out), dtype=jnp.float32)


def make_params(key, input_dim, hidden_dim, num_classes):
    in_dim = input_dim * 2 + DISTANCE_EMBEDDING_DIM
    ks = jax.random.split(key, 5)
    dist_emb = jax.random.normal(
        ks[0], (len(DISTANCE_BUCKETS) + 1, DISTANCE_EMBEDDING_DIM), dtype=jnp.float32)
    w1 = xavier_normal(ks[1], in_dim, hidden_dim)
    w2 = xavier_normal(ks[2], hidden_dim, hidden_dim)
    w3 = xavier_normal(ks[3], hidden_dim, hidden_dim)
    wo = xavier_normal(ks[4], hidden_dim, num_classes)
    b1 = jnp.zeros((1, hidden_dim), jnp.float32)
    b2 = jnp.zeros((1, hidden_dim), jnp.float32)
    b3 = jnp.zeros((1, hidden_dim), jnp.float32)
    bo = jnp.zeros((1, num_classes), jnp.float32)
    return dist_emb, (w1, b1, w2, b2, w3, b3, wo, bo)


def triplet_classifier_forward(target_opinion_pairs, dist_emb, params,
                               num_classes, use_bf16=False, force_pallas=False):
    """target_opinion_pairs: list of (span_pair, t_embed, o_embed, raw_distance)."""
    if len(target_opinion_pairs) == 0:
        # matches `torch.empty(0, 8)` fallback shape in the reference module
        return jnp.zeros((0, 8), jnp.float32)

    t = jnp.stack([p[1] for p in target_opinion_pairs]).astype(jnp.float32)
    o = jnp.stack([p[2] for p in target_opinion_pairs]).astype(jnp.float32)
    raw = jnp.asarray([float(p[3]) for p in target_opinion_pairs], jnp.float32)

    # vectorized bucket_distance: index of first bucket boundary >= d
    buckets = jnp.searchsorted(
        jnp.asarray(DISTANCE_BUCKETS, jnp.float32), raw, side="left")
    d_emb = jnp.take(dist_emb, buckets, axis=0)
    feats = jnp.concatenate([t, o, d_emb], axis=-1)

    # single NaN mask + single host sync (covers both isnan checks of the module)
    valid = jax.device_get(jnp.logical_not(jnp.isnan(feats).any(axis=-1)))
    keep = np.nonzero(np.asarray(valid))[0]
    if keep.size == 0:
        return jnp.zeros((0, 8), jnp.float32)
    x = feats[jnp.asarray(keep)]

    # TODO(synk): Dropout(p=0.4) is eval-mode identity; training-mode dropout
    # would need PRNG-based masking (pltpu.prng_*) and is not implemented.
    return triplet_mlp(x, params, num_classes,
                       use_bf16=use_bf16, force_pallas=force_pallas)


if __name__ == "__main__":
    key = jax.random.PRNGKey(0)

    # Small, module-consistent sizes.
    INPUT_DIM = 64            # span embedding dim -> in_dim = 64*2 + 128 = 256
    HIDDEN_DIM = 256
    NUM_CLASSES = 4
    N_PAIRS = 8

    kp, kd = jax.random.split(key)
    dist_emb, params = make_params(kp, INPUT_DIM, HIDDEN_DIM, NUM_CLASSES)

    # Build deterministic example pairs (+ one NaN pair that must be filtered).
    pair_keys = jax.random.split(kd, 2 * N_PAIRS + 1)
    raw_distances = [0, 2, 5, 9, 13, 25, 50, 100]
    pairs = []
    for i in range(N_PAIRS):
        t_embed = jax.random.normal(pair_keys[2 * i], (INPUT_DIM,), jnp.float32)
        o_embed = jax.random.normal(pair_keys[2 * i + 1], (INPUT_DIM,), jnp.float32)
        pairs.append(((i, i + 1), t_embed, o_embed, raw_distances[i]))
    nan_embed = jnp.full((INPUT_DIM,), jnp.nan, jnp.float32)
    pairs.append(((99, 100), nan_embed,
                  jax.random.normal(pair_keys[-1], (INPUT_DIM,), jnp.float32), 3))

    # 1) End-to-end forward through the Pallas MLP path.
    logits = triplet_classifier_forward(
        pairs, dist_emb, params, NUM_CLASSES, force_pallas=True)
    logits = jax.block_until_ready(logits)

    # Correctness check against pure-JAX reference (NaN pair must be dropped).
    feats = []
    for _sp, t, o, rd in pairs[:N_PAIRS]:
        feats.append(jnp.concatenate([t, o, dist_emb[bucket_distance(rd)]], -1))
    x_ref = jnp.stack(feats)
    ref = reference_mlp(x_ref, params)
    assert logits.shape == (N_PAIRS, NUM_CLASSES)
    assert jnp.allclose(logits, ref, atol=1e-4, rtol=1e-4)

    # 2) Larger batch exercising multiple row tiles (f32 and bf16 operand paths).
    x_big = jax.random.normal(
        jax.random.PRNGKey(1),
        (300, INPUT_DIM * 2 + DISTANCE_EMBEDDING_DIM), jnp.float32)
    ref_big = reference_mlp(x_big, params)

    out_f32 = jax.block_until_ready(
        triplet_mlp_pallas(x_big, params, NUM_CLASSES, use_bf16=False))
    assert out_f32.shape == (300, NUM_CLASSES)
    assert jnp.allclose(out_f32, ref_big, atol=1e-4, rtol=1e-4)

    out_bf16 = jax.block_until_ready(
        triplet_mlp_pallas(x_big, params, NUM_CLASSES, use_bf16=True))
    assert jnp.allclose(out_bf16, ref_big, atol=1e-1, rtol=1e-1)

    print("KERNEL_OK")
</pallas_src>

<mosaic_0001>
module attributes {stable_mosaic.version = 11 : i64} {
  func.func @triplet_mlp_kernel(%arg0: i32, %arg1: memref<256x256xf32, #tpu.memory_space<vmem>>, %arg2: memref<256x256xf32, #tpu.memory_space<vmem>>, %arg3: memref<1x256xf32, #tpu.memory_space<vmem>>, %arg4: memref<256x256xf32, #tpu.memory_space<vmem>>, %arg5: memref<1x256xf32, #tpu.memory_space<vmem>>, %arg6: memref<256x256xf32, #tpu.memory_space<vmem>>, %arg7: memref<1x256xf32, #tpu.memory_space<vmem>>, %arg8: memref<256x128xf32, #tpu.memory_space<vmem>>, %arg9: memref<1x128xf32, #tpu.memory_space<vmem>>, %arg10: memref<256x128xf32, #tpu.memory_space<vmem>>) attributes {dimension_semantics = [#tpu.dimension_semantics<parallel>], iteration_bounds = array<i64: 1>, scalar_prefetch = 0 : i64, scratch_operands = 0 : i64, tpu.core_type = #tpu.core_type<tc>, window_params = [{transform_indices = @transform_0, window_bounds = array<i64: 256, 256>}, {pipeline_mode = #tpu.pipeline_mode<synchronous>, transform_indices = @transform_1, window_bounds = array<i64: 256, 256>}, {pipeline_mode = #tpu.pipeline_mode<synchronous>, transform_indices = @transform_2, window_bounds = array<i64: 1, 256>}, {pipeline_mode = #tpu.pipeline_mode<synchronous>, transform_indices = @transform_3, window_bounds = array<i64: 256, 256>}, {pipeline_mode = #tpu.pipeline_mode<synchronous>, transform_indices = @transform_4, window_bounds = array<i64: 1, 256>}, {pipeline_mode = #tpu.pipeline_mode<synchronous>, transform_indices = @transform_5, window_bounds = array<i64: 256, 256>}, {pipeline_mode = #tpu.pipeline_mode<synchronous>, transform_indices = @transform_6, window_bounds = array<i64: 1, 256>}, {pipeline_mode = #tpu.pipeline_mode<synchronous>, transform_indices = @transform_7, window_bounds = array<i64: 256, 128>}, {pipeline_mode = #tpu.pipeline_mode<synchronous>, transform_indices = @transform_8, window_bounds = array<i64: 1, 128>}, {transform_indices = @transform_9, window_bounds = array<i64: 256, 128>}]} {
    %c0 = arith.constant 0 : index
    %c0_0 = arith.constant 0 : index
    %0 = vector.load %arg3[%c0, %c0_0] : memref<1x256xf32, #tpu.memory_space<vmem>>, vector<1x256xf32>
    %c0_1 = arith.constant 0 : index
    %c0_2 = arith.constant 0 : index
    %1 = vector.load %arg5[%c0_1, %c0_2] : memref<1x256xf32, #tpu.memory_space<vmem>>, vector<1x256xf32>
    %c0_3 = arith.constant 0 : index
    %c0_4 = arith.constant 0 : index
    %2 = vector.load %arg7[%c0_3, %c0_4] : memref<1x256xf32, #tpu.memory_space<vmem>>, vector<1x256xf32>
    %c0_5 = arith.constant 0 : index
    %c0_6 = arith.constant 0 : index
    %3 = vector.load %arg9[%c0_5, %c0_6] : memref<1x128xf32, #tpu.memory_space<vmem>>, vector<1x128xf32>
    %c0_7 = arith.constant 0 : index
    %c0_8 = arith.constant 0 : index
    %4 = vector.load %arg1[%c0_7, %c0_8] : memref<256x256xf32, #tpu.memory_space<vmem>>, vector<256x256xf32>
    %c0_9 = arith.constant 0 : index
    %c0_10 = arith.constant 0 : index
    %5 = vector.load %arg2[%c0_9, %c0_10] : memref<256x256xf32, #tpu.memory_space<vmem>>, vector<256x256xf32>
    %cst = arith.constant dense<0.000000e+00> : vector<256x256xf32>
    %6 = tpu.matmul %4, %5, %cst {dimension_numbers = #tpu.dot_dimension_numbers<[1], [0], [0], [1], [0, 0, 1, 1], [], []>} : vector<256x256xf32>, vector<256x256xf32>, vector<256x256xf32> -> vector<256x256xf32>
    %7 = vector.broadcast %0 : vector<1x256xf32> to vector<256x256xf32>
    %8 = arith.addf %6, %7 : vector<256x256xf32>
    %cst_11 = arith.constant 0.000000e+00 : f32
    %9 = vector.broadcast %cst_11 : f32 to vector<256x256xf32>
    %10 = arith.cmpf ogt, %8, %9 : vector<256x256xf32>
    %cst_12 = arith.constant 0.00999999977 : f32
    %11 = vector.broadcast %cst_12 : f32 to vector<256x256xf32>
    %12 = arith.mulf %11, %8 : vector<256x256xf32>
    %13 = arith.select %10, %8, %12 : vector<256x256xi1>, vector<256x256xf32>
    %c0_13 = arith.constant 0 : index
    %c0_14 = arith.constant 0 : index
    %14 = vector.load %arg4[%c0_13, %c0_14] : memref<256x256xf32, #tpu.memory_space<vmem>>, vector<256x256xf32>
    %cst_15 = arith.constant dense<0.000000e+00> : vector<256x256xf32>
    %15 = tpu.matmul %13, %14, %cst_15 {dimension_numbers = #tpu.dot_dimension_numbers<[1], [0], [0], [1], [0, 0, 1, 1], [], []>} : vector<256x256xf32>, vector<256x256xf32>, vector<256x256xf32> -> vector<256x256xf32>
    %16 = vector.broadcast %1 : vector<1x256xf32> to vector<256x256xf32>
    %17 = arith.addf %15, %16 : vector<256x256xf32>
    %cst_16 = arith.constant 0.000000e+00 : f32
    %18 = vector.broadcast %cst_16 : f32 to vector<256x256xf32>
    %19 = arith.cmpf ogt, %17, %18 : vector<256x256xf32>
    %cst_17 = arith.constant 0.00999999977 : f32
    %20 = vector.broadcast %cst_17 : f32 to vector<256x256xf32>
    %21 = arith.mulf %20, %17 : vector<256x256xf32>
    %22 = arith.select %19, %17, %21 : vector<256x256xi1>, vector<256x256xf32>
    %23 = arith.addf %22, %13 : vector<256x256xf32>
    %c0_18 = arith.constant 0 : index
    %c0_19 = arith.constant 0 : index
    %24 = vector.load %arg6[%c0_18, %c0_19] : memref<256x256xf32, #tpu.memory_space<vmem>>, vector<256x256xf32>
    %cst_20 = arith.constant dense<0.000000e+00> : vector<256x256xf32>
    %25 = tpu.matmul %23, %24, %cst_20 {dimension_numbers = #tpu.dot_dimension_numbers<[1], [0], [0], [1], [0, 0, 1, 1], [], []>} : vector<256x256xf32>, vector<256x256xf32>, vector<256x256xf32> -> vector<256x256xf32>
    %26 = vector.broadcast %2 : vector<1x256xf32> to vector<256x256xf32>
    %27 = arith.addf %25, %26 : vector<256x256xf32>
    %cst_21 = arith.constant 0.000000e+00 : f32
    %28 = vector.broadcast %cst_21 : f32 to vector<256x256xf32>
    %29 = arith.cmpf ogt, %27, %28 : vector<256x256xf32>
    %cst_22 = arith.constant 0.00999999977 : f32
    %30 = vector.broadcast %cst_22 : f32 to vector<256x256xf32>
    %31 = arith.mulf %30, %27 : vector<256x256xf32>
    %32 = arith.select %29, %27, %31 : vector<256x256xi1>, vector<256x256xf32>
    %33 = arith.addf %32, %23 : vector<256x256xf32>
    %c0_23 = arith.constant 0 : index
    %c0_24 = arith.constant 0 : index
    %34 = vector.load %arg8[%c0_23, %c0_24] : memref<256x128xf32, #tpu.memory_space<vmem>>, vector<256x128xf32>
    %cst_25 = arith.constant dense<0.000000e+00> : vector<256x128xf32>
    %35 = tpu.matmul %33, %34, %cst_25 {dimension_numbers = #tpu.dot_dimension_numbers<[1], [0], [0], [1], [0, 0, 1, 1], [], []>} : vector<256x256xf32>, vector<256x128xf32>, vector<256x128xf32> -> vector<256x128xf32>
    %36 = vector.broadcast %3 : vector<1x128xf32> to vector<256x128xf32>
    %37 = arith.addf %35, %36 : vector<256x128xf32>
    %c0_26 = arith.constant 0 : index
    %c0_27 = arith.constant 0 : index
    %38 = vector.load %arg10[%c0_26, %c0_27] : memref<256x128xf32, #tpu.memory_space<vmem>>, vector<256x128xf32>
    tpu.vector_store %arg10[%c0_26, %c0_27], %37 {strides = array<i32>} : memref<256x128xf32, #tpu.memory_space<vmem>>, vector<256x128xf32>,
    return
  }
  func.func @transform_0(%arg0: i32) -> (i32, i32) {
    %c0_i32 = arith.constant 0 : i32
    %c0_i32_0 = arith.constant 0 : i32
    return %arg0, %c0_i32 : i32, i32
  }
  func.func @transform_1(%arg0: i32) -> (i32, i32) {
    %c0_i32 = arith.constant 0 : i32
    %c0_i32_0 = arith.constant 0 : i32
    %c0_i32_1 = arith.constant 0 : i32
    return %c0_i32, %c0_i32_0 : i32, i32
  }
  func.func @transform_2(%arg0: i32) -> (i32, i32) {
    %c0_i32 = arith.constant 0 : i32
    %c0_i32_0 = arith.constant 0 : i32
    %c0_i32_1 = arith.constant 0 : i32
    return %c0_i32, %c0_i32_0 : i32, i32
  }
  func.func @transform_3(%arg0: i32) -> (i32, i32) {
    %c0_i32 = arith.constant 0 : i32
    %c0_i32_0 = arith.constant 0 : i32
    %c0_i32_1 = arith.constant 0 : i32
    return %c0_i32, %c0_i32_0 : i32, i32
  }
  func.func @transform_4(%arg0: i32) -> (i32, i32) {
    %c0_i32 = arith.constant 0 : i32
    %c0_i32_0 = arith.constant 0 : i32
    %c0_i32_1 = arith.constant 0 : i32
    return %c0_i32, %c0_i32_0 : i32, i32
  }
  func.func @transform_5(%arg0: i32) -> (i32, i32) {
    %c0_i32 = arith.constant 0 : i32
    %c0_i32_0 = arith.constant 0 : i32
    %c0_i32_1 = arith.constant 0 : i32
    return %c0_i32, %c0_i32_0 : i32, i32
  }
  func.func @transform_6(%arg0: i32) -> (i32, i32) {
    %c0_i32 = arith.constant 0 : i32
    %c0_i32_0 = arith.constant 0 : i32
    %c0_i32_1 = arith.constant 0 : i32
    return %c0_i32, %c0_i32_0 : i32, i32
  }
  func.func @transform_7(%arg0: i32) -> (i32, i32) {
    %c0_i32 = arith.constant 0 : i32
    %c0_i32_0 = arith.constant 0 : i32
    %c0_i32_1 = arith.constant 0 : i32
    return %c0_i32, %c0_i32_0 : i32, i32
  }
  func.func @transform_8(%arg0: i32) -> (i32, i32) {
    %c0_i32 = arith.constant 0 : i32
    %c0_i32_0 = arith.constant 0 : i32
    %c0_i32_1 = arith.constant 0 : i32
    return %c0_i32, %c0_i32_0 : i32, i32
  }
  func.func @transform_9(%arg0: i32) -> (i32, i32) {
    %c0_i32 = arith.constant 0 : i32
    %c0_i32_0 = arith.constant 0 : i32
    return %arg0, %c0_i32 : i32, i32
  }
}

</mosaic_0001>

<bundles_post_ra>
// kernel: tpu_custom_call.1
= control target key start
LH: loop header
LB: loop body
LE: loop exit
PB: predicated region body
PF: predicated region fallthrough
CT: control target
= control target key end

     0   :  { %14 = vsyncpa [#allocation3], 0  ;;  %s3529_s0 = inlined_call_operand.hbm [shape: f32[256,256], index: 0, kind: input, shape index: {}]   ;;  %s3530_s1 = inlined_call_operand.hbm [shape: f32[256,256], index: 1, kind: input, shape index: {}]   ;;  %s3531_s2 = inlined_call_operand.vmem [shape: f32[1,256], index: 2, kind: input, shape index: {}]   ;;  %s3532_s3 = inlined_call_operand.hbm [shape: f32[256,256], index: 3, kind: input, shape index: {}]   ;;  %s3533_s4 = inlined_call_operand.vmem [shape: f32[1,256], index: 4, kind: input, shape index: {}]   ;;  %s3534_s5 = inlined_call_operand.hbm [shape: f32[256,256], index: 5, kind: input, shape index: {}]   ;;  %s3535_s6 = inlined_call_operand.vmem [shape: f32[1,256], index: 6, kind: input, shape index: {}]   ;;  %s3536_s7 = inlined_call_operand.hbm [shape: f32[256,128], index: 7, kind: input, shape index: {}]   ;;  %s3537_s8 = inlined_call_operand.vmem [shape: f32[1,128], index: 8, kind: input, shape index: {}]   ;;  %s3538_s9 = inlined_call_operand.hbm [shape: f32[256,128], index: 9, kind: output, shape index: {}]  }
   0x1   :  { %15 = vsyncpa [#allocation6], 0 }
   0x2   :  { %16 = vsyncpa [#allocation9], 0 }
   0x3   :  { %17 = vsyncpa [#allocation4], 0  ;;  %s2575_s30 = smov [#allocation5]   ;;  %s2576_s11 = smov [#allocation8]  }
   0x4   :  { %s35_s10 = sshll.u32 %s2575_s30, 4  ;;  %s63_s12 = sshll.u32 %s2576_s11, 4  ;;  %s36_s10 = int_to_ptr.vmem [resolvable:$true] %s35_s10  ;;  %s2636_s12 = int_to_ptr.vmem [resolvable:$true] %s63_s12 }
   0x5   :  { %s2435_s15 = scalar_lea.hbm %s3530_s1, 8192 }
   0x6   :  { %p2436_p0 = scmp.ne.s32.totalorder %s3530_s1, %s2435_s15  ;;  %p2439_p1 = scmp.lt.u32.totalorder %s2435_s15, %s3530_s1 }
   0x8   :  { %p2441_p2 = pnand %p2439_p1, %p2436_p0 }
   0xa   :  { %2444 = shalt.err (!%p2441_p2)
}
   0xb   :  { %s2445_s20 = scalar_lea.vmem %s36_s10, 8192  ;;  %p2450_p4 = scmp.lt.s32.totalorder %s36_s10, %s36_s10 }
   0xc   :  { %p2446_p3 = scmp.ne.s32.totalorder %s36_s10, %s2445_s20  ;;  %p2451_p5 = scmp.lt.s32.totalorder %s2445_s20, %s2445_s20 }
   0xe   :  { %p2452_p6 = por %p2451_p5, %p2450_p4 }
  0x10   :  { %p2453_p7 = pnand %p2452_p6, %p2446_p3 }
  0x12   :  { %2456 = shalt.err (!%p2453_p7)
}
  0x13   :  { %s2577_s21 = smov 256   ;;  %s2578_s22 = smov 16  }
  0x14   :  { %41 = dma.hbm_to_vmem [thread:$0]  %s3530_s1, 8192, %s36_s10, [#allocation6], %s2577_s21, %s2577_s21, %s2578_s22  }
  0x15   :  { %s2457_s27 = scalar_lea.hbm %s3534_s5, 8192 }
  0x16   :  { %p2458_p8 = scmp.ne.s32.totalorder %s3534_s5, %s2457_s27  ;;  %p2461_p9 = scmp.lt.u32.totalorder %s2457_s27, %s3534_s5 }
  0x18   :  { %p2463_p10 = pnand %p2461_p9, %p2458_p8 }
  0x1a   :  { %2466 = shalt.err (!%p2463_p10)
}
  0x1b   :  { %s2467_s13 = scalar_lea.vmem %s2636_s12, 8192  ;;  %p2472_p12 = scmp.lt.s32.totalorder %s2636_s12, %s2636_s12 }
  0x1c   :  { %p2468_p11 = scmp.ne.s32.totalorder %s2636_s12, %s2467_s13  ;;  %p2473_p13 = scmp.lt.s32.totalorder %s2467_s13, %s2467_s13 }
  0x1e   :  { %p2474_p0 = por %p2473_p13, %p2472_p12 }
  0x20   :  { %p2475_p1 = pnand %p2474_p0, %p2468_p11 }
  0x22   :  { %2478 = shalt.err (!%p2475_p1)
}
  0x23   :  { %69 = dma.hbm_to_vmem [thread:$0]  %s3534_s5, 8192, %s2636_s12, [#allocation9], %s2577_s21, %s2577_s21, %s2578_s22  }
  0x24   :  { %s2579_s14 = smov [#allocation2]   ;;  %s2580_s16 = smov [#allocation7]  }
  0x25   :  { %s23_s15 = sshll.u32 %s2579_s14, 4  ;;  %s49_s17 = sshll.u32 %s2580_s16, 4  ;;  %s24_s15 = int_to_ptr.vmem [resolvable:$true] %s23_s15  ;;  %s2673_s17 = int_to_ptr.vmem [resolvable:$true] %s49_s17 }
  0x26   :  { %s2479_s20 = scalar_lea.hbm %s3529_s0, 8192 }
  0x27   :  { %p2480_p2 = scmp.ne.s32.totalorder %s3529_s0, %s2479_s20  ;;  %p2483_p3 = scmp.lt.u32.totalorder %s2479_s20, %s3529_s0 }
  0x29   :  { %p2485_p4 = pnand %p2483_p3, %p2480_p2 }
  0x2b   :  { %2488 = shalt.err (!%p2485_p4)
}
  0x2c   :  { %s2489_s5 = scalar_lea.vmem %s24_s15, 8192  ;;  %p2494_p6 = scmp.lt.s32.totalorder %s24_s15, %s24_s15 }
  0x2d   :  { %p2490_p5 = scmp.ne.s32.totalorder %s24_s15, %s2489_s5  ;;  %p2495_p7 = scmp.lt.s32.totalorder %s2489_s5, %s2489_s5 }
  0x2f   :  { %p2496_p8 = por %p2495_p7, %p2494_p6 }
  0x31   :  { %p2497_p9 = pnand %p2496_p8, %p2490_p5 }
  0x33   :  { %2500 = shalt.err (!%p2497_p9)
}
  0x34   :  { %29 = dma.hbm_to_vmem [thread:$0]  %s3529_s0, 8192, %s24_s15, [#allocation3], %s2577_s21, %s2577_s21, %s2578_s22  }
  0x35   :  { %s2501_s30 = scalar_lea.hbm %s3532_s3, 8192 }
  0x36   :  { %p2502_p10 = scmp.ne.s32.totalorder %s3532_s3, %s2501_s30  ;;  %p2505_p11 = scmp.lt.u32.totalorder %s2501_s30, %s3532_s3 }
  0x38   :  { %p2507_p12 = pnand %p2505_p11, %p2502_p10 }
  0x3a   :  { %2510 = shalt.err (!%p2507_p12)
}
  0x3b   :  { %s2511_s14 = scalar_lea.vmem %s2673_s17, 8192  ;;  %p2516_p0 = scmp.lt.s32.totalorder %s2673_s17, %s2673_s17 }
  0x3c   :  { %p2512_p13 = scmp.ne.s32.totalorder %s2673_s17, %s2511_s14  ;;  %p2517_p1 = scmp.lt.s32.totalorder %s2511_s14, %s2511_s14 }
  0x3e   :  { %p2518_p2 = por %p2517_p1, %p2516_p0 }
  0x40   :  { %p2519_p3 = pnand %p2518_p2, %p2512_p13 }
  0x42   :  { %2522 = shalt.err (!%p2519_p3)
}
  0x43   :  { %55 = dma.hbm_to_vmem [thread:$0]  %s3532_s3, 8192, %s2673_s17, [#allocation6], %s2577_s21, %s2577_s21, %s2578_s22  }
  0x44   :  { %s2581_s16 = smov [#allocation10]   ;;  %s2523_s23 = scalar_lea.hbm %s3536_s7, 4096 }
  0x45   :  { %s77_s18 = sshll.u32 %s2581_s16, 4  ;;  %p2524_p4 = scmp.ne.s32.totalorder %s3536_s7, %s2523_s23  ;;  %s78_s18 = int_to_ptr.vmem [resolvable:$true] %s77_s18 }
  0x46   :  { %p2527_p5 = scmp.lt.u32.totalorder %s2523_s23, %s3536_s7 }
  0x48   :  { %p2529_p6 = pnand %p2527_p5, %p2524_p4 }
  0x4a   :  { %2532 = shalt.err (!%p2529_p6)
}
  0x4b   :  { %s2533_s12 = scalar_lea.vmem %s78_s18, 4096  ;;  %p2538_p8 = scmp.lt.s32.totalorder %s78_s18, %s78_s18 }
  0x4c   :  { %p2534_p7 = scmp.ne.s32.totalorder %s78_s18, %s2533_s12  ;;  %p2539_p9 = scmp.lt.s32.totalorder %s2533_s12, %s2533_s12 }
  0x4e   :  { %p2540_p10 = por %p2539_p9, %p2538_p8 }
  0x50   :  { %p2541_p11 = pnand %p2540_p10, %p2534_p7 }
  0x52   :  { %2544 = shalt.err (!%p2541_p11)
}
  0x53   :  { %s2582_s3 = smov 128   ;;  %s2583_s21 = smov 8  }
  0x54   :  { %83 = dma.hbm_to_vmem [thread:$0]  %s3536_s7, 4096, %s78_s18, [#allocation9], %s2582_s3, %s2582_s3, %s2583_s21  }
  0x55   :  { %2567 = dma.done.wait [#allocation3], 8192  }
  0x56   :  { %2568 = vsyncadd [#allocation3], 4294959104 }
  0x57   :  { %2569 = dma.done.wait [#allocation6], 16384  }
  0x58   :  { %2570 = vsyncadd [#allocation6], 4294950912 }
  0x59   :  { %2571 = dma.done.wait [#allocation9], 12288  }
  0x5a   :  { %2572 = vsyncadd [#allocation9], 4294955008  ;;  %v170_v0 = vld [vmem:[#allocation5 + $0x8] sm:$0xff]  ;;  %v172_v1 = vld [vmem:[#allocation5 + $0x18] sm:$0xff] }
  0x5b   :  { %v169_v2 = vld [vmem:[#allocation5] sm:$0xff]  ;;  %v2184_v3 = vpack.c.bf16 %v172_v1, %v170_v0  ;;  %v171_v4 = vld [vmem:[#allocation5 + $0x10] sm:$0xff]  ;;  %v174_v5 = vld [vmem:[#allocation5 + $0x28] sm:$0xff] }
  0x5c   :  { %v176_v6 = vld [vmem:[#allocation5 + $0x38] sm:$0xff]  ;;  %v2186_v7 = vpack.c.bf16 %v171_v4, %v169_v2  ;;  %v173_v9 = vld [vmem:[#allocation5 + $0x20] sm:$0xff]  ;;  %v175_v10 = vld [vmem:[#allocation5 + $0x30] sm:$0xff] }
  0x5d   :  { %v2188_v8 = vpack.c.bf16 %v176_v6, %v174_v5  ;;  %v178_v11 = vld [vmem:[#allocation5 + $0x48] sm:$0xff]  ;;  %2185 = vmatprep.subr.bf16.mxu0 %v2184_v3  ;;  %v180_v12 = vld [vmem:[#allocation5 + $0x58] sm:$0xff]  ;;  %v2190_v13 = vpack.c.bf16 %v175_v10, %v173_v9  ;;  %v177_v15 = vld [vmem:[#allocation5 + $0x40] sm:$0xff] }
  0x5e   :  { %2187 = vmatpush1.bf16.msra.mxu0 %v2186_v7  ;;  %v2192_v14 = vpack.c.bf16 %v180_v12, %v178_v11  ;;  %v179_v16 = vld [vmem:[#allocation5 + $0x50] sm:$0xff]  ;;  %v182_v17 = vld [vmem:[#allocation5 + $0x68] sm:$0xff]  ;;  %v184_v18 = vld [vmem:[#allocation5 + $0x78] sm:$0xff] }
  0x5f   :  { %2189 = vmatprep.subr.bf16.mxu0 %v2188_v8  ;;  %v2194_v19 = vpack.c.bf16 %v179_v16, %v177_v15  ;;  %v2196_v20 = vpack.c.bf16 %v184_v18, %v182_v17  ;;  %v181_v21 = vld [vmem:[#allocation5 + $0x60] sm:$0xff]  ;;  %v183_v22 = vld [vmem:[#allocation5 + $0x70] sm:$0xff]  ;;  %v186_v23 = vld [vmem:[#allocation5 + $0x88] sm:$0xff] }
  0x60   :  { %v188_v24 = vld [vmem:[#allocation5 + $0x98] sm:$0xff]  ;;  %v2198_v25 = vpack.c.bf16 %v183_v22, %v181_v21  ;;  %v185_v27 = vld [vmem:[#allocation5 + $0x80] sm:$0xff]  ;;  %v187_v28 = vld [vmem:[#allocation5 + $0x90] sm:$0xff] }
  0x61   :  { %v2200_v26 = vpack.c.bf16 %v188_v24, %v186_v23  ;;  %v190_v29 = vld [vmem:[#allocation5 + $0xa8] sm:$0xff]  ;;  %v192_v30 = vld [vmem:[#allocation5 + $0xb8] sm:$0xff]  ;;  %v2202_v31 = vpack.c.bf16 %v187_v28, %v185_v27  ;;  %v189_v33 = vld [vmem:[#allocation5 + $0xa0] sm:$0xff] }
  0x62   :  { %2191 = vmatpush1.bf16.msra.mxu0 %v2190_v13  ;;  %v2204_v32 = vpack.c.bf16 %v192_v30, %v190_v29  ;;  %v191_v34 = vld [vmem:[#allocation5 + $0xb0] sm:$0xff]  ;;  %v194_v35 = vld [vmem:[#allocation5 + $0xc8] sm:$0xff]  ;;  %v196_v36 = vld [vmem:[#allocation5 + $0xd8] sm:$0xff] }
  0x63   :  { %2193 = vmatprep.subr.bf16.mxu0 %v2192_v14  ;;  %v2206_v37 = vpack.c.bf16 %v191_v34, %v189_v33  ;;  %v2208_v38 = vpack.c.bf16 %v196_v36, %v194_v35  ;;  %v193_v39 = vld [vmem:[#allocation5 + $0xc0] sm:$0xff]  ;;  %v195_v40 = vld [vmem:[#allocation5 + $0xd0] sm:$0xff]  ;;  %v106_v41 = vld [vmem:[#allocation2 + $0x8] sm:$0xff] }
  0x64   :  { %v198_v42 = vld [vmem:[#allocation5 + $0xe8] sm:$0xff]  ;;  %v200_v43 = vld [vmem:[#allocation5 + $0xf8] sm:$0xff]  ;;  %308 = vmatprep.mubr.f32.mxu0 %v106_v41  ;;  %v2210_v44 = vpack.c.bf16 %v195_v40, %v193_v39  ;;  %v197_v46 = vld [vmem:[#allocation5 + $0xe0] sm:$0xff] }
  0x65   :  { %v2212_v45 = vpack.c.bf16 %v200_v43, %v198_v42  ;;  %v199_v47 = vld [vmem:[#allocation5 + $0xf0] sm:$0xff]  ;;  %v202_v48 = vld [vmem:[#allocation5 + $0x108] sm:$0xff]  ;;  %v204_v49 = vld [vmem:[#allocation5 + $0x118] sm:$0xff] }
  0x66   :  { %2195 = vmatpush1.bf16.msra.mxu0 %v2194_v19  ;;  %v2214_v50 = vpack.c.bf16 %v199_v47, %v197_v46  ;;  %v2216_v51 = vpack.c.bf16 %v204_v49, %v202_v48  ;;  %v201_v52 = vld [vmem:[#allocation5 + $0x100] sm:$0xff]  ;;  %v203_v53 = vld [vmem:[#allocation5 + $0x110] sm:$0xff]  ;;  %v206_v54 = vld [vmem:[#allocation5 + $0x128] sm:$0xff] }
  0x67   :  { %2197 = vmatprep.subr.bf16.mxu0 %v2196_v20  ;;  %v208_v55 = vld [vmem:[#allocation5 + $0x138] sm:$0xff]  ;;  %v2218_v56 = vpack.c.bf16 %v203_v53, %v201_v52  ;;  %v205_v58 = vld [vmem:[#allocation5 + $0x120] sm:$0xff]  ;;  %v207_v59 = vld [vmem:[#allocation5 + $0x130] sm:$0xff] }
  0x68   :  { %v2220_v57 = vpack.c.bf16 %v208_v55, %v206_v54  ;;  %v210_v60 = vld [vmem:[#allocation5 + $0x148] sm:$0xff]  ;;  %v212_v61 = vld [vmem:[#allocation5 + $0x158] sm:$0xff]  ;;  %v2222_v62 = vpack.c.bf16 %v207_v59, %v205_v58  ;;  %v209_v0 = vld [vmem:[#allocation5 + $0x140] sm:$0xff] }
  0x69   :  { %v2224_v63 = vpack.c.bf16 %v212_v61, %v210_v60  ;;  %v211_v1 = vld [vmem:[#allocation5 + $0x150] sm:$0xff]  ;;  %v214_v2 = vld [vmem:[#allocation5 + $0x168] sm:$0xff]  ;;  %v216_v3 = vld [vmem:[#allocation5 + $0x178] sm:$0xff] }
  0x6a   :  { %2199 = vmatpush1.bf16.msra.mxu0 %v2198_v25  ;;  %v2226_v4 = vpack.c.bf16 %v211_v1, %v209_v0  ;;  %v2228_v5 = vpack.c.bf16 %v216_v3, %v214_v2  ;;  %v213_v6 = vld [vmem:[#allocation5 + $0x160] sm:$0xff]  ;;  %v215_v7 = vld [vmem:[#allocation5 + $0x170] sm:$0xff]  ;;  %v218_v8 = vld [vmem:[#allocation5 + $0x188] sm:$0xff] }
  0x6b   :  { %2201 = vmatprep.subr.bf16.mxu0 %v2200_v26  ;;  %v220_v9 = vld [vmem:[#allocation5 + $0x198] sm:$0xff]  ;;  %v2230_v10 = vpack.c.bf16 %v215_v7, %v213_v6  ;;  %v217_v12 = vld [vmem:[#allocation5 + $0x180] sm:$0xff]  ;;  %v219_v13 = vld [vmem:[#allocation5 + $0x190] sm:$0xff] }
  0x6c   :  { %v2232_v11 = vpack.c.bf16 %v220_v9, %v218_v8  ;;  %v222_v14 = vld [vmem:[#allocation5 + $0x1a8] sm:$0xff]  ;;  %v224_v15 = vld [vmem:[#allocation5 + $0x1b8] sm:$0xff]  ;;  %v2234_v16 = vpack.c.bf16 %v219_v13, %v217_v12  ;;  %v221_v18 = vld [vmem:[#allocation5 + $0x1a0] sm:$0xff] }
  0x6d   :  { %v2236_v17 = vpack.c.bf16 %v224_v15, %v222_v14  ;;  %v223_v19 = vld [vmem:[#allocation5 + $0x1b0] sm:$0xff]  ;;  %v226_v20 = vld [vmem:[#allocation5 + $0x1c8] sm:$0xff]  ;;  %v228_v21 = vld [vmem:[#allocation5 + $0x1d8] sm:$0xff] }
  0x6e   :  { %2203 = vmatpush1.bf16.msra.mxu0 %v2202_v31  ;;  %v2238_v22 = vpack.c.bf16 %v223_v19, %v221_v18  ;;  %v2240_v23 = vpack.c.bf16 %v228_v21, %v226_v20  ;;  %v225_v24 = vld [vmem:[#allocation5 + $0x1c0] sm:$0xff]  ;;  %v227_v25 = vld [vmem:[#allocation5 + $0x1d0] sm:$0xff]  ;;  %v230_v26 = vld [vmem:[#allocation5 + $0x1e8] sm:$0xff] }
  0x6f   :  { %2205 = vmatprep.subr.bf16.mxu0 %v2204_v32  ;;  %v232_v27 = vld [vmem:[#allocation5 + $0x1f8] sm:$0xff]  ;;  %v2242_v28 = vpack.c.bf16 %v227_v25, %v225_v24  ;;  %v229_v30 = vld [vmem:[#allocation5 + $0x1e0] sm:$0xff]  ;;  %v231_v31 = vld [vmem:[#allocation5 + $0x1f0] sm:$0xff] }
  0x70   :  { %v2244_v29 = vpack.c.bf16 %v232_v27, %v230_v26  ;;  %v2246_v32 = vpack.c.bf16 %v231_v31, %v229_v30  ;;  %v105_v33 = vld [vmem:[#allocation2] sm:$0xff]  ;;  %v108_v34 = vld [vmem:[#allocation2 + $0x18] sm:$0xff]  ;;  %v694_v35 = vld [vmem:[#allocation7 + $0x8] sm:$0xff] }
  0x71   :  { %v696_v36 = vld [vmem:[#allocation7 + $0x18] sm:$0xff]  ;;  %v695_v39 = vld [vmem:[#allocation7 + $0x10] sm:$0xff]  ;;  %v698_v40 = vld [vmem:[#allocation7 + $0x28] sm:$0xff] }
  0x72   :  { %2207 = vmatpush1.bf16.msra.mxu0 %v2206_v37  ;;  %v693_v37 = vld [vmem:[#allocation7] sm:$0xff]  ;;  %v700_v41 = vld [vmem:[#allocation7 + $0x38] sm:$0xff]  ;;  %v702_v46 = vld [vmem:[#allocation7 + $0x48] sm:$0xff] }
  0x73   :  { %2209 = vmatprep.subr.bf16.mxu0 %v2208_v38  ;;  %v2248_v38 = vpack.c.bf16 %v696_v36, %v694_v35  ;;  %v2250_v42 = vpack.c.bf16 %v695_v39, %v693_v37  ;;  %v2252_v43 = vpack.c.bf16 %v700_v41, %v698_v40  ;;  %v704_v47 = vld [vmem:[#allocation7 + $0x58] sm:$0xff]  ;;  %v107_v49 = vld [vmem:[#allocation2 + $0x10] sm:$0xff]  ;;  %v110_v53 = vld [vmem:[#allocation2 + $0x28] sm:$0xff] }
  0x74   :  { %v703_v52 = vld [vmem:[#allocation7 + $0x50] sm:$0xff]  ;;  %v706_v54 = vld [vmem:[#allocation7 + $0x68] sm:$0xff]  ;;  %v708_v55 = vld [vmem:[#allocation7 + $0x78] sm:$0xff] }
  0x75   :  { %2249 = vmatprep.subr.bf16.mxu1 %v2248_v38  ;;  %v2260_v58 = vpack.c.bf16 %v708_v55, %v706_v54  ;;  %v705_v59 = vld [vmem:[#allocation7 + $0x60] sm:$0xff]  ;;  %v707_v60 = vld [vmem:[#allocation7 + $0x70] sm:$0xff]  ;;  %v112_v61 = vld [vmem:[#allocation2 + $0x38] sm:$0xff] }
  0x76   :  { %2211 = vmatpush1.bf16.msra.mxu0 %v2210_v44  ;;  %v697_v44 = vld [vmem:[#allocation7 + $0x20] sm:$0xff]  ;;  %2251 = vmatpush1.bf16.msra.mxu1 %v2250_v42  ;;  %v2262_v0 = vpack.c.bf16 %v707_v60, %v705_v59  ;;  %v111_v1 = vld [vmem:[#allocation2 + $0x30] sm:$0xff]  ;;  %v714_v6 = vld [vmem:[#allocation7 + $0xa8] sm:$0xff] }
  0x77   :  { %2213 = vmatprep.subr.bf16.mxu0 %v2212_v45  ;;  %v699_v45 = vld [vmem:[#allocation7 + $0x30] sm:$0xff]  ;;  %2253 = vmatprep.subr.bf16.mxu1 %v2252_v43  ;;  %v709_v3 = vld [vmem:[#allocation7 + $0x80] sm:$0xff]  ;;  %v716_v7 = vld [vmem:[#allocation7 + $0xb8] sm:$0xff] }
  0x78   :  { %v2254_v48 = vpack.c.bf16 %v699_v45, %v697_v44  ;;  %v113_v9 = vld [vmem:[#allocation2 + $0x40] sm:$0xff]  ;;  %v715_v12 = vld [vmem:[#allocation7 + $0xb0] sm:$0xff]  ;;  %v116_v13 = vld [vmem:[#allocation2 + $0x58] sm:$0xff] }
  0x79   :  { %v718_v14 = vld [vmem:[#allocation7 + $0xc8] sm:$0xff]  ;;  %v720_v15 = vld [vmem:[#allocation7 + $0xd8] sm:$0xff]  ;;  %v717_v19 = vld [vmem:[#allocation7 + $0xc0] sm:$0xff] }
  0x7a   :  { %2215 = vmatpush1.bf16.msra.mxu0 %v2214_v50  ;;  %v2256_v50 = vpack.c.bf16 %v704_v47, %v702_v46  ;;  %2255 = vmatpush1.bf16.msra.mxu1 %v2254_v48  ;;  %v2272_v18 = vpack.c.bf16 %v720_v15, %v718_v14  ;;  %v719_v20 = vld [vmem:[#allocation7 + $0xd0] sm:$0xff]  ;;  %v118_v21 = vld [vmem:[#allocation2 + $0x68] sm:$0xff]  ;;  %v117_v25 = vld [vmem:[#allocation2 + $0x60] sm:$0xff] }
  0x7b   :  { %2217 = vmatprep.subr.bf16.mxu0 %v2216_v51  ;;  %v701_v51 = vld [vmem:[#allocation7 + $0x40] sm:$0xff]  ;;  %v2274_v24 = vpack.c.bf16 %v719_v20, %v717_v19  ;;  %v726_v30 = vld [vmem:[#allocation7 + $0x108] sm:$0xff]  ;;  %v728_v31 = vld [vmem:[#allocation7 + $0x118] sm:$0xff] }
  0x7c   :  { %2257 = vmatprep.subr.bf16.mxu1 %v2256_v50  ;;  %v721_v27 = vld [vmem:[#allocation7 + $0xe0] sm:$0xff]  ;;  %v727_v36 = vld [vmem:[#allocation7 + $0x110] sm:$0xff]  ;;  %v122_v37 = vld [vmem:[#allocation2 + $0x88] sm:$0xff] }
  0x7d   :  { %v725_v35 = vld [vmem:[#allocation7 + $0x100] sm:$0xff]  ;;  %v730_v38 = vld [vmem:[#allocation7 + $0x128] sm:$0xff]  ;;  %v732_v39 = vld [vmem:[#allocation7 + $0x138] sm:$0xff] }
  0x7e   :  { %2219 = vmatpush1.bf16.msra.mxu0 %v2218_v56  ;;  %v2258_v56 = vpack.c.bf16 %v703_v52, %v701_v51  ;;  %v2282_v40 = vpack.c.bf16 %v727_v36, %v725_v35  ;;  %v121_v41 = vld [vmem:[#allocation2 + $0x80] sm:$0xff]  ;;  %v2284_v42 = vpack.c.bf16 %v732_v39, %v730_v38  ;;  %v731_v44 = vld [vmem:[#allocation7 + $0x130] sm:$0xff]  ;;  %v124_v45 = vld [vmem:[#allocation2 + $0x98] sm:$0xff] }
  0x7f   :  { %2221 = vmatprep.subr.bf16.mxu0 %v2220_v57  ;;  %v109_v57 = vld [vmem:[#allocation2 + $0x20] sm:$0xff]  ;;  %v734_v46 = vld [vmem:[#allocation7 + $0x148] sm:$0xff]  ;;  %v736_v47 = vld [vmem:[#allocation7 + $0x158] sm:$0xff] }
  0x80   :  { %2259 = vmatpush1.bf16.msra.mxu1 %v2258_v56  ;;  %v729_v43 = vld [vmem:[#allocation7 + $0x120] sm:$0xff]  ;;  %v2288_v50 = vpack.c.bf16 %v736_v47, %v734_v46  ;;  %v735_v52 = vld [vmem:[#allocation7 + $0x150] sm:$0xff]  ;;  %v738_v54 = vld [vmem:[#allocation7 + $0x168] sm:$0xff] }
  0x81   :  { %2261 = vmatprep.subr.bf16.mxu1 %v2260_v58  ;;  %v2286_v48 = vpack.c.bf16 %v731_v44, %v729_v43  ;;  %v733_v51 = vld [vmem:[#allocation7 + $0x140] sm:$0xff]  ;;  %v740_v55 = vld [vmem:[#allocation7 + $0x178] sm:$0xff]  ;;  %v739_v60 = vld [vmem:[#allocation7 + $0x170] sm:$0xff] }
  0x82   :  { %2223 = vmatpush1.bf16.msra.mxu0 %v2222_v62  ;;  %v710_v62 = vld [vmem:[#allocation7 + $0x88] sm:$0xff]  ;;  %v2290_v56 = vpack.c.bf16 %v735_v52, %v733_v51  ;;  %v2292_v58 = vpack.c.bf16 %v740_v55, %v738_v54  ;;  %v737_v59 = vld [vmem:[#allocation7 + $0x160] sm:$0xff]  ;;  %v131_v15 = vld [vmem:[#allocation2 + $0xd0] sm:$0xff] }
  0x83   :  { %2225 = vmatprep.subr.bf16.mxu0 %v2224_v63  ;;  %v712_v63 = vld [vmem:[#allocation7 + $0x98] sm:$0xff]  ;;  %v135_v19 = vld [vmem:[#allocation2 + $0xf0] sm:$0xff]  ;;  %v138_v20 = vld [vmem:[#allocation2 + $0x108] sm:$0xff] }
  0x84   :  { %v2264_v2 = vpack.c.bf16 %v712_v63, %v710_v62  ;;  %2263 = vmatpush1.bf16.msra.mxu1 %v2262_v0  ;;  %v742_v62 = vld [vmem:[#allocation7 + $0x188] sm:$0xff]  ;;  %v744_v63 = vld [vmem:[#allocation7 + $0x198] sm:$0xff]  ;;  %v2294_v0 = vpack.c.bf16 %v739_v60, %v737_v59  ;;  %v749_v35 = vld [vmem:[#allocation7 + $0x1c0] sm:$0xff] }
  0x85   :  { %v751_v36 = vld [vmem:[#allocation7 + $0x1d0] sm:$0xff]  ;;  %v754_v39 = vld [vmem:[#allocation7 + $0x1e8] sm:$0xff]  ;;  %v753_v43 = vld [vmem:[#allocation7 + $0x1e0] sm:$0xff] }
  0x86   :  { %2227 = vmatpush1.bf16.msra.mxu0 %v2226_v4  ;;  %v711_v4 = vld [vmem:[#allocation7 + $0x90] sm:$0xff]  ;;  %2265 = vmatprep.subr.bf16.mxu1 %v2264_v2  ;;  %v2296_v2 = vpack.c.bf16 %v744_v63, %v742_v62  ;;  %v2306_v38 = vpack.c.bf16 %v751_v36, %v749_v35  ;;  %v158_v52 = vld [vmem:[#allocation2 + $0x1a8] sm:$0xff]  ;;  %v160_v54 = vld [vmem:[#allocation2 + $0x1b8] sm:$0xff] }
  0x87   :  { %2229 = vmatprep.subr.bf16.mxu0 %v2228_v5  ;;  %v114_v5 = vld [vmem:[#allocation2 + $0x48] sm:$0xff]  ;;  %v2266_v8 = vpack.c.bf16 %v711_v4, %v709_v3  ;;  %v741_v3 = vld [vmem:[#allocation7 + $0x180] sm:$0xff]  ;;  %v743_v4 = vld [vmem:[#allocation7 + $0x190] sm:$0xff] }
  0x88   :  { %v755_v44 = vld [vmem:[#allocation7 + $0x1f0] sm:$0xff]  ;;  %v166_v60 = vld [vmem:[#allocation2 + $0x1e8] sm:$0xff]  ;;  %v168_v62 = vld [vmem:[#allocation2 + $0x1f8] sm:$0xff] }
  0x89   :  { %2267 = vmatpush1.bf16.msra.mxu1 %v2266_v8  ;;  %v2298_v8 = vpack.c.bf16 %v743_v4, %v741_v3  ;;  %v2310_v46 = vpack.c.bf16 %v755_v44, %v753_v43  ;;  %v151_v47 = vld [vmem:[#allocation2 + $0x170] sm:$0xff]  ;;  %v1281_v3 = vld [vmem:[#allocation8] sm:$0xff] }
  0x8a   :  { %2231 = vmatpush1.bf16.msra.mxu0 %v2230_v10  ;;  %v2268_v10 = vpack.c.bf16 %v716_v7, %v714_v6  ;;  %v746_v6 = vld [vmem:[#allocation7 + $0x1a8] sm:$0xff]  ;;  %v748_v7 = vld [vmem:[#allocation7 + $0x1b8] sm:$0xff]  ;;  %v155_v51 = vld [vmem:[#allocation2 + $0x190] sm:$0xff] }
  0x8b   :  { %2233 = vmatprep.subr.bf16.mxu0 %v2232_v11  ;;  %v713_v11 = vld [vmem:[#allocation7 + $0xa0] sm:$0xff]  ;;  %v159_v55 = vld [vmem:[#allocation2 + $0x1b0] sm:$0xff] }
  0x8c   :  { %2269 = vmatprep.subr.bf16.mxu1 %v2268_v10  ;;  %v2300_v10 = vpack.c.bf16 %v748_v7, %v746_v6  ;;  %v163_v59 = vld [vmem:[#allocation2 + $0x1d0] sm:$0xff]  ;;  %v1286_v6 = vld [vmem:[#allocation8 + $0x28] sm:$0xff]  ;;  %v1288_v7 = vld [vmem:[#allocation8 + $0x38] sm:$0xff] }
  0x8d   :  { %v167_v63 = vld [vmem:[#allocation2 + $0x1f0] sm:$0xff]  ;;  %v1297_v43 = vld [vmem:[#allocation8 + $0x80] sm:$0xff] }
  0x8e   :  { %2235 = vmatpush1.bf16.msra.mxu0 %v2234_v16  ;;  %v2270_v16 = vpack.c.bf16 %v715_v12, %v713_v11  ;;  %v745_v11 = vld [vmem:[#allocation7 + $0x1a0] sm:$0xff]  ;;  %v747_v12 = vld [vmem:[#allocation7 + $0x1b0] sm:$0xff] }
  0x8f   :  { %2237 = vmatprep.subr.bf16.mxu0 %v2236_v17  ;;  %v115_v17 = vld [vmem:[#allocation2 + $0x50] sm:$0xff]  ;;  %v2302_v14 = vpack.c.bf16 %v747_v12, %v745_v11  ;;  %v234_v11 = vlaneseq }
  0x90   :  { %2271 = vmatpush1.bf16.msra.mxu1 %v2270_v16  ;;  %v134_v16 = vld [vmem:[#allocation2 + $0xe8] sm:$0xff]  ;;  %v1283_v4 = vld [vmem:[#allocation8 + $0x10] sm:$0xff] }
  0x91   :  { %2273 = vmatprep.subr.bf16.mxu1 %v2272_v18  ;;  %v136_v18 = vld [vmem:[#allocation2 + $0xf8] sm:$0xff]  ;;  %v1299_v44 = vld [vmem:[#allocation8 + $0x90] sm:$0xff] }
  0x92   :  { %2239 = vmatpush1.bf16.msra.mxu0 %v2238_v22  ;;  %v722_v22 = vld [vmem:[#allocation7 + $0xe8] sm:$0xff] }
  0x93   :  { %2241 = vmatprep.subr.bf16.mxu0 %v2240_v23  ;;  %v724_v23 = vld [vmem:[#allocation7 + $0xf8] sm:$0xff] }
  0x94   :  { %v2276_v26 = vpack.c.bf16 %v724_v23, %v722_v22  ;;  %2275 = vmatpush1.bf16.msra.mxu1 %v2274_v24  ;;  %v140_v22 = vld [vmem:[#allocation2 + $0x118] sm:$0xff]  ;;  %v139_v23 = vld [vmem:[#allocation2 + $0x110] sm:$0xff]  ;;  %v142_v24 = vld [vmem:[#allocation2 + $0x128] sm:$0xff] }
  0x96   :  { %2243 = vmatpush1.bf16.msra.mxu0 %v2242_v28  ;;  %v723_v28 = vld [vmem:[#allocation7 + $0xf0] sm:$0xff]  ;;  %2277 = vmatprep.subr.bf16.mxu1 %v2276_v26  ;;  %v144_v26 = vld [vmem:[#allocation2 + $0x138] sm:$0xff] }
  0x97   :  { %2245 = vmatprep.subr.bf16.mxu0 %v2244_v29  ;;  %v120_v29 = vld [vmem:[#allocation2 + $0x78] sm:$0xff] }
  0x9a   :  { %2247 = vmatpush1.bf16.msra.mxu0 %v2246_v32  ;;  %v2278_v32 = vpack.c.bf16 %v723_v28, %v721_v27  ;;  %v143_v27 = vld [vmem:[#allocation2 + $0x130] sm:$0xff]  ;;  %v146_v28 = vld [vmem:[#allocation2 + $0x148] sm:$0xff] }
  0x9c   :  { %2279 = vmatpush1.bf16.msra.mxu1 %v2278_v32  ;;  %v752_v32 = vld [vmem:[#allocation7 + $0x1d8] sm:$0xff] }
  0x9d   :  { %309 = vmatmul.mubr.f32.vlgmr.msra.gmra.mrb[0].mxu0 %v105_v33  ;;  %v119_v33 = vld [vmem:[#allocation2 + $0x70] sm:$0xff] }
  0x9e   :  { %314 = vmatprep.mubr.f32.mxu0 %v108_v34  ;;  %v2280_v34 = vpack.c.bf16 %v728_v31, %v726_v30  ;;  %v148_v30 = vld [vmem:[#allocation2 + $0x158] sm:$0xff]  ;;  %v750_v31 = vld [vmem:[#allocation7 + $0x1c8] sm:$0xff] }
  0xa0   :  { %2281 = vmatprep.subr.bf16.mxu1 %v2280_v34  ;;  %v2304_v34 = vpack.c.bf16 %v752_v32, %v750_v31 }
  0xa1   :  { %315 = vmatmul.mubr.f32.gmra.mrb[2].mxu0 %v107_v49  ;;  %2283 = vmatpush1.bf16.msra.mxu1 %v2282_v40  ;;  %v123_v49 = vld [vmem:[#allocation2 + $0x90] sm:$0xff]  ;;  %v756_v40 = vld [vmem:[#allocation7 + $0x1f8] sm:$0xff] }
  0xa2   :  { %320 = vmatprep.mubr.f32.mxu0 %v110_v53  ;;  %2285 = vmatprep.subr.bf16.mxu1 %v2284_v42  ;;  %v126_v53 = vld [vmem:[#allocation2 + $0xa8] sm:$0xff]  ;;  %v2308_v42 = vpack.c.bf16 %v756_v40, %v754_v39  ;;  %v1300_v39 = vld [vmem:[#allocation8 + $0x98] sm:$0xff] }
  0xa5   :  { %321 = vmatmul.mubr.f32.gmra.mrb[4].mxu0 %v109_v57  ;;  %2287 = vmatpush1.bf16.msra.mxu1 %v2286_v48  ;;  %v125_v57 = vld [vmem:[#allocation2 + $0xa0] sm:$0xff]  ;;  %v154_v48 = vld [vmem:[#allocation2 + $0x188] sm:$0xff] }
  0xa6   :  { %326 = vmatprep.mubr.f32.mxu0 %v112_v61  ;;  %2289 = vmatprep.subr.bf16.mxu1 %v2288_v50  ;;  %v128_v61 = vld [vmem:[#allocation2 + $0xb8] sm:$0xff] }
  0xa7   :  { %v156_v50 = vld [vmem:[#allocation2 + $0x198] sm:$0xff] }
  0xa9   :  { %327 = vmatmul.mubr.f32.gmra.mrb[6].mxu0 %v111_v1  ;;  %2291 = vmatpush1.bf16.msra.mxu1 %v2290_v56  ;;  %v127_v1 = vld [vmem:[#allocation2 + $0xb0] sm:$0xff]  ;;  %v162_v56 = vld [vmem:[#allocation2 + $0x1c8] sm:$0xff] }
  0xaa   :  { %332 = vmatprep.mubr.f32.mxu0 %v114_v5  ;;  %2293 = vmatprep.subr.bf16.mxu1 %v2292_v58  ;;  %v130_v5 = vld [vmem:[#allocation2 + $0xc8] sm:$0xff]  ;;  %v164_v58 = vld [vmem:[#allocation2 + $0x1d8] sm:$0xff] }
  0xad   :  { %333 = vmatmul.mubr.f32.gmra.mrb[8].mxu0 %v113_v9  ;;  %2295 = vmatpush1.bf16.msra.mxu1 %v2294_v0  ;;  %v129_v9 = vld [vmem:[#allocation2 + $0xc0] sm:$0xff]  ;;  %v1282_v0 = vld [vmem:[#allocation8 + $0x8] sm:$0xff] }
  0xae   :  { %338 = vmatprep.mubr.f32.mxu0 %v116_v13  ;;  %2297 = vmatprep.subr.bf16.mxu1 %v2296_v2  ;;  %v132_v13 = vld [vmem:[#allocation2 + $0xd8] sm:$0xff] }
  0xb1   :  { %339 = vmatmul.mubr.f32.gmra.mrb[10].mxu0 %v115_v17  ;;  %2299 = vmatpush1.bf16.msra.mxu1 %v2298_v8  ;;  %v133_v17 = vld [vmem:[#allocation2 + $0xe0] sm:$0xff]  ;;  %v2316_v8 = vpack.c.bf16 %v1288_v7, %v1286_v6 }
  0xb2   :  { %344 = vmatprep.mubr.f32.mxu0 %v118_v21  ;;  %2301 = vmatprep.subr.bf16.mxu1 %v2300_v10  ;;  %v137_v21 = vld [vmem:[#allocation2 + $0x100] sm:$0xff]  ;;  %v1287_v10 = vld [vmem:[#allocation8 + $0x30] sm:$0xff] }
  0xb5   :  { %345 = vmatmul.mubr.f32.gmra.mrb[12].mxu0 %v117_v25  ;;  %2303 = vmatpush1.bf16.msra.mxu1 %v2302_v14  ;;  %v141_v25 = vld [vmem:[#allocation2 + $0x120] sm:$0xff]  ;;  %v1290_v14 = vld [vmem:[#allocation8 + $0x48] sm:$0xff] }
  0xb6   :  { %350 = vmatprep.mubr.f32.mxu0 %v120_v29  ;;  %v145_v29 = vld [vmem:[#allocation2 + $0x140] sm:$0xff]  ;;  %2305 = vmatprep.subr.bf16.mxu1 %v2304_v34 }
  0xb9   :  { %351 = vmatmul.mubr.f32.gmra.mrb[14].mxu0 %v119_v33  ;;  %v147_v33 = vld [vmem:[#allocation2 + $0x150] sm:$0xff]  ;;  %2307 = vmatpush1.bf16.msra.mxu1 %v2306_v38  ;;  %v1298_v38 = vld [vmem:[#allocation8 + $0x88] sm:$0xff] }
  0xba   :  { %356 = vmatprep.mubr.f32.mxu0 %v122_v37  ;;  %v150_v37 = vld [vmem:[#allocation2 + $0x168] sm:$0xff]  ;;  %2309 = vmatprep.subr.bf16.mxu1 %v2308_v42  ;;  %v2328_v42 = vpack.c.bf16 %v1300_v39, %v1298_v38 }
  0xbd   :  { %357 = vmatmul.mubr.f32.gmra.mrb[16].mxu0 %v121_v41  ;;  %v149_v41 = vld [vmem:[#allocation2 + $0x160] sm:$0xff]  ;;  %2311 = vmatpush1.bf16.msra.mxu1 %v2310_v46 }
  0xbe   :  { %362 = vmatprep.mubr.f32.mxu0 %v124_v45  ;;  %v152_v45 = vld [vmem:[#allocation2 + $0x178] sm:$0xff] }
  0xc1   :  { %363 = vmatmul.mubr.f32.gmra.mrb[18].mxu0 %v123_v49  ;;  %v153_v49 = vld [vmem:[#allocation2 + $0x180] sm:$0xff] }
  0xc2   :  { %368 = vmatprep.mubr.f32.mxu0 %v126_v53  ;;  %v157_v53 = vld [vmem:[#allocation2 + $0x1a0] sm:$0xff] }
  0xc5   :  { %369 = vmatmul.mubr.f32.gmra.mrb[20].mxu0 %v125_v57  ;;  %v161_v57 = vld [vmem:[#allocation2 + $0x1c0] sm:$0xff] }
  0xc6   :  { %374 = vmatprep.mubr.f32.mxu0 %v128_v61  ;;  %v165_v61 = vld [vmem:[#allocation2 + $0x1e0] sm:$0xff] }
  0xc9   :  { %375 = vmatmul.mubr.f32.gmra.mrb[22].mxu0 %v127_v1  ;;  %v1284_v1 = vld [vmem:[#allocation8 + $0x18] sm:$0xff] }
  0xca   :  { %380 = vmatprep.mubr.f32.mxu0 %v130_v5  ;;  %v2312_v2 = vpack.c.bf16 %v1284_v1, %v1282_v0  ;;  %v2314_v5 = vpack.c.bf16 %v1283_v4, %v1281_v3  ;;  %v1307_v0 = vld [vmem:[#allocation8 + $0xd0] sm:$0xff]  ;;  %v1310_v3 = vld [vmem:[#allocation8 + $0xe8] sm:$0xff]  ;;  %v1312_v4 = vld [vmem:[#allocation8 + $0xf8] sm:$0xff] }
  0xcc   :  { %2313 = vmatprep.subr.bf16.mxu0 %v2312_v2 }
  0xcd   :  { %381 = vmatmul.mubr.f32.gmra.mrb[24].mxu0 %v129_v9  ;;  %v1285_v9 = vld [vmem:[#allocation8 + $0x20] sm:$0xff] }
  0xce   :  { %386 = vmatprep.mubr.f32.mxu0 %v132_v13  ;;  %2315 = vmatpush1.bf16.msra.mxu0 %v2314_v5  ;;  %v2318_v12 = vpack.c.bf16 %v1287_v10, %v1285_v9  ;;  %v235_v13 = vshrl.u32 %v234_v11, 7 }
  0xcf   :  { %2317 = vmatprep.subr.bf16.mxu0 %v2316_v8 }
  0xd1   :  { %387 = vmatmul.mubr.f32.gmra.mrb[26].mxu0 %v131_v15  ;;  %v1292_v15 = vld [vmem:[#allocation8 + $0x58] sm:$0xff] }
  0xd2   :  { %392 = vmatprep.mubr.f32.mxu0 %v134_v16  ;;  %2319 = vmatpush1.bf16.msra.mxu0 %v2318_v12  ;;  %v2320_v16 = vpack.c.bf16 %v1292_v15, %v1290_v14  ;;  %v2340_v12 = vpack.c.bf16 %v1312_v4, %v1310_v3  ;;  %v1311_v14 = vld [vmem:[#allocation8 + $0xf0] sm:$0xff]  ;;  %v1328_v3 = vld [vmem:[#allocation8 + $0x178] sm:$0xff] }
  0xd4   :  { %2321 = vmatprep.subr.bf16.mxu0 %v2320_v16 }
  0xd5   :  { %393 = vmatmul.mubr.f32.gmra.mrb[28].mxu0 %v133_v17  ;;  %v1289_v17 = vld [vmem:[#allocation8 + $0x40] sm:$0xff] }
  0xd6   :  { %398 = vmatprep.mubr.f32.mxu0 %v136_v18  ;;  %v1291_v18 = vld [vmem:[#allocation8 + $0x50] sm:$0xff] }
  0xd9   :  { %399 = vmatmul.mubr.f32.gmra.mrb[30].mxu0 %v135_v19  ;;  %v2725_v19 = vsub.s32 0, %v235_v13 }
  0xda   :  { %404 = vmatprep.mubr.f32.mxu0 %v138_v20  ;;  %v2322_v20 = vpack.c.bf16 %v1291_v18, %v1289_v17  ;;  %v1314_v17 = vld [vmem:[#allocation8 + $0x108] sm:$0xff]  ;;  %v1316_v18 = vld [vmem:[#allocation8 + $0x118] sm:$0xff] }
  0xdb   :  { %3584 = vst [vmem:[#allocation16_spill] sm:$0xff] %v2725_v19 }
  0xdc   :  { %2323 = vmatpush1.bf16.msra.mxu0 %v2322_v20 }
  0xdd   :  { %405 = vmatmul.mubr.f32.gmra.mrb[32].mxu0 %v137_v21  ;;  %v101_v21 = vld [vmem:[%s3531_s2] sm:$0x3] }
  0xde   :  { %410 = vmatprep.mubr.f32.mxu0 %v140_v22  ;;  %v2730_v22 = vsub.s32 1, %v235_v13  ;;  %v1309_v13 = vld [vmem:[#allocation8 + $0xe0] sm:$0xff] }
  0xe0   :  { %3585 = vst [vmem:[#allocation17_spill] sm:$0xff] %v2730_v22 }
  0xe1   :  { %411 = vmatmul.mubr.f32.gmra.mrb[34].mxu0 %v139_v23  ;;  %v2733_v23 = vrot.slane %v101_v21, %v2725_v19 }
  0xe2   :  { %416 = vmatprep.mubr.f32.mxu0 %v142_v24  ;;  %v2736_v24 = vrot.slane %v101_v21, %v2730_v22 }
  0xe5   :  { %417 = vmatmul.mubr.f32.gmra.mrb[36].mxu0 %v141_v25  ;;  %v1294_v25 = vld [vmem:[#allocation8 + $0x68] sm:$0xff] }
  0xe6   :  { %422 = vmatprep.mubr.f32.mxu0 %v144_v26  ;;  %v1296_v26 = vld [vmem:[#allocation8 + $0x78] sm:$0xff] }
  0xe9   :  { %423 = vmatmul.mubr.f32.gmra.mrb[38].mxu0 %v143_v27 }
  0xea   :  { %428 = vmatprep.mubr.f32.mxu0 %v146_v28  ;;  %v2324_v28 = vpack.c.bf16 %v1296_v26, %v1294_v25 }
  0xec   :  { %2325 = vmatprep.subr.bf16.mxu0 %v2324_v28 }
  0xed   :  { %429 = vmatmul.mubr.f32.gmra.mrb[40].mxu0 %v145_v29  ;;  %v1293_v29 = vld [vmem:[#allocation8 + $0x60] sm:$0xff] }
  0xee   :  { %434 = vmatprep.mubr.f32.mxu0 %v148_v30  ;;  %v1295_v30 = vld [vmem:[#allocation8 + $0x70] sm:$0xff] }
  0xf1   :  { %435 = vmatmul.mubr.f32.gmra.mrb[42].mxu0 %v147_v33  ;;  %v2326_v33 = vpack.c.bf16 %v1295_v30, %v1293_v29  ;;  %v2344_v30 = vpack.c.bf16 %v1316_v18, %v1314_v17  ;;  %v1330_v18 = vld [vmem:[#allocation8 + $0x188] sm:$0xff] }
  0xf2   :  { %440 = vmatprep.mubr.f32.mxu0 %v150_v37 }
  0xf3   :  { %2327 = vmatpush1.bf16.msra.mxu0 %v2326_v33 }
  0xf4   :  { %2329 = vmatprep.subr.bf16.mxu0 %v2328_v42 }
  0xf5   :  { %441 = vmatmul.mubr.f32.gmra.mrb[44].mxu0 %v149_v41 }
  0xf6   :  { %446 = vmatprep.mubr.f32.mxu0 %v152_v45  ;;  %v1302_v45 = vld [vmem:[#allocation8 + $0xa8] sm:$0xff] }
  0xf9   :  { %447 = vmatmul.mubr.f32.gmra.mrb[46].mxu0 %v151_v47 }
  0xfa   :  { %452 = vmatprep.mubr.f32.mxu0 %v154_v48  ;;  %v2330_v48 = vpack.c.bf16 %v1299_v44, %v1297_v43 }
  0xfc   :  { %2331 = vmatpush1.bf16.msra.mxu0 %v2330_v48 }
  0xfd   :  { %453 = vmatmul.mubr.f32.gmra.mrb[48].mxu0 %v153_v49  ;;  %v1304_v49 = vld [vmem:[#allocation8 + $0xb8] sm:$0xff] }
  0xfe   :  { %458 = vmatprep.mubr.f32.mxu0 %v156_v50  ;;  %v1301_v50 = vld [vmem:[#allocation8 + $0xa0] sm:$0xff] }
 0x101   :  { %459 = vmatmul.mubr.f32.gmra.mrb[50].mxu0 %v155_v51  ;;  %v1303_v51 = vld [vmem:[#allocation8 + $0xb0] sm:$0xff] }
 0x102   :  { %464 = vmatprep.mubr.f32.mxu0 %v158_v52 }
 0x105   :  { %465 = vmatmul.mubr.f32.gmra.mrb[52].mxu0 %v157_v53 }
 0x106   :  { %470 = vmatprep.mubr.f32.mxu0 %v160_v54  ;;  %v2332_v54 = vpack.c.bf16 %v1304_v49, %v1302_v45  ;;  %v1317_v45 = vld [vmem:[#allocation8 + $0x120] sm:$0xff] }
 0x108   :  { %2333 = vmatprep.subr.bf16.mxu0 %v2332_v54 }
 0x109   :  { %471 = vmatmul.mubr.f32.gmra.mrb[54].mxu0 %v159_v55  ;;  %v1306_v55 = vld [vmem:[#allocation8 + $0xc8] sm:$0xff] }
 0x10a   :  { %476 = vmatprep.mubr.f32.mxu0 %v162_v56  ;;  %v1308_v56 = vld [vmem:[#allocation8 + $0xd8] sm:$0xff] }
 0x10d   :  { %477 = vmatmul.mubr.f32.gmra.mrb[56].mxu0 %v161_v57 }
 0x10e   :  { %482 = vmatprep.mubr.f32.mxu0 %v164_v58 }
 0x111   :  { %483 = vmatmul.mubr.f32.gmra.mrb[58].mxu0 %v163_v59  ;;  %v2334_v59 = vpack.c.bf16 %v1303_v51, %v1301_v50  ;;  %v1322_v50 = vld [vmem:[#allocation8 + $0x148] sm:$0xff]  ;;  %v1324_v51 = vld [vmem:[#allocation8 + $0x158] sm:$0xff] }
 0x112   :  { %488 = vmatprep.mubr.f32.mxu0 %v166_v60 }
 0x113   :  { %2335 = vmatpush1.bf16.msra.mxu0 %v2334_v59 }
 0x115   :  { %489 = vmatmul.mubr.f32.gmra.mrb[60].mxu0 %v165_v61 }
 0x116   :  { %494 = vmatprep.mubr.f32.mxu0 %v168_v62  ;;  %v2336_v62 = vpack.c.bf16 %v1308_v56, %v1306_v55 }
 0x118   :  { %2337 = vmatprep.subr.bf16.mxu0 %v2336_v62  ;;  %v1323_v62 = vld [vmem:[#allocation8 + $0x150] sm:$0xff] }
 0x119   :  { %495 = vmatmul.mubr.f32.gmra.mrb[62].mxu0 %v167_v63  ;;  %v1305_v63 = vld [vmem:[#allocation8 + $0xc0] sm:$0xff] }
 0x11a   :  { %v2338_v9 = vpack.c.bf16 %v1307_v0, %v1305_v63 }
 0x11c   :  { %2339 = vmatpush1.bf16.msra.mxu0 %v2338_v9 }
 0x11d   :  { %2341 = vmatprep.subr.bf16.mxu0 %v2340_v12 }
 0x170   :  { %v310_v27 = vpop.f32.mrb[0].mxu0 }
 0x171   :  { %v311_v31 = vadd.f32 %v310_v27, %v2733_v23  ;;  %v312_v32 = vpop.f32.mrb[1].mxu0  ;;  %v2342_v27 = vpack.c.bf16 %v1311_v14, %v1309_v13  ;;  %v1325_v13 = vld [vmem:[#allocation8 + $0x160] sm:$0xff]  ;;  %v1327_v14 = vld [vmem:[#allocation8 + $0x170] sm:$0xff] }
 0x172   :  { %v313_v34 = vadd.f32 %v312_v32, %v2736_v24  ;;  %v1315_v32 = vld [vmem:[#allocation8 + $0x110] sm:$0xff] }
 0x173   :  { %v565_v35 = vmul.f32 0.01, %v311_v31  ;;  %vm501_vm0 = vcmp.gt.f32.partialorder %v311_v31, 0.0  ;;  %2343 = vmatpush1.bf16.msra.mxu0 %v2342_v27 }
 0x174   :  { %v316_v36 = vpop.f32.mrb[2].mxu0  ;;  %vm502_vm1 = vcmp.gt.f32.partialorder %v313_v34, 0.0  ;;  %v566_v37 = vmul.f32 0.01, %v313_v34  ;;  %2345 = vmatprep.subr.bf16.mxu0 %v2344_v30 }
 0x175   :  { %v317_v40 = vadd.f32 %v316_v36, %v2733_v23  ;;  %v318_v41 = vpop.f32.mrb[3].mxu0  ;;  %v2746_v53 = vsel %vm501_vm0, %v311_v31, %v565_v35  ;;  %v1313_v31 = vld [vmem:[#allocation8 + $0x100] sm:$0xff]  ;;  %v1318_v35 = vld [vmem:[#allocation8 + $0x128] sm:$0xff]  ;;  %v1320_v36 = vld [vmem:[#allocation8 + $0x138] sm:$0xff] }
 0x176   :  { %v319_v46 = vadd.f32 %v318_v41, %v2736_v24  ;;  %v2742_v47 = vsel %vm502_vm1, %v313_v34, %v566_v37  ;;  %v2346_v41 = vpack.c.bf16 %v1315_v32, %v1313_v31  ;;  %v2348_v44 = vpack.c.bf16 %v1320_v36, %v1318_v35  ;;  %v1331_v35 = vld [vmem:[#allocation8 + $0x190] sm:$0xff] }
 0x177   :  { %v567_v52 = vmul.f32 0.01, %v317_v40  ;;  %832 = vmatprep.mubr.f32.mxu1 %v2742_v47  ;;  %vm503_vm3 = vcmp.gt.f32.partialorder %v317_v40, 0.0 }
 0x178   :  { %v568_v57 = vmul.f32 0.01, %v319_v46  ;;  %v322_v58 = vpop.f32.mrb[4].mxu0  ;;  %833 = vmatmul.mubr.f32.vlgmr.msra.gmra.mrb[0].mxu1 %v2746_v53  ;;  %vm504_vm2 = vcmp.gt.f32.partialorder %v319_v46, 0.0  ;;  %2347 = vmatpush1.bf16.msra.mxu0 %v2346_v41 }
 0x179   :  { %v323_v60 = vadd.f32 %v322_v58, %v2733_v23  ;;  %v324_v61 = vpop.f32.mrb[5].mxu0  ;;  %v2754_v6 = vsel %vm503_vm3, %v317_v40, %v567_v52  ;;  %2349 = vmatprep.subr.bf16.mxu0 %v2348_v44 }
 0x17a   :  { %v325_v1 = vadd.f32 %v324_v61, %v2736_v24  ;;  %v2751_v2 = vsel %vm504_vm2, %v319_v46, %v568_v57  ;;  %v1319_v46 = vld [vmem:[#allocation8 + $0x130] sm:$0xff]  ;;  %v1321_v61 = vld [vmem:[#allocation8 + $0x140] sm:$0xff] }
 0x17b   :  { %v569_v5 = vmul.f32 0.01, %v323_v60  ;;  %838 = vmatprep.mubr.f32.mxu1 %v2751_v2  ;;  %vm505_vm5 = vcmp.gt.f32.partialorder %v323_v60, 0.0  ;;  %v2350_v57 = vpack.c.bf16 %v1319_v46, %v1317_v45  ;;  %v2354_v9 = vpack.c.bf16 %v1323_v62, %v1321_v61 }
 0x17c   :  { %v570_v7 = vmul.f32 0.01, %v325_v1  ;;  %v328_v8 = vpop.f32.mrb[6].mxu0  ;;  %839 = vmatmul.mubr.f32.gmra.mrb[2].mxu1 %v2754_v6  ;;  %vm506_vm4 = vcmp.gt.f32.partialorder %v325_v1, 0.0 }
 0x17d   :  { %v329_v10 = vadd.f32 %v328_v8, %v2733_v23  ;;  %v330_v11 = vpop.f32.mrb[7].mxu0  ;;  %v2762_v21 = vsel %vm505_vm5, %v323_v60, %v569_v5  ;;  %v2352_v60 = vpack.c.bf16 %v1324_v51, %v1322_v50  ;;  %2351 = vmatpush1.bf16.msra.mxu0 %v2350_v57  ;;  %v1333_v51 = vld [vmem:[#allocation8 + $0x1a0] sm:$0xff]  ;;  %v1338_v57 = vld [vmem:[#allocation8 + $0x1c8] sm:$0xff] }
 0x17e   :  { %v331_v15 = vadd.f32 %v330_v11, %v2736_v24  ;;  %v2759_v16 = vsel %vm506_vm4, %v325_v1, %v570_v7  ;;  %v1326_v1 = vld [vmem:[#allocation8 + $0x168] sm:$0xff] }
 0x17f   :  { %v571_v20 = vmul.f32 0.01, %v329_v10  ;;  %844 = vmatprep.mubr.f32.mxu1 %v2759_v16  ;;  %vm507_vm7 = vcmp.gt.f32.partialorder %v329_v10, 0.0  ;;  %2353 = vmatprep.subr.bf16.mxu0 %v2352_v60  ;;  %v2356_v12 = vpack.c.bf16 %v1328_v3, %v1326_v1 }
 0x180   :  { %v572_v25 = vmul.f32 0.01, %v331_v15  ;;  %v334_v26 = vpop.f32.mrb[8].mxu0  ;;  %845 = vmatmul.mubr.f32.gmra.mrb[4].mxu1 %v2762_v21  ;;  %vm508_vm6 = vcmp.gt.f32.partialorder %v331_v15, 0.0 }
 0x181   :  { %v335_v28 = vadd.f32 %v334_v26, %v2733_v23  ;;  %v336_v29 = vpop.f32.mrb[9].mxu0  ;;  %v2770_v38 = vsel %vm507_vm7, %v329_v10, %v571_v20  ;;  %v1332_v20 = vld [vmem:[#allocation8 + $0x198] sm:$0xff]  ;;  %2355 = vmatpush1.bf16.msra.mxu0 %v2354_v9 }
 0x182   :  { %v337_v33 = vadd.f32 %v336_v29, %v2736_v24  ;;  %v2767_v34 = vsel %vm508_vm6, %v331_v15, %v572_v25  ;;  %v2358_v29 = vpack.c.bf16 %v1327_v14, %v1325_v13  ;;  %2357 = vmatprep.subr.bf16.mxu0 %v2356_v12  ;;  %v2360_v32 = vpack.c.bf16 %v1332_v20, %v1330_v18 }
 0x183   :  { %v573_v37 = vmul.f32 0.01, %v335_v28  ;;  %850 = vmatprep.mubr.f32.mxu1 %v2767_v34  ;;  %vm509_vm9 = vcmp.gt.f32.partialorder %v335_v28, 0.0 }
 0x184   :  { %v574_v39 = vmul.f32 0.01, %v337_v33  ;;  %v340_v40 = vpop.f32.mrb[10].mxu0  ;;  %851 = vmatmul.mubr.f32.gmra.mrb[6].mxu1 %v2770_v38  ;;  %vm510_vm8 = vcmp.gt.f32.partialorder %v337_v33, 0.0 }
 0x185   :  { %v341_v42 = vadd.f32 %v340_v40, %v2733_v23  ;;  %v342_v43 = vpop.f32.mrb[11].mxu0  ;;  %v2778_v54 = vsel %vm509_vm9, %v335_v28, %v573_v37  ;;  %v1336_v40 = vld [vmem:[#allocation8 + $0x1b8] sm:$0xff]  ;;  %2359 = vmatpush1.bf16.msra.mxu0 %v2358_v29 }
 0x186   :  { %v343_v48 = vadd.f32 %v342_v43, %v2736_v24  ;;  %v2775_v49 = vsel %vm510_vm8, %v337_v33, %v574_v39  ;;  %v1329_v33 = vld [vmem:[#allocation8 + $0x180] sm:$0xff]  ;;  %v1334_v39 = vld [vmem:[#allocation8 + $0x1a8] sm:$0xff]  ;;  %2361 = vmatprep.subr.bf16.mxu0 %v2360_v32 }
 0x187   :  { %v575_v52 = vmul.f32 0.01, %v341_v42  ;;  %856 = vmatprep.mubr.f32.mxu1 %v2775_v49  ;;  %vm511_vm11 = vcmp.gt.f32.partialorder %v341_v42, 0.0  ;;  %v2362_v45 = vpack.c.bf16 %v1331_v35, %v1329_v33  ;;  %v2364_v50 = vpack.c.bf16 %v1336_v40, %v1334_v39 }
 0x188   :  { %v576_v55 = vmul.f32 0.01, %v343_v48  ;;  %v346_v56 = vpop.f32.mrb[12].mxu0  ;;  %857 = vmatmul.mubr.f32.gmra.mrb[8].mxu1 %v2778_v54  ;;  %vm512_vm10 = vcmp.gt.f32.partialorder %v343_v48, 0.0 }
 0x189   :  { %v347_v58 = vadd.f32 %v346_v56, %v2733_v23  ;;  %v348_v59 = vpop.f32.mrb[13].mxu0  ;;  %v2786_v5 = vsel %vm511_vm11, %v341_v42, %v575_v52  ;;  %v1335_v52 = vld [vmem:[#allocation8 + $0x1b0] sm:$0xff]  ;;  %2363 = vmatpush1.bf16.msra.mxu0 %v2362_v45 }
 0x18a   :  { %v349_v63 = vadd.f32 %v348_v59, %v2736_v24  ;;  %v2783_v0 = vsel %vm512_vm10, %v343_v48, %v576_v55  ;;  %2365 = vmatprep.subr.bf16.mxu0 %v2364_v50 }
 0x18b   :  { %v577_v4 = vmul.f32 0.01, %v347_v58  ;;  %862 = vmatprep.mubr.f32.mxu1 %v2783_v0  ;;  %vm513_vm13 = vcmp.gt.f32.partialorder %v347_v58, 0.0 }
 0x18c   :  { %v578_v7 = vmul.f32 0.01, %v349_v63  ;;  %v352_v8 = vpop.f32.mrb[14].mxu0  ;;  %863 = vmatmul.mubr.f32.gmra.mrb[10].mxu1 %v2786_v5  ;;  %vm514_vm12 = vcmp.gt.f32.partialorder %v349_v63, 0.0 }
 0x18d   :  { %v353_v10 = vadd.f32 %v352_v8, %v2733_v23  ;;  %v354_v11 = vpop.f32.mrb[15].mxu0  ;;  %v2794_v26 = vsel %vm513_vm13, %v347_v58, %v577_v4  ;;  %v1340_v58 = vld [vmem:[#allocation8 + $0x1d8] sm:$0xff]  ;;  %v1339_v8 = vld [vmem:[#allocation8 + $0x1d0] sm:$0xff] }
 0x18e   :  { %v355_v15 = vadd.f32 %v354_v11, %v2736_v24  ;;  %v2791_v17 = vsel %vm514_vm12, %v349_v63, %v578_v7  ;;  %v2366_v63 = vpack.c.bf16 %v1335_v52, %v1333_v51  ;;  %v2368_v4 = vpack.c.bf16 %v1340_v58, %v1338_v57  ;;  %v1337_v7 = vld [vmem:[#allocation8 + $0x1c0] sm:$0xff] }
 0x18f   :  { %v579_v25 = vmul.f32 0.01, %v353_v10  ;;  %868 = vmatprep.mubr.f32.mxu1 %v2791_v17  ;;  %vm515_vm15 = vcmp.gt.f32.partialorder %v353_v10, 0.0 }
 0x190   :  { %v580_v27 = vmul.f32 0.01, %v355_v15  ;;  %v358_v28 = vpop.f32.mrb[16].mxu0  ;;  %869 = vmatmul.mubr.f32.gmra.mrb[12].mxu1 %v2794_v26  ;;  %vm516_vm14 = vcmp.gt.f32.partialorder %v355_v15, 0.0  ;;  %2367 = vmatpush1.bf16.msra.mxu0 %v2366_v63 }
 0x191   :  { %v359_v30 = vadd.f32 %v358_v28, %v2733_v23  ;;  %v360_v31 = vpop.f32.mrb[17].mxu0  ;;  %v2802_v42 = vsel %vm515_vm15, %v353_v10, %v579_v25  ;;  %2369 = vmatprep.subr.bf16.mxu0 %v2368_v4 }
 0x192   :  { %v361_v36 = vadd.f32 %v360_v31, %v2736_v24  ;;  %v2799_v37 = vsel %vm516_vm14, %v355_v15, %v580_v27  ;;  %v2370_v15 = vpack.c.bf16 %v1339_v8, %v1337_v7 }
 0x193   :  { %v581_v41 = vmul.f32 0.01, %v359_v30  ;;  %874 = vmatprep.mubr.f32.mxu1 %v2799_v37  ;;  %vm517_vm1 = vcmp.gt.f32.partialorder %v359_v30, 0.0 }
 0x194   :  { %v582_v43 = vmul.f32 0.01, %v361_v36  ;;  %v364_v44 = vpop.f32.mrb[18].mxu0  ;;  %875 = vmatmul.mubr.f32.gmra.mrb[14].mxu1 %v2802_v42  ;;  %vm518_vm0 = vcmp.gt.f32.partialorder %v361_v36, 0.0  ;;  %2371 = vmatpush1.bf16.msra.mxu0 %v2370_v15 }
 0x195   :  { %v365_v46 = vadd.f32 %v364_v44, %v2733_v23  ;;  %v366_v48 = vpop.f32.mrb[19].mxu0  ;;  %v2810_v60 = vsel %vm517_vm1, %v359_v30, %v581_v41 }
 0x196   :  { %v367_v55 = vadd.f32 %v366_v48, %v2736_v24  ;;  %v2807_v56 = vsel %vm518_vm0, %v361_v36, %v582_v43 }
 0x197   :  { %v583_v59 = vmul.f32 0.01, %v365_v46  ;;  %880 = vmatprep.mubr.f32.mxu1 %v2807_v56  ;;  %vm519_vm3 = vcmp.gt.f32.partialorder %v365_v46, 0.0 }
 0x198   :  { %v584_v61 = vmul.f32 0.01, %v367_v55  ;;  %v370_v62 = vpop.f32.mrb[20].mxu0  ;;  %881 = vmatmul.mubr.f32.gmra.mrb[16].mxu1 %v2810_v60  ;;  %vm520_vm2 = vcmp.gt.f32.partialorder %v367_v55, 0.0 }
 0x199   :  { %v371_v1 = vadd.f32 %v370_v62, %v2733_v23  ;;  %v372_v3 = vpop.f32.mrb[21].mxu0  ;;  %v2818_v12 = vsel %vm519_vm3, %v365_v46, %v583_v59 }
 0x19a   :  { %v373_v9 = vadd.f32 %v372_v3, %v2736_v24  ;;  %v2815_v10 = vsel %vm520_vm2, %v367_v55, %v584_v61 }
 0x19b   :  { %v585_v11 = vmul.f32 0.01, %v371_v1  ;;  %886 = vmatprep.mubr.f32.mxu1 %v2815_v10  ;;  %vm521_vm5 = vcmp.gt.f32.partialorder %v371_v1, 0.0 }
 0x19c   :  { %v586_v13 = vmul.f32 0.01, %v373_v9  ;;  %v376_v14 = vpop.f32.mrb[22].mxu0  ;;  %887 = vmatmul.mubr.f32.gmra.mrb[18].mxu1 %v2818_v12  ;;  %vm522_vm4 = vcmp.gt.f32.partialorder %v373_v9, 0.0 }
 0x19d   :  { %v377_v18 = vadd.f32 %v376_v14, %v2733_v23  ;;  %v378_v20 = vpop.f32.mrb[23].mxu0  ;;  %v2826_v29 = vsel %vm521_vm5, %v371_v1, %v585_v11 }
 0x19e   :  { %v379_v25 = vadd.f32 %v378_v20, %v2736_v24  ;;  %v2823_v27 = vsel %vm522_vm4, %v373_v9, %v586_v13 }
 0x19f   :  { %v587_v28 = vmul.f32 0.01, %v377_v18  ;;  %892 = vmatprep.mubr.f32.mxu1 %v2823_v27  ;;  %vm523_vm7 = vcmp.gt.f32.partialorder %v377_v18, 0.0 }
 0x1a0   :  { %v588_v30 = vmul.f32 0.01, %v379_v25  ;;  %v382_v31 = vpop.f32.mrb[24].mxu0  ;;  %893 = vmatmul.mubr.f32.gmra.mrb[20].mxu1 %v2826_v29  ;;  %vm524_vm6 = vcmp.gt.f32.partialorder %v379_v25, 0.0 }
 0x1a1   :  { %v383_v32 = vadd.f32 %v382_v31, %v2733_v23  ;;  %v384_v33 = vpop.f32.mrb[25].mxu0  ;;  %v2834_v40 = vsel %vm523_vm7, %v377_v18, %v587_v28 }
 0x1a2   :  { %v385_v35 = vadd.f32 %v384_v33, %v2736_v24  ;;  %v2831_v36 = vsel %vm524_vm6, %v379_v25, %v588_v30 }
 0x1a3   :  { %v589_v39 = vmul.f32 0.01, %v383_v32  ;;  %898 = vmatprep.mubr.f32.mxu1 %v2831_v36  ;;  %vm525_vm9 = vcmp.gt.f32.partialorder %v383_v32, 0.0 }
 0x1a4   :  { %v590_v41 = vmul.f32 0.01, %v385_v35  ;;  %v388_v43 = vpop.f32.mrb[26].mxu0  ;;  %899 = vmatmul.mubr.f32.gmra.mrb[22].mxu1 %v2834_v40  ;;  %vm526_vm8 = vcmp.gt.f32.partialorder %v385_v35, 0.0 }
 0x1a5   :  { %v389_v44 = vadd.f32 %v388_v43, %v2733_v23  ;;  %v390_v45 = vpop.f32.mrb[27].mxu0  ;;  %v2842_v51 = vsel %vm525_vm9, %v383_v32, %v589_v39 }
 0x1a6   :  { %v391_v46 = vadd.f32 %v390_v45, %v2736_v24  ;;  %v2839_v48 = vsel %vm526_vm8, %v385_v35, %v590_v41 }
 0x1a7   :  { %v591_v50 = vmul.f32 0.01, %v389_v44  ;;  %904 = vmatprep.mubr.f32.mxu1 %v2839_v48  ;;  %vm527_vm11 = vcmp.gt.f32.partialorder %v389_v44, 0.0 }
 0x1a8   :  { %v592_v52 = vmul.f32 0.01, %v391_v46  ;;  %v394_v55 = vpop.f32.mrb[28].mxu0  ;;  %905 = vmatmul.mubr.f32.gmra.mrb[24].mxu1 %v2842_v51  ;;  %vm528_vm10 = vcmp.gt.f32.partialorder %v391_v46, 0.0 }
 0x1a9   :  { %v395_v57 = vadd.f32 %v394_v55, %v2733_v23  ;;  %v396_v58 = vpop.f32.mrb[29].mxu0  ;;  %v2850_v63 = vsel %vm527_vm11, %v389_v44, %v591_v50 }
 0x1aa   :  { %v397_v59 = vadd.f32 %v396_v58, %v2736_v24  ;;  %v2847_v61 = vsel %vm528_vm10, %v391_v46, %v592_v52 }
 0x1ab   :  { %v593_v62 = vmul.f32 0.01, %v395_v57  ;;  %910 = vmatprep.mubr.f32.mxu1 %v2847_v61  ;;  %vm529_vm13 = vcmp.gt.f32.partialorder %v395_v57, 0.0 }
 0x1ac   :  { %v594_v1 = vmul.f32 0.01, %v397_v59  ;;  %v400_v3 = vpop.f32.mrb[30].mxu0  ;;  %911 = vmatmul.mubr.f32.gmra.mrb[26].mxu1 %v2850_v63  ;;  %vm530_vm12 = vcmp.gt.f32.partialorder %v397_v59, 0.0 }
 0x1ad   :  { %v401_v4 = vadd.f32 %v400_v3, %v2733_v23  ;;  %v402_v7 = vpop.f32.mrb[31].mxu0  ;;  %v2858_v13 = vsel %vm529_vm13, %v395_v57, %v593_v62 }
 0x1ae   :  { %v403_v8 = vadd.f32 %v402_v7, %v2736_v24  ;;  %v2855_v9 = vsel %vm530_vm12, %v397_v59, %v594_v1 }
 0x1af   :  { %v595_v11 = vmul.f32 0.01, %v401_v4  ;;  %916 = vmatprep.mubr.f32.mxu1 %v2855_v9  ;;  %vm531_vm15 = vcmp.gt.f32.partialorder %v401_v4, 0.0 }
 0x1b0   :  { %v596_v14 = vmul.f32 0.01, %v403_v8  ;;  %v406_v15 = vpop.f32.mrb[32].mxu0  ;;  %917 = vmatmul.mubr.f32.gmra.mrb[28].mxu1 %v2858_v13  ;;  %vm532_vm14 = vcmp.gt.f32.partialorder %v403_v8, 0.0 }
 0x1b1   :  { %v407_v18 = vadd.f32 %v406_v15, %v2733_v23  ;;  %v408_v20 = vpop.f32.mrb[33].mxu0  ;;  %v2866_v31 = vsel %vm531_vm15, %v401_v4, %v595_v11 }
 0x1b2   :  { %v409_v25 = vadd.f32 %v408_v20, %v2736_v24  ;;  %v2863_v28 = vsel %vm532_vm14, %v403_v8, %v596_v14 }
 0x1b3   :  { %v597_v30 = vmul.f32 0.01, %v407_v18  ;;  %922 = vmatprep.mubr.f32.mxu1 %v2863_v28  ;;  %vm533_vm1 = vcmp.gt.f32.partialorder %v407_v18, 0.0 }
 0x1b4   :  { %v598_v32 = vmul.f32 0.01, %v409_v25  ;;  %v412_v33 = vpop.f32.mrb[34].mxu0  ;;  %923 = vmatmul.mubr.f32.gmra.mrb[30].mxu1 %v2866_v31  ;;  %vm534_vm0 = vcmp.gt.f32.partialorder %v409_v25, 0.0 }
 0x1b5   :  { %v413_v35 = vadd.f32 %v412_v33, %v2733_v23  ;;  %v414_v39 = vpop.f32.mrb[35].mxu0  ;;  %v2874_v45 = vsel %vm533_vm1, %v407_v18, %v597_v30 }
 0x1b6   :  { %v415_v41 = vadd.f32 %v414_v39, %v2736_v24  ;;  %v2871_v43 = vsel %vm534_vm0, %v409_v25, %v598_v32 }
 0x1b7   :  { %v599_v44 = vmul.f32 0.01, %v413_v35  ;;  %928 = vmatprep.mubr.f32.mxu1 %v2871_v43  ;;  %vm535_vm3 = vcmp.gt.f32.partialorder %v413_v35, 0.0 }
 0x1b8   :  { %v600_v46 = vmul.f32 0.01, %v415_v41  ;;  %v418_v50 = vpop.f32.mrb[36].mxu0  ;;  %929 = vmatmul.mubr.f32.gmra.mrb[32].mxu1 %v2874_v45  ;;  %vm536_vm2 = vcmp.gt.f32.partialorder %v415_v41, 0.0 }
 0x1b9   :  { %v419_v52 = vadd.f32 %v418_v50, %v2733_v23  ;;  %v420_v55 = vpop.f32.mrb[37].mxu0  ;;  %v2882_v62 = vsel %vm535_vm3, %v413_v35, %v599_v44 }
 0x1ba   :  { %v421_v57 = vadd.f32 %v420_v55, %v2736_v24  ;;  %v2879_v58 = vsel %vm536_vm2, %v415_v41, %v600_v46 }
 0x1bb   :  { %v601_v59 = vmul.f32 0.01, %v419_v52  ;;  %934 = vmatprep.mubr.f32.mxu1 %v2879_v58  ;;  %vm537_vm5 = vcmp.gt.f32.partialorder %v419_v52, 0.0 }
 0x1bc   :  { %v602_v1 = vmul.f32 0.01, %v421_v57  ;;  %v424_v3 = vpop.f32.mrb[38].mxu0  ;;  %935 = vmatmul.mubr.f32.gmra.mrb[34].mxu1 %v2882_v62  ;;  %vm538_vm4 = vcmp.gt.f32.partialorder %v421_v57, 0.0 }
 0x1bd   :  { %v425_v4 = vadd.f32 %v424_v3, %v2733_v23  ;;  %v426_v7 = vpop.f32.mrb[39].mxu0  ;;  %v2890_v15 = vsel %vm537_vm5, %v419_v52, %v601_v59 }
 0x1be   :  { %v427_v8 = vadd.f32 %v426_v7, %v2736_v24  ;;  %v2887_v11 = vsel %vm538_vm4, %v421_v57, %v602_v1 }
 0x1bf   :  { %v603_v14 = vmul.f32 0.01, %v425_v4  ;;  %940 = vmatprep.mubr.f32.mxu1 %v2887_v11  ;;  %vm539_vm7 = vcmp.gt.f32.partialorder %v425_v4, 0.0 }
 0x1c0   :  { %v604_v18 = vmul.f32 0.01, %v427_v8  ;;  %v430_v20 = vpop.f32.mrb[40].mxu0  ;;  %941 = vmatmul.mubr.f32.gmra.mrb[36].mxu1 %v2890_v15  ;;  %vm540_vm6 = vcmp.gt.f32.partialorder %v427_v8, 0.0 }
 0x1c1   :  { %v431_v25 = vadd.f32 %v430_v20, %v2733_v23  ;;  %v432_v30 = vpop.f32.mrb[41].mxu0  ;;  %v2898_v39 = vsel %vm539_vm7, %v425_v4, %v603_v14 }
 0x1c2   :  { %v433_v32 = vadd.f32 %v432_v30, %v2736_v24  ;;  %v2895_v33 = vsel %vm540_vm6, %v427_v8, %v604_v18 }
 0x1c3   :  { %v605_v35 = vmul.f32 0.01, %v431_v25  ;;  %946 = vmatprep.mubr.f32.mxu1 %v2895_v33  ;;  %vm541_vm9 = vcmp.gt.f32.partialorder %v431_v25, 0.0 }
 0x1c4   :  { %v606_v41 = vmul.f32 0.01, %v433_v32  ;;  %v436_v44 = vpop.f32.mrb[42].mxu0  ;;  %947 = vmatmul.mubr.f32.gmra.mrb[38].mxu1 %v2898_v39  ;;  %vm542_vm8 = vcmp.gt.f32.partialorder %v433_v32, 0.0 }
 0x1c5   :  { %v437_v46 = vadd.f32 %v436_v44, %v2733_v23  ;;  %v438_v50 = vpop.f32.mrb[43].mxu0  ;;  %v2906_v59 = vsel %vm541_vm9, %v431_v25, %v605_v35 }
 0x1c6   :  { %v439_v52 = vadd.f32 %v438_v50, %v2736_v24  ;;  %v2903_v55 = vsel %vm542_vm8, %v433_v32, %v606_v41  ;;  %3586 = vst [vmem:[#allocation18_spill] sm:$0xff] %v2906_v59  ;;  %v1342_v50 = vld [vmem:[#allocation8 + $0x1e8] sm:$0xff] }
 0x1c7   :  { %v607_v57 = vmul.f32 0.01, %v437_v46  ;;  %952 = vmatprep.mubr.f32.mxu1 %v2903_v55  ;;  %vm543_vm11 = vcmp.gt.f32.partialorder %v437_v46, 0.0 }
 0x1c8   :  { %v608_v1 = vmul.f32 0.01, %v439_v52  ;;  %v442_v3 = vpop.f32.mrb[44].mxu0  ;;  %953 = vmatmul.mubr.f32.gmra.mrb[40].mxu1 %v2906_v59  ;;  %vm544_vm10 = vcmp.gt.f32.partialorder %v439_v52, 0.0 }
 0x1c9   :  { %v443_v4 = vadd.f32 %v442_v3, %v2733_v23  ;;  %v444_v7 = vpop.f32.mrb[45].mxu0  ;;  %v2914_v20 = vsel %vm543_vm11, %v437_v46, %v607_v57  ;;  %v1341_v3 = vld [vmem:[#allocation8 + $0x1e0] sm:$0xff] }
 0x1ca   :  { %v445_v8 = vadd.f32 %v444_v7, %v2736_v24  ;;  %v2911_v14 = vsel %vm544_vm10, %v439_v52, %v608_v1  ;;  %3588 = vst [vmem:[#allocation20_spill] sm:$0xff] %v2914_v20  ;;  %v1344_v52 = vld [vmem:[#allocation8 + $0x1f8] sm:$0xff]  ;;  %v1343_v7 = vld [vmem:[#allocation8 + $0x1f0] sm:$0xff] }
 0x1cb   :  { %3587 = vst [vmem:[#allocation19_spill] sm:$0xff] %v2911_v14  ;;  %v609_v18 = vmul.f32 0.01, %v443_v4  ;;  %958 = vmatprep.mubr.f32.mxu1 %v2911_v14  ;;  %vm545_vm13 = vcmp.gt.f32.partialorder %v443_v4, 0.0  ;;  %v2372_v57 = vpack.c.bf16 %v1344_v52, %v1342_v50 }
 0x1cc   :  { %v610_v25 = vmul.f32 0.01, %v445_v8  ;;  %v448_v30 = vpop.f32.mrb[46].mxu0  ;;  %959 = vmatmul.mubr.f32.gmra.mrb[42].mxu1 %v2914_v20  ;;  %vm546_vm12 = vcmp.gt.f32.partialorder %v445_v8, 0.0 }
 0x1cd   :  { %v449_v32 = vadd.f32 %v448_v30, %v2733_v23  ;;  %v450_v35 = vpop.f32.mrb[47].mxu0  ;;  %v2922_v46 = vsel %vm545_vm13, %v443_v4, %v609_v18  ;;  %v2374_v30 = vpack.c.bf16 %v1343_v7, %v1341_v3  ;;  %2373 = vmatprep.subr.bf16.mxu0 %v2372_v57 }
 0x1ce   :  { %v451_v41 = vadd.f32 %v450_v35, %v2736_v24  ;;  %v2919_v44 = vsel %vm546_vm12, %v445_v8, %v610_v25  ;;  %3589 = vst [vmem:[#allocation21_spill] sm:$0xff] %v2922_v46 }
 0x1cf   :  { %v611_v1 = vmul.f32 0.01, %v449_v32  ;;  %964 = vmatprep.mubr.f32.mxu1 %v2919_v44  ;;  %vm547_vm15 = vcmp.gt.f32.partialorder %v449_v32, 0.0  ;;  %2375 = vmatpush1.bf16.msra.mxu0 %v2374_v30 }
 0x1d0   :  { %v612_v20 = vmul.f32 0.01, %v451_v41  ;;  %v454_v14 = vpop.f32.mrb[48].mxu0  ;;  %965 = vmatmul.mubr.f32.gmra.mrb[44].mxu1 %v2922_v46  ;;  %vm548_vm14 = vcmp.gt.f32.partialorder %v451_v41, 0.0 }
 0x1d1   :  { %v455_v8 = vadd.f32 %v454_v14, %v2733_v23  ;;  %v456_v25 = vpop.f32.mrb[49].mxu0  ;;  %v2930_v18 = vsel %vm547_vm15, %v449_v32, %v611_v1 }
 0x1d2   :  { %v457_v35 = vadd.f32 %v456_v25, %v2736_v24  ;;  %v2927_v59 = vsel %vm548_vm14, %v451_v41, %v612_v20  ;;  %3591 = vst [vmem:[#allocation23_spill] sm:$0xff] %v2930_v18 }
 0x1d3   :  { %3590 = vst [vmem:[#allocation22_spill] sm:$0xff] %v2927_v59  ;;  %v613_v4 = vmul.f32 0.01, %v455_v8  ;;  %970 = vmatprep.mubr.f32.mxu1 %v2927_v59  ;;  %vm549_vm1 = vcmp.gt.f32.partialorder %v455_v8, 0.0 }
 0x1d4   :  { %v614_v50 = vmul.f32 0.01, %v457_v35  ;;  %v460_v52 = vpop.f32.mrb[50].mxu0  ;;  %971 = vmatmul.mubr.f32.gmra.mrb[46].mxu1 %v2930_v18  ;;  %vm550_vm0 = vcmp.gt.f32.partialorder %v457_v35, 0.0 }
 0x1d5   :  { %v461_v14 = vadd.f32 %v460_v52, %v2733_v23  ;;  %v462_v3 = vpop.f32.mrb[51].mxu0  ;;  %v2938_v41 = vsel %vm549_vm1, %v455_v8, %v613_v4 }
 0x1d6   :  { %v463_v57 = vadd.f32 %v462_v3, %v2736_v24  ;;  %v2935_v7 = vsel %vm550_vm0, %v457_v35, %v614_v50  ;;  %3593 = vst [vmem:[#allocation25_spill] sm:$0xff] %v2938_v41 }
 0x1d7   :  { %3592 = vst [vmem:[#allocation24_spill] sm:$0xff] %v2935_v7  ;;  %v615_v20 = vmul.f32 0.01, %v461_v14  ;;  %976 = vmatprep.mubr.f32.mxu1 %v2935_v7  ;;  %vm551_vm3 = vcmp.gt.f32.partialorder %v461_v14, 0.0 }
 0x1d8   :  { %v616_v32 = vmul.f32 0.01, %v463_v57  ;;  %v466_v1 = vpop.f32.mrb[52].mxu0  ;;  %977 = vmatmul.mubr.f32.gmra.mrb[48].mxu1 %v2938_v41  ;;  %vm552_vm2 = vcmp.gt.f32.partialorder %v463_v57, 0.0 }
 0x1d9   :  { %v467_v30 = vadd.f32 %v466_v1, %v2733_v23  ;;  %v468_v25 = vpop.f32.mrb[53].mxu0  ;;  %v2946_v50 = vsel %vm551_vm3, %v461_v14, %v615_v20 }
 0x1da   :  { %v469_v52 = vadd.f32 %v468_v25, %v2736_v24  ;;  %v2943_v18 = vsel %vm552_vm2, %v463_v57, %v616_v32  ;;  %3595 = vst [vmem:[#allocation27_spill] sm:$0xff] %v2946_v50 }
 0x1db   :  { %3594 = vst [vmem:[#allocation26_spill] sm:$0xff] %v2943_v18  ;;  %v617_v35 = vmul.f32 0.01, %v467_v30  ;;  %982 = vmatprep.mubr.f32.mxu1 %v2943_v18  ;;  %vm553_vm5 = vcmp.gt.f32.partialorder %v467_v30, 0.0 }
 0x1dc   :  { %v618_v8 = vmul.f32 0.01, %v469_v52  ;;  %v472_v4 = vpop.f32.mrb[54].mxu0  ;;  %983 = vmatmul.mubr.f32.gmra.mrb[50].mxu1 %v2946_v50  ;;  %vm554_vm4 = vcmp.gt.f32.partialorder %v469_v52, 0.0 }
 0x1dd   :  { %v473_v3 = vadd.f32 %v472_v4, %v2733_v23  ;;  %v474_v41 = vpop.f32.mrb[55].mxu0  ;;  %v2954_v32 = vsel %vm553_vm5, %v467_v30, %v617_v35 }
 0x1de   :  { %v475_v1 = vadd.f32 %v474_v41, %v2736_v24  ;;  %v2951_v7 = vsel %vm554_vm4, %v469_v52, %v618_v8  ;;  %3597 = vst [vmem:[#allocation29_spill] sm:$0xff] %v2954_v32 }
 0x1df   :  { %3596 = vst [vmem:[#allocation28_spill] sm:$0xff] %v2951_v7  ;;  %v619_v57 = vmul.f32 0.01, %v473_v3  ;;  %988 = vmatprep.mubr.f32.mxu1 %v2951_v7  ;;  %vm555_vm7 = vcmp.gt.f32.partialorder %v473_v3, 0.0 }
 0x1e0   :  { %v620_v14 = vmul.f32 0.01, %v475_v1  ;;  %v478_v20 = vpop.f32.mrb[56].mxu0  ;;  %989 = vmatmul.mubr.f32.gmra.mrb[52].mxu1 %v2954_v32  ;;  %vm556_vm6 = vcmp.gt.f32.partialorder %v475_v1, 0.0 }
 0x1e1   :  { %v479_v25 = vadd.f32 %v478_v20, %v2733_v23  ;;  %v480_v50 = vpop.f32.mrb[57].mxu0  ;;  %v2962_v52 = vsel %vm555_vm7, %v473_v3, %v619_v57 }
 0x1e2   :  { %v481_v4 = vadd.f32 %v480_v50, %v2736_v24  ;;  %v2959_v18 = vsel %vm556_vm6, %v475_v1, %v620_v14  ;;  %3599 = vst [vmem:[#allocation31_spill] sm:$0xff] %v2962_v52 }
 0x1e3   :  { %3598 = vst [vmem:[#allocation30_spill] sm:$0xff] %v2959_v18  ;;  %v621_v41 = vmul.f32 0.01, %v479_v25  ;;  %994 = vmatprep.mubr.f32.mxu1 %v2959_v18  ;;  %vm557_vm9 = vcmp.gt.f32.partialorder %v479_v25, 0.0 }
 0x1e4   :  { %v622_v30 = vmul.f32 0.01, %v481_v4  ;;  %v484_v35 = vpop.f32.mrb[58].mxu0  ;;  %995 = vmatmul.mubr.f32.gmra.mrb[54].mxu1 %v2962_v52  ;;  %vm558_vm8 = vcmp.gt.f32.partialorder %v481_v4, 0.0 }
 0x1e5   :  { %v485_v8 = vadd.f32 %v484_v35, %v2733_v23  ;;  %v486_v32 = vpop.f32.mrb[59].mxu0  ;;  %v2970_v1 = vsel %vm557_vm9, %v479_v25, %v621_v41 }
 0x1e6   :  { %v487_v20 = vadd.f32 %v486_v32, %v2736_v24  ;;  %v2967_v7 = vsel %vm558_vm8, %v481_v4, %v622_v30  ;;  %3601 = vst [vmem:[#allocation33_spill] sm:$0xff] %v2970_v1 }
 0x1e7   :  { %3600 = vst [vmem:[#allocation32_spill] sm:$0xff] %v2967_v7  ;;  %v623_v50 = vmul.f32 0.01, %v485_v8  ;;  %1000 = vmatprep.mubr.f32.mxu1 %v2967_v7  ;;  %vm559_vm11 = vcmp.gt.f32.partialorder %v485_v8, 0.0 }
 0x1e8   :  { %v624_v3 = vmul.f32 0.01, %v487_v20  ;;  %v490_v57 = vpop.f32.mrb[60].mxu0  ;;  %1001 = vmatmul.mubr.f32.gmra.mrb[56].mxu1 %v2970_v1  ;;  %vm560_vm10 = vcmp.gt.f32.partialorder %v487_v20, 0.0 }
 0x1e9   :  { %v491_v14 = vadd.f32 %v490_v57, %v2733_v23  ;;  %v492_v52 = vpop.f32.mrb[61].mxu0  ;;  %v2978_v4 = vsel %vm559_vm11, %v485_v8, %v623_v50 }
 0x1ea   :  { %v493_v35 = vadd.f32 %v492_v52, %v2736_v24  ;;  %v2975_v18 = vsel %vm560_vm10, %v487_v20, %v624_v3  ;;  %3603 = vst [vmem:[#allocation35_spill] sm:$0xff] %v2978_v4  ;;  %v3554_v3 = vmov 0.0|0.0  }
 0x1eb   :  { %3602 = vst [vmem:[#allocation34_spill] sm:$0xff] %v2975_v18  ;;  %v625_v32 = vmul.f32 0.01, %v491_v14  ;;  %1006 = vmatprep.mubr.f32.mxu1 %v2975_v18  ;;  %vm561_vm13 = vcmp.gt.f32.partialorder %v491_v14, 0.0  ;;  %2376 = vmatprep.subr.bf16.mxu1 %v3554_v3  ;;  %v1880_v18 = vld [vmem:[#allocation10 + $0x58] sm:$0xff] }
 0x1ec   :  { %v626_v25 = vmul.f32 0.01, %v493_v35  ;;  %v496_v41 = vpop.f32.mrb[62].mxu0  ;;  %1007 = vmatmul.mubr.f32.gmra.mrb[58].mxu1 %v2978_v4  ;;  %vm562_vm12 = vcmp.gt.f32.partialorder %v493_v35, 0.0  ;;  %v1878_v4 = vld [vmem:[#allocation10 + $0x48] sm:$0xff] }
 0x1ed   :  { %v497_v30 = vadd.f32 %v496_v41, %v2733_v23  ;;  %v498_v1 = vpop.f32.mrb[63].mxu0  ;;  %v2986_v20 = vsel %vm561_vm13, %v491_v14, %v625_v32  ;;  %v1872_v32 = vld [vmem:[#allocation10 + $0x18] sm:$0xff]  ;;  %v1873_v41 = vld [vmem:[#allocation10 + $0x20] sm:$0xff] }
 0x1ee   :  { %v499_v57 = vadd.f32 %v498_v1, %v2736_v24  ;;  %v2983_v7 = vsel %vm562_vm12, %v493_v35, %v626_v25  ;;  %3605 = vst [vmem:[#allocation37_spill] sm:$0xff] %v2986_v20  ;;  %v1869_v24 = vld [vmem:[#allocation10] sm:$0xff]  ;;  %v1870_v1 = vld [vmem:[#allocation10 + $0x8] sm:$0xff]  ;;  %v1871_v35 = vld [vmem:[#allocation10 + $0x10] sm:$0xff] }
 0x1ef   :  { %3604 = vst [vmem:[#allocation36_spill] sm:$0xff] %v2983_v7  ;;  %v627_v52 = vmul.f32 0.01, %v497_v30  ;;  %1012 = vmatprep.mubr.f32.mxu1 %v2983_v7  ;;  %vm563_vm15 = vcmp.gt.f32.partialorder %v497_v30, 0.0  ;;  %v2377_v14 = vpack.c.bf16 %v1870_v1, %v1869_v24  ;;  %v2380_v25 = vpack.c.bf16 %v1872_v32, %v1871_v35  ;;  %v1876_v35 = vld [vmem:[#allocation10 + $0x38] sm:$0xff] }
 0x1f0   :  { %v628_v8 = vmul.f32 0.01, %v499_v57  ;;  %1013 = vmatmul.mubr.f32.gmra.mrb[60].mxu1 %v2986_v20  ;;  %vm564_vm14 = vcmp.gt.f32.partialorder %v499_v57, 0.0 }
 0x1f1   :  { %v2992_v23 = vsel %vm563_vm15, %v497_v30, %v627_v52  ;;  %2378 = vmatpush1.bf16.msra.mxu1 %v2377_v14  ;;  %v1874_v30 = vld [vmem:[#allocation10 + $0x28] sm:$0xff]  ;;  %v102_v52 = vld [vmem:[%s3533_s4] sm:$0x3]  ;;  %v1875_v14 = vld [vmem:[#allocation10 + $0x30] sm:$0xff] }
 0x1f2   :  { %v2989_v50 = vsel %vm564_vm14, %v499_v57, %v628_v8  ;;  %3607 = vst [vmem:[#allocation39_spill] sm:$0xff] %v2992_v23  ;;  %2379 = vmatprep.subr.bf16.mxu1 %v3554_v3  ;;  %v2383_v57 = vpack.c.bf16 %v1874_v30, %v1873_v41  ;;  %v3003_v8 = vrot.slane %v102_v52, %v2725_v19  ;;  %v3608_v19 = vmov 0.0|0.0  }
 0x1f3   :  { %3606 = vst [vmem:[#allocation38_spill] sm:$0xff] %v2989_v50  ;;  %1018 = vmatprep.mubr.f32.mxu1 %v2989_v50  ;;  %v3006_v24 = vrot.slane %v102_v52, %v2730_v22  ;;  %v2386_v41 = vpack.c.bf16 %v1876_v35, %v1875_v14  ;;  %v1879_v14 = vld [vmem:[#allocation10 + $0x50] sm:$0xff] }
 0x1f4   :  { %1019 = vmatmul.mubr.f32.gmra.mrb[62].mxu1 %v2992_v23 }
 0x1f5   :  { %2381 = vmatpush1.bf16.msra.mxu1 %v2380_v25 }
 0x1f6   :  { %2382 = vmatprep.subr.bf16.mxu1 %v3554_v3 }
 0x1f9   :  { %2384 = vmatpush1.bf16.msra.mxu1 %v2383_v57 }
 0x1fa   :  { %2385 = vmatprep.subr.bf16.mxu1 %v3554_v3 }
 0x1fd   :  { %2387 = vmatpush1.bf16.msra.mxu1 %v2386_v41 }
 0x1fe   :  { %2388 = vmatprep.subr.bf16.mxu1 %v3608_v19 }
 0x24b   :  { %v834_v1 = vpop.f32.mrb[0].mxu1 }
 0x24c   :  { %v835_v32 = vadd.f32 %v834_v1, %v3003_v8  ;;  %v836_v25 = vpop.f32.mrb[1].mxu1  ;;  %v1877_v1 = vld [vmem:[#allocation10 + $0x40] sm:$0xff] }
 0x24d   :  { %v837_v30 = vadd.f32 %v836_v25, %v3006_v24  ;;  %v2389_v41 = vpack.c.bf16 %v1878_v4, %v1877_v1 }
 0x24e   :  { %vm1025_vm0 = vcmp.gt.f32.partialorder %v835_v32, 0.0  ;;  %v1089_v23 = vmul.f32 0.01, %v835_v32 }
 0x24f   :  { %vm1026_vm1 = vcmp.gt.f32.partialorder %v837_v30, 0.0  ;;  %v1090_v57 = vmul.f32 0.01, %v837_v30  ;;  %v840_v3 = vpop.f32.mrb[2].mxu1  ;;  %2390 = vmatpush1.bf16.msra.mxu1 %v2389_v41 }
 0x250   :  { %v1153_v50 = vsel %vm1025_vm0, %v835_v32, %v1089_v23  ;;  %v841_v52 = vadd.f32 %v840_v3, %v3003_v8  ;;  %v842_v22 = vpop.f32.mrb[3].mxu1  ;;  %2391 = vmatprep.subr.bf16.mxu1 %v3608_v19 }
 0x251   :  { %v843_v20 = vadd.f32 %v842_v22, %v3006_v24  ;;  %v1154_v7 = vsel %vm1026_vm1, %v837_v30, %v1090_v57  ;;  %v3017_v59 = vadd.f32 %v1153_v50, %v2746_v53  ;;  %v2392_v57 = vpack.c.bf16 %v1880_v18, %v1879_v14  ;;  %v1881_v53 = vld [vmem:[#allocation10 + $0x60] sm:$0xff] }
 0x252   :  { %vm1027_vm2 = vcmp.gt.f32.partialorder %v841_v52, 0.0  ;;  %v1091_v35 = vmul.f32 0.01, %v841_v52  ;;  %v3014_v25 = vadd.f32 %v1154_v7, %v2742_v47  ;;  %v1882_v7 = vld [vmem:[#allocation10 + $0x68] sm:$0xff] }
 0x253   :  { %vm1028_vm3 = vcmp.gt.f32.partialorder %v843_v20, 0.0  ;;  %v1092_v23 = vmul.f32 0.01, %v843_v20  ;;  %v846_v3 = vpop.f32.mrb[4].mxu1  ;;  %2393 = vmatpush1.bf16.msra.mxu1 %v2392_v57 }
 0x254   :  { %v847_v32 = vadd.f32 %v846_v3, %v3003_v8  ;;  %v848_v22 = vpop.f32.mrb[5].mxu1  ;;  %1420 = vmatprep.mubr.f32.mxu0 %v3014_v25  ;;  %v1155_v30 = vsel %vm1027_vm2, %v841_v52, %v1091_v35  ;;  %v2395_v35 = vpack.c.bf16 %v1882_v7, %v1881_v53  ;;  %2394 = vmatprep.subr.bf16.mxu1 %v3608_v19 }
 0x255   :  { %v849_v46 = vadd.f32 %v848_v22, %v3006_v24  ;;  %1421 = vmatmul.mubr.f32.vlgmr.msra.gmra.mrb[64].mxu0 %v3017_v59  ;;  %v1156_v47 = vsel %vm1028_vm3, %v843_v20, %v1092_v23  ;;  %v3028_v52 = vadd.f32 %v1155_v30, %v2754_v6  ;;  %v1883_v23 = vld [vmem:[#allocation10 + $0x70] sm:$0xff]  ;;  %v1884_v22 = vld [vmem:[#allocation10 + $0x78] sm:$0xff] }
 0x256   :  { %vm1029_vm4 = vcmp.gt.f32.partialorder %v847_v32, 0.0  ;;  %v1093_v4 = vmul.f32 0.01, %v847_v32  ;;  %v3025_v50 = vadd.f32 %v1156_v47, %v2751_v2  ;;  %v2398_v7 = vpack.c.bf16 %v1884_v22, %v1883_v23 }
 0x257   :  { %vm1030_vm5 = vcmp.gt.f32.partialorder %v849_v46, 0.0  ;;  %v1094_v1 = vmul.f32 0.01, %v849_v46  ;;  %v852_v3 = vpop.f32.mrb[6].mxu1  ;;  %2396 = vmatpush1.bf16.msra.mxu1 %v2395_v35 }
 0x258   :  { %v853_v18 = vadd.f32 %v852_v3, %v3003_v8  ;;  %v854_v14 = vpop.f32.mrb[7].mxu1  ;;  %1426 = vmatprep.mubr.f32.mxu0 %v3025_v50  ;;  %v1157_v20 = vsel %vm1029_vm4, %v847_v32, %v1093_v4  ;;  %2397 = vmatprep.subr.bf16.mxu1 %v3608_v19 }
 0x259   :  { %v855_v41 = vadd.f32 %v854_v14, %v3006_v24  ;;  %1427 = vmatmul.mubr.f32.gmra.mrb[66].mxu0 %v3028_v52  ;;  %v1158_v2 = vsel %vm1030_vm5, %v849_v46, %v1094_v1  ;;  %v3039_v32 = vadd.f32 %v1157_v20, %v2762_v21  ;;  %v1885_v1 = vld [vmem:[#allocation10 + $0x80] sm:$0xff]  ;;  %v1886_v14 = vld [vmem:[#allocation10 + $0x88] sm:$0xff] }
 0x25a   :  { %vm1031_vm6 = vcmp.gt.f32.partialorder %v853_v18, 0.0  ;;  %v1095_v6 = vmul.f32 0.01, %v853_v18  ;;  %v3036_v30 = vadd.f32 %v1158_v2, %v2759_v16  ;;  %v2401_v22 = vpack.c.bf16 %v1886_v14, %v1885_v1 }
 0x25b   :  { %vm1032_vm7 = vcmp.gt.f32.partialorder %v855_v41, 0.0  ;;  %v1096_v47 = vmul.f32 0.01, %v855_v41  ;;  %v858_v3 = vpop.f32.mrb[8].mxu1  ;;  %2399 = vmatpush1.bf16.msra.mxu1 %v2398_v7 }
 0x25c   :  { %v859_v57 = vadd.f32 %v858_v3, %v3003_v8  ;;  %v860_v53 = vpop.f32.mrb[9].mxu1  ;;  %1432 = vmatprep.mubr.f32.mxu0 %v3036_v30  ;;  %v1159_v46 = vsel %vm1031_vm6, %v853_v18, %v1095_v6  ;;  %2400 = vmatprep.subr.bf16.mxu1 %v3608_v19 }
 0x25d   :  { %v861_v4 = vadd.f32 %v860_v53, %v3006_v24  ;;  %1433 = vmatmul.mubr.f32.gmra.mrb[68].mxu0 %v3039_v32  ;;  %v1160_v16 = vsel %vm1032_vm7, %v855_v41, %v1096_v47  ;;  %v3050_v18 = vadd.f32 %v1159_v46, %v2770_v38  ;;  %v1887_v47 = vld [vmem:[#allocation10 + $0x90] sm:$0xff]  ;;  %v1888_v53 = vld [vmem:[#allocation10 + $0x98] sm:$0xff] }
 0x25e   :  { %vm1033_vm8 = vcmp.gt.f32.partialorder %v859_v57, 0.0  ;;  %v1097_v21 = vmul.f32 0.01, %v859_v57  ;;  %v3047_v20 = vadd.f32 %v1160_v16, %v2767_v34  ;;  %v2404_v14 = vpack.c.bf16 %v1888_v53, %v1887_v47 }
 0x25f   :  { %vm1034_vm9 = vcmp.gt.f32.partialorder %v861_v4, 0.0  ;;  %v1098_v2 = vmul.f32 0.01, %v861_v4  ;;  %v864_v3 = vpop.f32.mrb[10].mxu1  ;;  %2402 = vmatpush1.bf16.msra.mxu1 %v2401_v22 }
 0x260   :  { %v865_v35 = vadd.f32 %v864_v3, %v3003_v8  ;;  %v866_v23 = vpop.f32.mrb[11].mxu1  ;;  %1438 = vmatprep.mubr.f32.mxu0 %v3047_v20  ;;  %v1161_v41 = vsel %vm1033_vm8, %v859_v57, %v1097_v21  ;;  %2403 = vmatprep.subr.bf16.mxu1 %v3608_v19 }
 0x261   :  { %v867_v6 = vadd.f32 %v866_v23, %v3006_v24  ;;  %1439 = vmatmul.mubr.f32.gmra.mrb[70].mxu0 %v3050_v18  ;;  %v1162_v34 = vsel %vm1034_vm9, %v861_v4, %v1098_v2  ;;  %v3061_v57 = vadd.f32 %v1161_v41, %v2778_v54  ;;  %v1889_v2 = vld [vmem:[#allocation10 + $0xa0] sm:$0xff]  ;;  %v1890_v23 = vld [vmem:[#allocation10 + $0xa8] sm:$0xff] }
 0x262   :  { %vm1035_vm10 = vcmp.gt.f32.partialorder %v865_v35, 0.0  ;;  %v1099_v38 = vmul.f32 0.01, %v865_v35  ;;  %v3058_v46 = vadd.f32 %v1162_v34, %v2775_v49  ;;  %v2407_v53 = vpack.c.bf16 %v1890_v23, %v1889_v2 }
 0x263   :  { %vm1036_vm11 = vcmp.gt.f32.partialorder %v867_v6, 0.0  ;;  %v1100_v16 = vmul.f32 0.01, %v867_v6  ;;  %v870_v3 = vpop.f32.mrb[12].mxu1  ;;  %2405 = vmatpush1.bf16.msra.mxu1 %v2404_v14 }
 0x264   :  { %v871_v7 = vadd.f32 %v870_v3, %v3003_v8  ;;  %v872_v1 = vpop.f32.mrb[13].mxu1  ;;  %1444 = vmatprep.mubr.f32.mxu0 %v3058_v46  ;;  %v1163_v4 = vsel %vm1035_vm10, %v865_v35, %v1099_v38  ;;  %2406 = vmatprep.subr.bf16.mxu1 %v3608_v19 }
 0x265   :  { %v873_v21 = vadd.f32 %v872_v1, %v3006_v24  ;;  %1445 = vmatmul.mubr.f32.gmra.mrb[72].mxu0 %v3061_v57  ;;  %v1164_v49 = vsel %vm1036_vm11, %v867_v6, %v1100_v16  ;;  %v3072_v35 = vadd.f32 %v1163_v4, %v2786_v5  ;;  %v1891_v16 = vld [vmem:[#allocation10 + $0xb0] sm:$0xff]  ;;  %v1892_v1 = vld [vmem:[#allocation10 + $0xb8] sm:$0xff] }
 0x266   :  { %vm1037_vm12 = vcmp.gt.f32.partialorder %v871_v7, 0.0  ;;  %v1101_v54 = vmul.f32 0.01, %v871_v7  ;;  %v3069_v41 = vadd.f32 %v1164_v49, %v2783_v0  ;;  %v2410_v23 = vpack.c.bf16 %v1892_v1, %v1891_v16 }
 0x267   :  { %vm1038_vm13 = vcmp.gt.f32.partialorder %v873_v21, 0.0  ;;  %v1102_v34 = vmul.f32 0.01, %v873_v21  ;;  %v876_v3 = vpop.f32.mrb[14].mxu1  ;;  %2408 = vmatpush1.bf16.msra.mxu1 %v2407_v53 }
 0x268   :  { %v877_v22 = vadd.f32 %v876_v3, %v3003_v8  ;;  %v878_v47 = vpop.f32.mrb[15].mxu1  ;;  %1450 = vmatprep.mubr.f32.mxu0 %v3069_v41  ;;  %v1165_v6 = vsel %vm1037_vm12, %v871_v7, %v1101_v54  ;;  %2409 = vmatprep.subr.bf16.mxu1 %v3608_v19 }
 0x269   :  { %v879_v38 = vadd.f32 %v878_v47, %v3006_v24  ;;  %1451 = vmatmul.mubr.f32.gmra.mrb[74].mxu0 %v3072_v35  ;;  %v1166_v0 = vsel %vm1038_vm13, %v873_v21, %v1102_v34  ;;  %v3083_v7 = vadd.f32 %v1165_v6, %v2794_v26  ;;  %v1893_v34 = vld [vmem:[#allocation10 + $0xc0] sm:$0xff]  ;;  %v1894_v47 = vld [vmem:[#allocation10 + $0xc8] sm:$0xff] }
 0x26a   :  { %vm1039_vm14 = vcmp.gt.f32.partialorder %v877_v22, 0.0  ;;  %v1103_v5 = vmul.f32 0.01, %v877_v22  ;;  %v3080_v4 = vadd.f32 %v1166_v0, %v2791_v17  ;;  %v2413_v1 = vpack.c.bf16 %v1894_v47, %v1893_v34 }
 0x26b   :  { %vm1040_vm15 = vcmp.gt.f32.partialorder %v879_v38, 0.0  ;;  %v1104_v49 = vmul.f32 0.01, %v879_v38  ;;  %v882_v3 = vpop.f32.mrb[16].mxu1  ;;  %2411 = vmatpush1.bf16.msra.mxu1 %v2410_v23 }
 0x26c   :  { %v883_v14 = vadd.f32 %v882_v3, %v3003_v8  ;;  %v884_v2 = vpop.f32.mrb[17].mxu1  ;;  %1456 = vmatprep.mubr.f32.mxu0 %v3080_v4  ;;  %v1167_v21 = vsel %vm1039_vm14, %v877_v22, %v1103_v5  ;;  %2412 = vmatprep.subr.bf16.mxu1 %v3608_v19 }
 0x26d   :  { %v885_v54 = vadd.f32 %v884_v2, %v3006_v24  ;;  %1457 = vmatmul.mubr.f32.gmra.mrb[76].mxu0 %v3083_v7  ;;  %v1168_v17 = vsel %vm1040_vm15, %v879_v38, %v1104_v49  ;;  %v3094_v22 = vadd.f32 %v1167_v21, %v2802_v42  ;;  %v1895_v49 = vld [vmem:[#allocation10 + $0xd0] sm:$0xff]  ;;  %v1896_v2 = vld [vmem:[#allocation10 + $0xd8] sm:$0xff] }
 0x26e   :  { %vm1041_vm0 = vcmp.gt.f32.partialorder %v883_v14, 0.0  ;;  %v1105_v26 = vmul.f32 0.01, %v883_v14  ;;  %v3091_v6 = vadd.f32 %v1168_v17, %v2799_v37  ;;  %v2416_v47 = vpack.c.bf16 %v1896_v2, %v1895_v49 }
 0x26f   :  { %vm1042_vm1 = vcmp.gt.f32.partialorder %v885_v54, 0.0  ;;  %v1106_v0 = vmul.f32 0.01, %v885_v54  ;;  %v888_v3 = vpop.f32.mrb[18].mxu1  ;;  %2414 = vmatpush1.bf16.msra.mxu1 %v2413_v1 }
 0x270   :  { %v889_v53 = vadd.f32 %v888_v3, %v3003_v8  ;;  %v890_v16 = vpop.f32.mrb[19].mxu1  ;;  %1462 = vmatprep.mubr.f32.mxu0 %v3091_v6  ;;  %v1169_v38 = vsel %vm1041_vm0, %v883_v14, %v1105_v26  ;;  %2415 = vmatprep.subr.bf16.mxu1 %v3608_v19 }
 0x271   :  { %v891_v5 = vadd.f32 %v890_v16, %v3006_v24  ;;  %1463 = vmatmul.mubr.f32.gmra.mrb[78].mxu0 %v3094_v22  ;;  %v1170_v37 = vsel %vm1042_vm1, %v885_v54, %v1106_v0  ;;  %v3105_v14 = vadd.f32 %v1169_v38, %v2810_v60  ;;  %v1897_v0 = vld [vmem:[#allocation10 + $0xe0] sm:$0xff]  ;;  %v1898_v16 = vld [vmem:[#allocation10 + $0xe8] sm:$0xff] }
 0x272   :  { %vm1043_vm2 = vcmp.gt.f32.partialorder %v889_v53, 0.0  ;;  %v1107_v42 = vmul.f32 0.01, %v889_v53  ;;  %v3102_v21 = vadd.f32 %v1170_v37, %v2807_v56  ;;  %v2419_v2 = vpack.c.bf16 %v1898_v16, %v1897_v0 }
 0x273   :  { %vm1044_vm3 = vcmp.gt.f32.partialorder %v891_v5, 0.0  ;;  %v1108_v17 = vmul.f32 0.01, %v891_v5  ;;  %v894_v3 = vpop.f32.mrb[20].mxu1  ;;  %2417 = vmatpush1.bf16.msra.mxu1 %v2416_v47 }
 0x274   :  { %v895_v23 = vadd.f32 %v894_v3, %v3003_v8  ;;  %v896_v34 = vpop.f32.mrb[21].mxu1  ;;  %1468 = vmatprep.mubr.f32.mxu0 %v3102_v21  ;;  %v1171_v54 = vsel %vm1043_vm2, %v889_v53, %v1107_v42  ;;  %2418 = vmatprep.subr.bf16.mxu1 %v3608_v19 }
 0x275   :  { %v897_v26 = vadd.f32 %v896_v34, %v3006_v24  ;;  %1469 = vmatmul.mubr.f32.gmra.mrb[80].mxu0 %v3105_v14  ;;  %v1172_v56 = vsel %vm1044_vm3, %v891_v5, %v1108_v17  ;;  %v3116_v53 = vadd.f32 %v1171_v54, %v2818_v12 }
 0x276   :  { %vm1045_vm4 = vcmp.gt.f32.partialorder %v895_v23, 0.0  ;;  %v1109_v60 = vmul.f32 0.01, %v895_v23  ;;  %v3113_v38 = vadd.f32 %v1172_v56, %v2815_v10 }
 0x277   :  { %vm1046_vm5 = vcmp.gt.f32.partialorder %v897_v26, 0.0  ;;  %v1110_v37 = vmul.f32 0.01, %v897_v26  ;;  %v900_v3 = vpop.f32.mrb[22].mxu1  ;;  %2420 = vmatpush1.bf16.msra.mxu1 %v2419_v2 }
 0x278   :  { %v901_v1 = vadd.f32 %v900_v3, %v3003_v8  ;;  %v902_v49 = vpop.f32.mrb[23].mxu1  ;;  %1474 = vmatprep.mubr.f32.mxu0 %v3113_v38  ;;  %v1173_v5 = vsel %vm1045_vm4, %v895_v23, %v1109_v60  ;;  %2421 = vmatprep.subr.bf16.mxu1 %v3608_v19 }
 0x279   :  { %v903_v42 = vadd.f32 %v902_v49, %v3006_v24  ;;  %1475 = vmatmul.mubr.f32.gmra.mrb[82].mxu0 %v3116_v53  ;;  %v1174_v10 = vsel %vm1046_vm5, %v897_v26, %v1110_v37  ;;  %v3127_v56 = vadd.f32 %v1173_v5, %v2826_v29 }
 0x27a   :  { %vm1047_vm6 = vcmp.gt.f32.partialorder %v901_v1, 0.0  ;;  %v1111_v17 = vmul.f32 0.01, %v901_v1  ;;  %v3124_v12 = vadd.f32 %v1174_v10, %v2823_v27 }
 0x27b   :  { %vm1048_vm7 = vcmp.gt.f32.partialorder %v903_v42, 0.0  ;;  %v1112_v34 = vmul.f32 0.01, %v903_v42  ;;  %v906_v54 = vpop.f32.mrb[24].mxu1 }
 0x27c   :  { %v907_v23 = vadd.f32 %v906_v54, %v3003_v8  ;;  %v908_v47 = vpop.f32.mrb[25].mxu1  ;;  %1480 = vmatprep.mubr.f32.mxu0 %v3124_v12  ;;  %v1175_v0 = vsel %vm1047_vm6, %v901_v1, %v1111_v17 }
 0x27d   :  { %v909_v26 = vadd.f32 %v908_v47, %v3006_v24  ;;  %1481 = vmatmul.mubr.f32.gmra.mrb[84].mxu0 %v3127_v56  ;;  %v1176_v16 = vsel %vm1048_vm7, %v903_v42, %v1112_v34  ;;  %v3138_v3 = vadd.f32 %v1175_v0, %v2834_v40 }
 0x27e   :  { %vm1049_vm8 = vcmp.gt.f32.partialorder %v907_v23, 0.0  ;;  %v1113_v27 = vmul.f32 0.01, %v907_v23  ;;  %v3135_v60 = vadd.f32 %v1176_v16, %v2831_v36 }
 0x27f   :  { %vm1050_vm9 = vcmp.gt.f32.partialorder %v909_v26, 0.0  ;;  %v1114_v29 = vmul.f32 0.01, %v909_v26  ;;  %v912_v37 = vpop.f32.mrb[26].mxu1 }
 0x280   :  { %v913_v1 = vadd.f32 %v912_v37, %v3003_v8  ;;  %v914_v49 = vpop.f32.mrb[27].mxu1  ;;  %1486 = vmatprep.mubr.f32.mxu0 %v3135_v60  ;;  %v1177_v5 = vsel %vm1049_vm8, %v907_v23, %v1113_v27 }
 0x281   :  { %v915_v2 = vadd.f32 %v914_v49, %v3006_v24  ;;  %1487 = vmatmul.mubr.f32.gmra.mrb[86].mxu0 %v3138_v3  ;;  %v1178_v19 = vsel %vm1050_vm9, %v909_v26, %v1114_v29  ;;  %v3148_v17 = vadd.f32 %v1177_v5, %v2842_v51 }
 0x282   :  { %vm1051_vm10 = vcmp.gt.f32.partialorder %v913_v1, 0.0  ;;  %v1115_v36 = vmul.f32 0.01, %v913_v1  ;;  %v3145_v42 = vadd.f32 %v1178_v19, %v2839_v48 }
 0x283   :  { %vm1052_vm11 = vcmp.gt.f32.partialorder %v915_v2, 0.0  ;;  %v1116_v10 = vmul.f32 0.01, %v915_v2  ;;  %v918_v40 = vpop.f32.mrb[28].mxu1 }
 0x284   :  { %v919_v34 = vadd.f32 %v918_v40, %v3003_v8  ;;  %v920_v54 = vpop.f32.mrb[29].mxu1  ;;  %1492 = vmatprep.mubr.f32.mxu0 %v3145_v42  ;;  %v1179_v23 = vsel %vm1051_vm10, %v913_v1, %v1115_v36 }
 0x285   :  { %v921_v47 = vadd.f32 %v920_v54, %v3006_v24  ;;  %1493 = vmatmul.mubr.f32.gmra.mrb[88].mxu0 %v3148_v17  ;;  %v1180_v0 = vsel %vm1052_vm11, %v915_v2, %v1116_v10  ;;  %v3158_v27 = vadd.f32 %v1179_v23, %v2850_v63 }
 0x286   :  { %vm1053_vm12 = vcmp.gt.f32.partialorder %v919_v34, 0.0  ;;  %v1117_v48 = vmul.f32 0.01, %v919_v34  ;;  %v3155_v26 = vadd.f32 %v1180_v0, %v2847_v61 }
 0x287   :  { %vm1054_vm13 = vcmp.gt.f32.partialorder %v921_v47, 0.0  ;;  %v1118_v16 = vmul.f32 0.01, %v921_v47  ;;  %v924_v51 = vpop.f32.mrb[30].mxu1 }
 0x288   :  { %v925_v29 = vadd.f32 %v924_v51, %v3003_v8  ;;  %v926_v37 = vpop.f32.mrb[31].mxu1  ;;  %1498 = vmatprep.mubr.f32.mxu0 %v3155_v26  ;;  %v1181_v1 = vsel %vm1053_vm12, %v919_v34, %v1117_v48 }
 0x289   :  { %v927_v49 = vadd.f32 %v926_v37, %v3006_v24  ;;  %1499 = vmatmul.mubr.f32.gmra.mrb[90].mxu0 %v3158_v27  ;;  %v1182_v5 = vsel %vm1054_vm13, %v921_v47, %v1118_v16  ;;  %v3168_v36 = vadd.f32 %v1181_v1, %v2858_v13 }
 0x28a   :  { %vm1055_vm14 = vcmp.gt.f32.partialorder %v925_v29, 0.0  ;;  %v1119_v61 = vmul.f32 0.01, %v925_v29  ;;  %v3165_v2 = vadd.f32 %v1182_v5, %v2855_v9 }
 0x28b   :  { %vm1056_vm15 = vcmp.gt.f32.partialorder %v927_v49, 0.0  ;;  %v1120_v19 = vmul.f32 0.01, %v927_v49  ;;  %v930_v63 = vpop.f32.mrb[32].mxu1 }
 0x28c   :  { %v931_v10 = vadd.f32 %v930_v63, %v3003_v8  ;;  %v932_v40 = vpop.f32.mrb[33].mxu1  ;;  %1504 = vmatprep.mubr.f32.mxu0 %v3165_v2  ;;  %v1183_v34 = vsel %vm1055_vm14, %v925_v29, %v1119_v61 }
 0x28d   :  { %v933_v54 = vadd.f32 %v932_v40, %v3006_v24  ;;  %1505 = vmatmul.mubr.f32.gmra.mrb[92].mxu0 %v3168_v36  ;;  %v1184_v23 = vsel %vm1056_vm15, %v927_v49, %v1120_v19  ;;  %v3178_v48 = vadd.f32 %v1183_v34, %v2866_v31 }
 0x28e   :  { %vm1057_vm0 = vcmp.gt.f32.partialorder %v931_v10, 0.0  ;;  %v1121_v9 = vmul.f32 0.01, %v931_v10  ;;  %v3175_v47 = vadd.f32 %v1184_v23, %v2863_v28 }
 0x28f   :  { %vm1058_vm1 = vcmp.gt.f32.partialorder %v933_v54, 0.0  ;;  %v1122_v0 = vmul.f32 0.01, %v933_v54  ;;  %v936_v13 = vpop.f32.mrb[34].mxu1 }
 0x290   :  { %v937_v16 = vadd.f32 %v936_v13, %v3003_v8  ;;  %v938_v51 = vpop.f32.mrb[35].mxu1  ;;  %1510 = vmatprep.mubr.f32.mxu0 %v3175_v47  ;;  %v1185_v29 = vsel %vm1057_vm0, %v931_v10, %v1121_v9 }
 0x291   :  { %v939_v37 = vadd.f32 %v938_v51, %v3006_v24  ;;  %1511 = vmatmul.mubr.f32.gmra.mrb[94].mxu0 %v3178_v48  ;;  %v1186_v1 = vsel %vm1058_vm1, %v933_v54, %v1122_v0  ;;  %v3188_v61 = vadd.f32 %v1185_v29, %v2874_v45 }
 0x292   :  { %vm1059_vm2 = vcmp.gt.f32.partialorder %v937_v16, 0.0  ;;  %v1123_v28 = vmul.f32 0.01, %v937_v16  ;;  %v3185_v49 = vadd.f32 %v1186_v1, %v2871_v43 }
 0x293   :  { %vm1060_vm3 = vcmp.gt.f32.partialorder %v939_v37, 0.0  ;;  %v1124_v5 = vmul.f32 0.01, %v939_v37  ;;  %v942_v31 = vpop.f32.mrb[36].mxu1 }
 0x294   :  { %v943_v19 = vadd.f32 %v942_v31, %v3003_v8  ;;  %v944_v63 = vpop.f32.mrb[37].mxu1  ;;  %1516 = vmatprep.mubr.f32.mxu0 %v3185_v49  ;;  %v1187_v10 = vsel %vm1059_vm2, %v937_v16, %v1123_v28 }
 0x295   :  { %v945_v40 = vadd.f32 %v944_v63, %v3006_v24  ;;  %1517 = vmatmul.mubr.f32.gmra.mrb[96].mxu0 %v3188_v61  ;;  %v1188_v34 = vsel %vm1060_vm3, %v939_v37, %v1124_v5  ;;  %v3198_v9 = vadd.f32 %v1187_v10, %v2882_v62 }
 0x296   :  { %vm1061_vm4 = vcmp.gt.f32.partialorder %v943_v19, 0.0  ;;  %v1125_v43 = vmul.f32 0.01, %v943_v19  ;;  %v3195_v54 = vadd.f32 %v1188_v34, %v2879_v58 }
 0x297   :  { %vm1062_vm5 = vcmp.gt.f32.partialorder %v945_v40, 0.0  ;;  %v1126_v23 = vmul.f32 0.01, %v945_v40  ;;  %v948_v45 = vpop.f32.mrb[38].mxu1 }
 0x298   :  { %v949_v0 = vadd.f32 %v948_v45, %v3003_v8  ;;  %v950_v13 = vpop.f32.mrb[39].mxu1  ;;  %1522 = vmatprep.mubr.f32.mxu0 %v3195_v54  ;;  %v1189_v16 = vsel %vm1061_vm4, %v943_v19, %v1125_v43 }
 0x299   :  { %v951_v51 = vadd.f32 %v950_v13, %v3006_v24  ;;  %1523 = vmatmul.mubr.f32.gmra.mrb[98].mxu0 %v3198_v9  ;;  %v1190_v29 = vsel %vm1062_vm5, %v945_v40, %v1126_v23  ;;  %v3208_v28 = vadd.f32 %v1189_v16, %v2890_v15 }
 0x29a   :  { %vm1063_vm6 = vcmp.gt.f32.partialorder %v949_v0, 0.0  ;;  %v1127_v58 = vmul.f32 0.01, %v949_v0  ;;  %v3205_v37 = vadd.f32 %v1190_v29, %v2887_v11 }
 0x29b   :  { %vm1064_vm7 = vcmp.gt.f32.partialorder %v951_v51, 0.0  ;;  %v1128_v1 = vmul.f32 0.01, %v951_v51  ;;  %v954_v62 = vpop.f32.mrb[40].mxu1 }
 0x29c   :  { %v955_v5 = vadd.f32 %v954_v62, %v3003_v8  ;;  %v956_v31 = vpop.f32.mrb[41].mxu1  ;;  %1528 = vmatprep.mubr.f32.mxu0 %v3205_v37  ;;  %v1191_v19 = vsel %vm1063_vm6, %v949_v0, %v1127_v58  ;;  %v3609_v58 = vld [vmem:[#allocation18_spill] sm:$0xff] }
 0x29d   :  { %v957_v63 = vadd.f32 %v956_v31, %v3006_v24  ;;  %1529 = vmatmul.mubr.f32.gmra.mrb[100].mxu0 %v3208_v28  ;;  %v1192_v10 = vsel %vm1064_vm7, %v951_v51, %v1128_v1  ;;  %v3218_v43 = vadd.f32 %v1191_v19, %v2898_v39 }
 0x29e   :  { %vm1065_vm8 = vcmp.gt.f32.partialorder %v955_v5, 0.0  ;;  %v1129_v11 = vmul.f32 0.01, %v955_v5  ;;  %v3215_v40 = vadd.f32 %v1192_v10, %v2895_v33  ;;  %v3611_v10 = vld [vmem:[#allocation19_spill] sm:$0xff] }
 0x29f   :  { %vm1066_vm9 = vcmp.gt.f32.partialorder %v957_v63, 0.0  ;;  %v1130_v34 = vmul.f32 0.01, %v957_v63  ;;  %v960_v15 = vpop.f32.mrb[42].mxu1 }
 0x2a0   :  { %v961_v23 = vadd.f32 %v960_v15, %v3003_v8  ;;  %v962_v45 = vpop.f32.mrb[43].mxu1  ;;  %1534 = vmatprep.mubr.f32.mxu0 %v3215_v40  ;;  %v1193_v0 = vsel %vm1065_vm8, %v955_v5, %v1129_v11 }
 0x2a1   :  { %v963_v13 = vadd.f32 %v962_v45, %v3006_v24  ;;  %1535 = vmatmul.mubr.f32.gmra.mrb[102].mxu0 %v3218_v43  ;;  %v1194_v16 = vsel %vm1066_vm9, %v957_v63, %v1130_v34  ;;  %v3228_v1 = vadd.f32 %v1193_v0, %v3609_v58  ;;  %v3613_v45 = vld [vmem:[#allocation20_spill] sm:$0xff] }
 0x2a2   :  { %vm1067_vm10 = vcmp.gt.f32.partialorder %v961_v23, 0.0  ;;  %v1131_v33 = vmul.f32 0.01, %v961_v23  ;;  %v3225_v51 = vadd.f32 %v1194_v16, %v2903_v55 }
 0x2a3   :  { %vm1068_vm11 = vcmp.gt.f32.partialorder %v963_v13, 0.0  ;;  %v1132_v29 = vmul.f32 0.01, %v963_v13  ;;  %v966_v39 = vpop.f32.mrb[44].mxu1  ;;  %3610 = vst [vmem:[#allocation18_spill] sm:$0xff] %v3228_v1 }
 0x2a4   :  { %v967_v62 = vadd.f32 %v966_v39, %v3003_v8  ;;  %v968_v31 = vpop.f32.mrb[45].mxu1  ;;  %1540 = vmatprep.mubr.f32.mxu0 %v3225_v51  ;;  %v1195_v5 = vsel %vm1067_vm10, %v961_v23, %v1131_v33 }
 0x2a5   :  { %v969_v19 = vadd.f32 %v968_v31, %v3006_v24  ;;  %1541 = vmatmul.mubr.f32.gmra.mrb[104].mxu0 %v3228_v1  ;;  %v1196_v63 = vsel %vm1068_vm11, %v963_v13, %v1132_v29  ;;  %v3238_v0 = vadd.f32 %v1195_v5, %v3613_v45 }
 0x2a6   :  { %vm1069_vm12 = vcmp.gt.f32.partialorder %v967_v62, 0.0  ;;  %v1133_v55 = vmul.f32 0.01, %v967_v62  ;;  %v3235_v11 = vadd.f32 %v1196_v63, %v3611_v10  ;;  %v3615_v63 = vld [vmem:[#allocation21_spill] sm:$0xff] }
 0x2a7   :  { %vm1070_vm13 = vcmp.gt.f32.partialorder %v969_v19, 0.0  ;;  %v1134_v34 = vmul.f32 0.01, %v969_v19  ;;  %v972_v15 = vpop.f32.mrb[46].mxu1  ;;  %3614 = vst [vmem:[#allocation20_spill] sm:$0xff] %v3238_v0 }
 0x2a8   :  { %3612 = vst [vmem:[#allocation19_spill] sm:$0xff] %v3235_v11  ;;  %v973_v16 = vadd.f32 %v972_v15, %v3003_v8  ;;  %v974_v39 = vpop.f32.mrb[47].mxu1  ;;  %1546 = vmatprep.mubr.f32.mxu0 %v3235_v11  ;;  %v1197_v23 = vsel %vm1069_vm12, %v967_v62, %v1133_v55  ;;  %v1899_v55 = vld [vmem:[#allocation10 + $0xf0] sm:$0xff] }
 0x2a9   :  { %v975_v33 = vadd.f32 %v974_v39, %v3006_v24  ;;  %1547 = vmatmul.mubr.f32.gmra.mrb[106].mxu0 %v3238_v0  ;;  %v1198_v13 = vsel %vm1070_vm13, %v969_v19, %v1134_v34  ;;  %v3248_v10 = vadd.f32 %v1197_v23, %v3615_v63  ;;  %v1900_v39 = vld [vmem:[#allocation10 + $0xf8] sm:$0xff]  ;;  %v3616_v0 = vld [vmem:[#allocation22_spill] sm:$0xff] }
 0x2aa   :  { %vm1071_vm14 = vcmp.gt.f32.partialorder %v973_v16, 0.0  ;;  %v1135_v29 = vmul.f32 0.01, %v973_v16  ;;  %v3245_v58 = vadd.f32 %v1198_v13, %v2919_v44  ;;  %v2422_v34 = vpack.c.bf16 %v1900_v39, %v1899_v55  ;;  %v3618_v63 = vld [vmem:[#allocation23_spill] sm:$0xff]  ;;  %v3620_v55 = vld [vmem:[#allocation24_spill] sm:$0xff] }
 0x2ab   :  { %vm1072_vm15 = vcmp.gt.f32.partialorder %v975_v33, 0.0  ;;  %v1136_v31 = vmul.f32 0.01, %v975_v33  ;;  %v978_v5 = vpop.f32.mrb[48].mxu1 }
 0x2ac   :  { %v979_v15 = vadd.f32 %v978_v5, %v3003_v8  ;;  %v980_v45 = vpop.f32.mrb[49].mxu1  ;;  %1552 = vmatprep.mubr.f32.mxu0 %v3245_v58  ;;  %v1199_v62 = vsel %vm1071_vm14, %v973_v16, %v1135_v29  ;;  %2423 = vmatpush1.bf16.msra.mxu1 %v2422_v34  ;;  %v3622_v34 = vld [vmem:[#allocation25_spill] sm:$0xff] }
 0x2ad   :  { %v981_v19 = vadd.f32 %v980_v45, %v3006_v24  ;;  %1553 = vmatmul.mubr.f32.gmra.mrb[108].mxu0 %v3248_v10  ;;  %v1200_v44 = vsel %vm1072_vm15, %v975_v33, %v1136_v31  ;;  %v3258_v1 = vadd.f32 %v1199_v62, %v3618_v63 }
 0x2ae   :  { %vm1073_vm0 = vcmp.gt.f32.partialorder %v979_v15, 0.0  ;;  %v1137_v13 = vmul.f32 0.01, %v979_v15  ;;  %v3255_v11 = vadd.f32 %v1200_v44, %v3616_v0 }
 0x2af   :  { %vm1074_vm1 = vcmp.gt.f32.partialorder %v981_v19, 0.0  ;;  %v1138_v23 = vmul.f32 0.01, %v981_v19  ;;  %v984_v5 = vpop.f32.mrb[50].mxu1  ;;  %3619 = vst [vmem:[#allocation22_spill] sm:$0xff] %v3258_v1 }
 0x2b0   :  { %3617 = vst [vmem:[#allocation21_spill] sm:$0xff] %v3255_v11  ;;  %v985_v16 = vadd.f32 %v984_v5, %v3003_v8  ;;  %v986_v29 = vpop.f32.mrb[51].mxu1  ;;  %1558 = vmatprep.mubr.f32.mxu0 %v3255_v11  ;;  %v1201_v45 = vsel %vm1073_vm0, %v979_v15, %v1137_v13 }
 0x2b1   :  { %v987_v33 = vadd.f32 %v986_v29, %v3006_v24  ;;  %1559 = vmatmul.mubr.f32.gmra.mrb[110].mxu0 %v3258_v1  ;;  %v1202_v31 = vsel %vm1074_vm1, %v981_v19, %v1138_v23  ;;  %v3268_v63 = vadd.f32 %v1201_v45, %v3622_v34  ;;  %v3624_v29 = vld [vmem:[#allocation26_spill] sm:$0xff]  ;;  %v3626_v34 = vld [vmem:[#allocation27_spill] sm:$0xff] }
 0x2b2   :  { %vm1075_vm2 = vcmp.gt.f32.partialorder %v985_v16, 0.0  ;;  %v1139_v0 = vmul.f32 0.01, %v985_v16  ;;  %v3265_v39 = vadd.f32 %v1202_v31, %v3620_v55 }
 0x2b3   :  { %vm1076_vm3 = vcmp.gt.f32.partialorder %v987_v33, 0.0  ;;  %v1140_v62 = vmul.f32 0.01, %v987_v33  ;;  %v990_v44 = vpop.f32.mrb[52].mxu1  ;;  %3623 = vst [vmem:[#allocation24_spill] sm:$0xff] %v3268_v63 }
 0x2b4   :  { %3621 = vst [vmem:[#allocation23_spill] sm:$0xff] %v3265_v39  ;;  %v991_v5 = vadd.f32 %v990_v44, %v3003_v8  ;;  %v992_v11 = vpop.f32.mrb[53].mxu1  ;;  %1564 = vmatprep.mubr.f32.mxu0 %v3265_v39  ;;  %v1203_v15 = vsel %vm1075_vm2, %v985_v16, %v1139_v0 }
 0x2b5   :  { %v993_v13 = vadd.f32 %v992_v11, %v3006_v24  ;;  %1565 = vmatmul.mubr.f32.gmra.mrb[112].mxu0 %v3268_v63  ;;  %v1204_v19 = vsel %vm1076_vm3, %v987_v33, %v1140_v62  ;;  %v3278_v1 = vadd.f32 %v1203_v15, %v3626_v34  ;;  %v3628_v62 = vld [vmem:[#allocation28_spill] sm:$0xff]  ;;  %v3630_v34 = vld [vmem:[#allocation29_spill] sm:$0xff] }
 0x2b6   :  { %vm1077_vm4 = vcmp.gt.f32.partialorder %v991_v5, 0.0  ;;  %v1141_v23 = vmul.f32 0.01, %v991_v5  ;;  %v3275_v31 = vadd.f32 %v1204_v19, %v3624_v29 }
 0x2b7   :  { %vm1078_vm5 = vcmp.gt.f32.partialorder %v993_v13, 0.0  ;;  %v1142_v55 = vmul.f32 0.01, %v993_v13  ;;  %v996_v45 = vpop.f32.mrb[54].mxu1  ;;  %3627 = vst [vmem:[#allocation26_spill] sm:$0xff] %v3278_v1 }
 0x2b8   :  { %3625 = vst [vmem:[#allocation25_spill] sm:$0xff] %v3275_v31  ;;  %v997_v44 = vadd.f32 %v996_v45, %v3003_v8  ;;  %v998_v39 = vpop.f32.mrb[55].mxu1  ;;  %1570 = vmatprep.mubr.f32.mxu0 %v3275_v31  ;;  %v1205_v11 = vsel %vm1077_vm4, %v991_v5, %v1141_v23 }
 0x2b9   :  { %v999_v16 = vadd.f32 %v998_v39, %v3006_v24  ;;  %1571 = vmatmul.mubr.f32.gmra.mrb[114].mxu0 %v3278_v1  ;;  %v1206_v33 = vsel %vm1078_vm5, %v993_v13, %v1142_v55  ;;  %v3288_v63 = vadd.f32 %v1205_v11, %v3630_v34  ;;  %v3632_v55 = vld [vmem:[#allocation30_spill] sm:$0xff]  ;;  %v3634_v34 = vld [vmem:[#allocation31_spill] sm:$0xff] }
 0x2ba   :  { %vm1079_vm6 = vcmp.gt.f32.partialorder %v997_v44, 0.0  ;;  %v1143_v0 = vmul.f32 0.01, %v997_v44  ;;  %v3285_v19 = vadd.f32 %v1206_v33, %v3628_v62 }
 0x2bb   :  { %vm1080_vm7 = vcmp.gt.f32.partialorder %v999_v16, 0.0  ;;  %v1144_v29 = vmul.f32 0.01, %v999_v16  ;;  %v1002_v15 = vpop.f32.mrb[56].mxu1  ;;  %3631 = vst [vmem:[#allocation28_spill] sm:$0xff] %v3288_v63 }
 0x2bc   :  { %3629 = vst [vmem:[#allocation27_spill] sm:$0xff] %v3285_v19  ;;  %v1003_v45 = vadd.f32 %v1002_v15, %v3003_v8  ;;  %v1004_v31 = vpop.f32.mrb[57].mxu1  ;;  %1576 = vmatprep.mubr.f32.mxu0 %v3285_v19  ;;  %v1207_v39 = vsel %vm1079_vm6, %v997_v44, %v1143_v0 }
 0x2bd   :  { %v1005_v5 = vadd.f32 %v1004_v31, %v3006_v24  ;;  %1577 = vmatmul.mubr.f32.gmra.mrb[116].mxu0 %v3288_v63  ;;  %v1208_v13 = vsel %vm1080_vm7, %v999_v16, %v1144_v29  ;;  %v3298_v1 = vadd.f32 %v1207_v39, %v3634_v34  ;;  %v3636_v29 = vld [vmem:[#allocation32_spill] sm:$0xff]  ;;  %v3638_v34 = vld [vmem:[#allocation33_spill] sm:$0xff] }
 0x2be   :  { %vm1081_vm8 = vcmp.gt.f32.partialorder %v1003_v45, 0.0  ;;  %v1145_v23 = vmul.f32 0.01, %v1003_v45  ;;  %v3295_v33 = vadd.f32 %v1208_v13, %v3632_v55 }
 0x2bf   :  { %vm1082_vm9 = vcmp.gt.f32.partialorder %v1005_v5, 0.0  ;;  %v1146_v62 = vmul.f32 0.01, %v1005_v5  ;;  %v1008_v11 = vpop.f32.mrb[58].mxu1  ;;  %3635 = vst [vmem:[#allocation30_spill] sm:$0xff] %v3298_v1 }
 0x2c0   :  { %3633 = vst [vmem:[#allocation29_spill] sm:$0xff] %v3295_v33  ;;  %v1009_v15 = vadd.f32 %v1008_v11, %v3003_v8  ;;  %v1010_v19 = vpop.f32.mrb[59].mxu1  ;;  %1582 = vmatprep.mubr.f32.mxu0 %v3295_v33  ;;  %v1209_v31 = vsel %vm1081_vm8, %v1003_v45, %v1145_v23 }
 0x2c1   :  { %v1011_v44 = vadd.f32 %v1010_v19, %v3006_v24  ;;  %1583 = vmatmul.mubr.f32.gmra.mrb[118].mxu0 %v3298_v1  ;;  %v1210_v16 = vsel %vm1082_vm9, %v1005_v5, %v1146_v62  ;;  %v3308_v63 = vadd.f32 %v1209_v31, %v3638_v34  ;;  %v3639_v62 = vld [vmem:[#allocation34_spill] sm:$0xff]  ;;  %v3640_v34 = vld [vmem:[#allocation35_spill] sm:$0xff] }
 0x2c2   :  { %vm1083_vm10 = vcmp.gt.f32.partialorder %v1009_v15, 0.0  ;;  %v1147_v0 = vmul.f32 0.01, %v1009_v15  ;;  %v3305_v13 = vadd.f32 %v1210_v16, %v3636_v29 }
 0x2c3   :  { %vm1084_vm11 = vcmp.gt.f32.partialorder %v1011_v44, 0.0  ;;  %v1148_v55 = vmul.f32 0.01, %v1011_v44  ;;  %v1014_v39 = vpop.f32.mrb[60].mxu1 }
 0x2c4   :  { %3637 = vst [vmem:[#allocation31_spill] sm:$0xff] %v3305_v13  ;;  %v1015_v11 = vadd.f32 %v1014_v39, %v3003_v8  ;;  %v1016_v33 = vpop.f32.mrb[61].mxu1  ;;  %1588 = vmatprep.mubr.f32.mxu0 %v3305_v13  ;;  %v1211_v19 = vsel %vm1083_vm10, %v1009_v15, %v1147_v0 }
 0x2c5   :  { %v1017_v45 = vadd.f32 %v1016_v33, %v3006_v24  ;;  %1589 = vmatmul.mubr.f32.gmra.mrb[120].mxu0 %v3308_v63  ;;  %v1212_v5 = vsel %vm1084_vm11, %v1011_v44, %v1148_v55  ;;  %v3318_v1 = vadd.f32 %v1211_v19, %v3640_v34  ;;  %v3642_v55 = vld [vmem:[#allocation36_spill] sm:$0xff]  ;;  %v3644_v19 = vld [vmem:[#allocation37_spill] sm:$0xff] }
 0x2c6   :  { %vm1085_vm12 = vcmp.gt.f32.partialorder %v1015_v11, 0.0  ;;  %v1149_v23 = vmul.f32 0.01, %v1015_v11  ;;  %v3315_v16 = vadd.f32 %v1212_v5, %v3639_v62 }
 0x2c7   :  { %vm1086_vm13 = vcmp.gt.f32.partialorder %v1017_v45, 0.0  ;;  %v1150_v29 = vmul.f32 0.01, %v1017_v45  ;;  %v1020_v31 = vpop.f32.mrb[62].mxu1  ;;  %3641 = vst [vmem:[#allocation32_spill] sm:$0xff] %v3318_v1 }
 0x2c8   :  { %v1021_v39 = vadd.f32 %v1020_v31, %v3003_v8  ;;  %v1022_v13 = vpop.f32.mrb[63].mxu1  ;;  %1594 = vmatprep.mubr.f32.mxu0 %v3315_v16  ;;  %v1213_v33 = vsel %vm1085_vm12, %v1015_v11, %v1149_v23  ;;  %v3650_v31 = vld [vmem:[#allocation16_spill] sm:$0xff] }
 0x2c9   :  { %v1023_v15 = vadd.f32 %v1022_v13, %v3006_v24  ;;  %1595 = vmatmul.mubr.f32.gmra.mrb[122].mxu0 %v3318_v1  ;;  %v1214_v44 = vsel %vm1086_vm13, %v1017_v45, %v1150_v29  ;;  %v3328_v34 = vadd.f32 %v1213_v33, %v3644_v19  ;;  %v3646_v24 = vld [vmem:[#allocation38_spill] sm:$0xff]  ;;  %v3648_v45 = vld [vmem:[#allocation39_spill] sm:$0xff]  ;;  %v103_v29 = vld [vmem:[%s3535_s6] sm:$0x3] }
 0x2ca   :  { %vm1087_vm14 = vcmp.gt.f32.partialorder %v1021_v39, 0.0  ;;  %v1151_v0 = vmul.f32 0.01, %v1021_v39  ;;  %v3325_v5 = vadd.f32 %v1214_v44, %v3642_v55  ;;  %v3344_v33 = vrot.slane %v103_v29, %v3650_v31 }
 0x2cb   :  { %vm1088_vm15 = vcmp.gt.f32.partialorder %v1023_v15, 0.0  ;;  %v1152_v62 = vmul.f32 0.01, %v1023_v15  ;;  %3645 = vst [vmem:[#allocation34_spill] sm:$0xff] %v3328_v34 }
 0x2cc   :  { %3643 = vst [vmem:[#allocation33_spill] sm:$0xff] %v3325_v5  ;;  %1600 = vmatprep.mubr.f32.mxu0 %v3325_v5  ;;  %v1215_v8 = vsel %vm1087_vm14, %v1021_v39, %v1151_v0  ;;  %v3651_v39 = vld [vmem:[#allocation17_spill] sm:$0xff] }
 0x2cd   :  { %1601 = vmatmul.mubr.f32.gmra.mrb[124].mxu0 %v3328_v34  ;;  %v1216_v11 = vsel %vm1088_vm15, %v1023_v15, %v1152_v62  ;;  %v3336_v23 = vadd.f32 %v1215_v8, %v3648_v45  ;;  %v3347_v44 = vrot.slane %v103_v29, %v3651_v39 }
 0x2ce   :  { %v3333_v13 = vadd.f32 %v1216_v11, %v3646_v24 }
 0x2cf   :  { %3649 = vst [vmem:[#allocation36_spill] sm:$0xff] %v3336_v23 }
 0x2d0   :  { %3647 = vst [vmem:[#allocation35_spill] sm:$0xff] %v3333_v13  ;;  %1606 = vmatprep.mubr.f32.mxu0 %v3333_v13 }
 0x2d1   :  { %1607 = vmatmul.mubr.f32.gmra.mrb[126].mxu0 %v3336_v23 }
 0x328   :  { %v1422_v15 = vpop.f32.mrb[64].mxu0 }
 0x329   :  { %v1423_v0 = vadd.f32 %v1422_v15, %v3344_v33  ;;  %v1424_v55 = vpop.f32.mrb[65].mxu0 }
 0x32a   :  { %v1425_v62 = vadd.f32 %v1424_v55, %v3347_v44 }
 0x32b   :  { %vm1613_vm0 = vcmp.gt.f32.partialorder %v1423_v0, 0.0  ;;  %v1677_v19 = vmul.f32 0.01, %v1423_v0 }
 0x32c   :  { %vm1614_vm1 = vcmp.gt.f32.partialorder %v1425_v62, 0.0  ;;  %v1678_v8 = vmul.f32 0.01, %v1425_v62  ;;  %v1428_v11 = vpop.f32.mrb[66].mxu0 }
 0x32d   :  { %v1741_v24 = vsel %vm1613_vm0, %v1423_v0, %v1677_v19  ;;  %v1429_v45 = vadd.f32 %v1428_v11, %v3344_v33  ;;  %v1430_v23 = vpop.f32.mrb[67].mxu0 }
 0x32e   :  { %v1431_v31 = vadd.f32 %v1430_v23, %v3347_v44  ;;  %v1742_v13 = vsel %vm1614_vm1, %v1425_v62, %v1678_v8  ;;  %v1805_v15 = vadd.f32 %v1741_v24, %v3017_v59 }
 0x32f   :  { %vm1615_vm2 = vcmp.gt.f32.partialorder %v1429_v45, 0.0  ;;  %v1679_v29 = vmul.f32 0.01, %v1429_v45  ;;  %v1806_v39 = vadd.f32 %v1742_v13, %v3014_v25 }
 0x330   :  { %vm1616_vm3 = vcmp.gt.f32.partialorder %v1431_v31, 0.0  ;;  %v1680_v55 = vmul.f32 0.01, %v1431_v31  ;;  %v1434_v34 = vpop.f32.mrb[68].mxu0 }
 0x331   :  { %v1435_v5 = vadd.f32 %v1434_v34, %v3344_v33  ;;  %v1436_v1 = vpop.f32.mrb[69].mxu0  ;;  %1971 = vmatprep.mubr.f32.mxu1 %v1806_v39  ;;  %v1743_v0 = vsel %vm1615_vm2, %v1429_v45, %v1679_v29 }
 0x332   :  { %v1437_v19 = vadd.f32 %v1436_v1, %v3347_v44  ;;  %1972 = vmatmul.mubr.f32.vlgmr.msra.gmra.mrb[64].mxu1 %v1805_v15  ;;  %v1744_v11 = vsel %vm1616_vm3, %v1431_v31, %v1680_v55  ;;  %v1807_v59 = vadd.f32 %v1743_v0, %v3028_v52 }
 0x333   :  { %vm1617_vm4 = vcmp.gt.f32.partialorder %v1435_v5, 0.0  ;;  %v1681_v23 = vmul.f32 0.01, %v1435_v5  ;;  %v1808_v62 = vadd.f32 %v1744_v11, %v3025_v50 }
 0x334   :  { %vm1618_vm5 = vcmp.gt.f32.partialorder %v1437_v19, 0.0  ;;  %v1682_v25 = vmul.f32 0.01, %v1437_v19  ;;  %v1440_v13 = vpop.f32.mrb[70].mxu0 }
 0x335   :  { %v1441_v8 = vadd.f32 %v1440_v13, %v3344_v33  ;;  %v1442_v24 = vpop.f32.mrb[71].mxu0  ;;  %1976 = vmatprep.mubr.f32.mxu1 %v1808_v62  ;;  %v1745_v34 = vsel %vm1617_vm4, %v1435_v5, %v1681_v23 }
 0x336   :  { %v1443_v45 = vadd.f32 %v1442_v24, %v3347_v44  ;;  %1977 = vmatmul.mubr.f32.gmra.mrb[66].mxu1 %v1807_v59  ;;  %v1746_v1 = vsel %vm1618_vm5, %v1437_v19, %v1682_v25  ;;  %v1809_v15 = vadd.f32 %v1745_v34, %v3039_v32 }
 0x337   :  { %vm1619_vm6 = vcmp.gt.f32.partialorder %v1441_v8, 0.0  ;;  %v1683_v31 = vmul.f32 0.01, %v1441_v8  ;;  %v1810_v29 = vadd.f32 %v1746_v1, %v3036_v30 }
 0x338   :  { %vm1620_vm7 = vcmp.gt.f32.partialorder %v1443_v45, 0.0  ;;  %v1684_v50 = vmul.f32 0.01, %v1443_v45  ;;  %v1446_v39 = vpop.f32.mrb[72].mxu0 }
 0x339   :  { %v1447_v52 = vadd.f32 %v1446_v39, %v3344_v33  ;;  %v1448_v55 = vpop.f32.mrb[73].mxu0  ;;  %1981 = vmatprep.mubr.f32.mxu1 %v1810_v29  ;;  %v1747_v0 = vsel %vm1619_vm6, %v1441_v8, %v1683_v31 }
 0x33a   :  { %v1449_v5 = vadd.f32 %v1448_v55, %v3347_v44  ;;  %1982 = vmatmul.mubr.f32.gmra.mrb[68].mxu1 %v1809_v15  ;;  %v1748_v11 = vsel %vm1620_vm7, %v1443_v45, %v1684_v50  ;;  %v1811_v25 = vadd.f32 %v1747_v0, %v3050_v18 }
 0x33b   :  { %vm1621_vm8 = vcmp.gt.f32.partialorder %v1447_v52, 0.0  ;;  %v1685_v19 = vmul.f32 0.01, %v1447_v52  ;;  %v1812_v23 = vadd.f32 %v1748_v11, %v3047_v20 }
 0x33c   :  { %vm1622_vm9 = vcmp.gt.f32.partialorder %v1449_v5, 0.0  ;;  %v1686_v30 = vmul.f32 0.01, %v1449_v5  ;;  %v1452_v62 = vpop.f32.mrb[74].mxu0 }
 0x33d   :  { %v1453_v32 = vadd.f32 %v1452_v62, %v3344_v33  ;;  %v1454_v13 = vpop.f32.mrb[75].mxu0  ;;  %1986 = vmatprep.mubr.f32.mxu1 %v1812_v23  ;;  %v1749_v59 = vsel %vm1621_vm8, %v1447_v52, %v1685_v19 }
 0x33e   :  { %v1455_v8 = vadd.f32 %v1454_v13, %v3347_v44  ;;  %1987 = vmatmul.mubr.f32.gmra.mrb[70].mxu1 %v1811_v25  ;;  %v1750_v24 = vsel %vm1622_vm9, %v1449_v5, %v1686_v30  ;;  %v1813_v31 = vadd.f32 %v1749_v59, %v3061_v57 }
 0x33f   :  { %vm1623_vm10 = vcmp.gt.f32.partialorder %v1453_v32, 0.0  ;;  %v1687_v34 = vmul.f32 0.01, %v1453_v32  ;;  %v1814_v45 = vadd.f32 %v1750_v24, %v3058_v46 }
 0x340   :  { %vm1624_vm11 = vcmp.gt.f32.partialorder %v1455_v8, 0.0  ;;  %v1688_v20 = vmul.f32 0.01, %v1455_v8  ;;  %v1458_v1 = vpop.f32.mrb[76].mxu0 }
 0x341   :  { %v1459_v18 = vadd.f32 %v1458_v1, %v3344_v33  ;;  %v1460_v29 = vpop.f32.mrb[77].mxu0  ;;  %1991 = vmatprep.mubr.f32.mxu1 %v1814_v45  ;;  %v1751_v50 = vsel %vm1623_vm10, %v1453_v32, %v1687_v34 }
 0x342   :  { %v1461_v39 = vadd.f32 %v1460_v29, %v3347_v44  ;;  %1992 = vmatmul.mubr.f32.gmra.mrb[72].mxu1 %v1813_v31  ;;  %v1752_v15 = vsel %vm1624_vm11, %v1455_v8, %v1688_v20  ;;  %v1815_v5 = vadd.f32 %v1751_v50, %v3072_v35 }
 0x343   :  { %vm1625_vm12 = vcmp.gt.f32.partialorder %v1459_v18, 0.0  ;;  %v1689_v52 = vmul.f32 0.01, %v1459_v18  ;;  %v1816_v55 = vadd.f32 %v1752_v15, %v3069_v41 }
 0x344   :  { %vm1626_vm13 = vcmp.gt.f32.partialorder %v1461_v39, 0.0  ;;  %v1690_v46 = vmul.f32 0.01, %v1461_v39  ;;  %v1464_v0 = vpop.f32.mrb[78].mxu0 }
 0x345   :  { %v1465_v57 = vadd.f32 %v1464_v0, %v3344_v33  ;;  %v1466_v11 = vpop.f32.mrb[79].mxu0  ;;  %1996 = vmatprep.mubr.f32.mxu1 %v1816_v55  ;;  %v1753_v19 = vsel %vm1625_vm12, %v1459_v18, %v1689_v52 }
 0x346   :  { %v1467_v23 = vadd.f32 %v1466_v11, %v3347_v44  ;;  %1997 = vmatmul.mubr.f32.gmra.mrb[74].mxu1 %v1815_v5  ;;  %v1754_v30 = vsel %vm1626_vm13, %v1461_v39, %v1690_v46  ;;  %v1817_v13 = vadd.f32 %v1753_v19, %v3083_v7 }
 0x347   :  { %vm1627_vm14 = vcmp.gt.f32.partialorder %v1465_v57, 0.0  ;;  %v1691_v62 = vmul.f32 0.01, %v1465_v57  ;;  %v1818_v25 = vadd.f32 %v1754_v30, %v3080_v4 }
 0x348   :  { %vm1628_vm15 = vcmp.gt.f32.partialorder %v1467_v23, 0.0  ;;  %v1692_v41 = vmul.f32 0.01, %v1467_v23  ;;  %v1470_v32 = vpop.f32.mrb[80].mxu0 }
 0x349   :  { %v1471_v35 = vadd.f32 %v1470_v32, %v3344_v33  ;;  %v1472_v59 = vpop.f32.mrb[81].mxu0  ;;  %2001 = vmatprep.mubr.f32.mxu1 %v1818_v25  ;;  %v1755_v8 = vsel %vm1627_vm14, %v1465_v57, %v1691_v62 }
 0x34a   :  { %v1473_v24 = vadd.f32 %v1472_v59, %v3347_v44  ;;  %2002 = vmatmul.mubr.f32.gmra.mrb[76].mxu1 %v1817_v13  ;;  %v1756_v34 = vsel %vm1628_vm15, %v1467_v23, %v1692_v41  ;;  %v1819_v31 = vadd.f32 %v1755_v8, %v3094_v22 }
 0x34b   :  { %vm1629_vm0 = vcmp.gt.f32.partialorder %v1471_v35, 0.0  ;;  %v1693_v45 = vmul.f32 0.01, %v1471_v35  ;;  %v1820_v20 = vadd.f32 %v1756_v34, %v3091_v6 }
 0x34c   :  { %vm1630_vm1 = vcmp.gt.f32.partialorder %v1473_v24, 0.0  ;;  %v1694_v4 = vmul.f32 0.01, %v1473_v24  ;;  %v1476_v1 = vpop.f32.mrb[82].mxu0 }
 0x34d   :  { %v1477_v7 = vadd.f32 %v1476_v1, %v3344_v33  ;;  %v1478_v18 = vpop.f32.mrb[83].mxu0  ;;  %2006 = vmatprep.mubr.f32.mxu1 %v1820_v20  ;;  %v1757_v29 = vsel %vm1629_vm0, %v1471_v35, %v1693_v45 }
 0x34e   :  { %v1479_v50 = vadd.f32 %v1478_v18, %v3347_v44  ;;  %2007 = vmatmul.mubr.f32.gmra.mrb[78].mxu1 %v1819_v31  ;;  %v1758_v39 = vsel %vm1630_vm1, %v1473_v24, %v1694_v4  ;;  %v1821_v46 = vadd.f32 %v1757_v29, %v3105_v14 }
 0x34f   :  { %vm1631_vm2 = vcmp.gt.f32.partialorder %v1477_v7, 0.0  ;;  %v1695_v15 = vmul.f32 0.01, %v1477_v7  ;;  %v1822_v52 = vadd.f32 %v1758_v39, %v3102_v21 }
 0x350   :  { %vm1632_vm3 = vcmp.gt.f32.partialorder %v1479_v50, 0.0  ;;  %v1696_v6 = vmul.f32 0.01, %v1479_v50  ;;  %v1482_v55 = vpop.f32.mrb[84].mxu0 }
 0x351   :  { %v1483_v22 = vadd.f32 %v1482_v55, %v3344_v33  ;;  %v1484_v0 = vpop.f32.mrb[85].mxu0  ;;  %2011 = vmatprep.mubr.f32.mxu1 %v1822_v52  ;;  %v1759_v5 = vsel %vm1631_vm2, %v1477_v7, %v1695_v15 }
 0x352   :  { %v1485_v57 = vadd.f32 %v1484_v0, %v3347_v44  ;;  %2012 = vmatmul.mubr.f32.gmra.mrb[80].mxu1 %v1821_v46  ;;  %v1760_v11 = vsel %vm1632_vm3, %v1479_v50, %v1696_v6  ;;  %v1823_v62 = vadd.f32 %v1759_v5, %v3116_v53 }
 0x353   :  { %vm1633_vm4 = vcmp.gt.f32.partialorder %v1483_v22, 0.0  ;;  %v1697_v19 = vmul.f32 0.01, %v1483_v22  ;;  %v1824_v23 = vadd.f32 %v1760_v11, %v3113_v38 }
 0x354   :  { %vm1634_vm5 = vcmp.gt.f32.partialorder %v1485_v57, 0.0  ;;  %v1698_v21 = vmul.f32 0.01, %v1485_v57  ;;  %v1488_v30 = vpop.f32.mrb[86].mxu0 }
 0x355   :  { %v1489_v14 = vadd.f32 %v1488_v30, %v3344_v33  ;;  %v1490_v25 = vpop.f32.mrb[87].mxu0  ;;  %2016 = vmatprep.mubr.f32.mxu1 %v1824_v23  ;;  %v1761_v41 = vsel %vm1633_vm4, %v1483_v22, %v1697_v19 }
 0x356   :  { %v1491_v32 = vadd.f32 %v1490_v25, %v3347_v44  ;;  %2017 = vmatmul.mubr.f32.gmra.mrb[82].mxu1 %v1823_v62  ;;  %v1762_v13 = vsel %vm1634_vm5, %v1485_v57, %v1698_v21  ;;  %v1825_v24 = vadd.f32 %v1761_v41, %v3127_v56 }
 0x357   :  { %vm1635_vm6 = vcmp.gt.f32.partialorder %v1489_v14, 0.0  ;;  %v1699_v35 = vmul.f32 0.01, %v1489_v14  ;;  %v1826_v59 = vadd.f32 %v1762_v13, %v3124_v12 }
 0x358   :  { %vm1636_vm7 = vcmp.gt.f32.partialorder %v1491_v32, 0.0  ;;  %v1700_v38 = vmul.f32 0.01, %v1491_v32  ;;  %v1494_v8 = vpop.f32.mrb[88].mxu0 }
 0x359   :  { %v1495_v53 = vadd.f32 %v1494_v8, %v3344_v33  ;;  %v1496_v34 = vpop.f32.mrb[89].mxu0  ;;  %2021 = vmatprep.mubr.f32.mxu1 %v1826_v59  ;;  %v1763_v45 = vsel %vm1635_vm6, %v1489_v14, %v1699_v35 }
 0x35a   :  { %v1497_v20 = vadd.f32 %v1496_v34, %v3347_v44  ;;  %2022 = vmatmul.mubr.f32.gmra.mrb[84].mxu1 %v1825_v24  ;;  %v1764_v4 = vsel %vm1636_vm7, %v1491_v32, %v1700_v38  ;;  %v1827_v18 = vadd.f32 %v1763_v45, %v3138_v3 }
 0x35b   :  { %vm1637_vm8 = vcmp.gt.f32.partialorder %v1495_v53, 0.0  ;;  %v1701_v1 = vmul.f32 0.01, %v1495_v53  ;;  %v1828_v31 = vadd.f32 %v1764_v4, %v3135_v60 }
 0x35c   :  { %vm1638_vm9 = vcmp.gt.f32.partialorder %v1497_v20, 0.0  ;;  %v1702_v12 = vmul.f32 0.01, %v1497_v20  ;;  %v1500_v7 = vpop.f32.mrb[90].mxu0 }
 0x35d   :  { %v1501_v56 = vadd.f32 %v1500_v7, %v3344_v33  ;;  %v1502_v29 = vpop.f32.mrb[91].mxu0  ;;  %2026 = vmatprep.mubr.f32.mxu1 %v1828_v31  ;;  %v1765_v50 = vsel %vm1637_vm8, %v1495_v53, %v1701_v1 }
 0x35e   :  { %v1503_v39 = vadd.f32 %v1502_v29, %v3347_v44  ;;  %2027 = vmatmul.mubr.f32.gmra.mrb[86].mxu1 %v1827_v18  ;;  %v1766_v15 = vsel %vm1638_vm9, %v1497_v20, %v1702_v12  ;;  %v1829_v46 = vadd.f32 %v1765_v50, %v3148_v17 }
 0x35f   :  { %vm1639_vm10 = vcmp.gt.f32.partialorder %v1501_v56, 0.0  ;;  %v1703_v52 = vmul.f32 0.01, %v1501_v56  ;;  %v1830_v6 = vadd.f32 %v1766_v15, %v3145_v42 }
 0x360   :  { %vm1640_vm11 = vcmp.gt.f32.partialorder %v1503_v39, 0.0  ;;  %v1704_v60 = vmul.f32 0.01, %v1503_v39  ;;  %v1506_v55 = vpop.f32.mrb[92].mxu0 }
 0x361   :  { %v1507_v3 = vadd.f32 %v1506_v55, %v3344_v33  ;;  %v1508_v22 = vpop.f32.mrb[93].mxu0  ;;  %2031 = vmatprep.mubr.f32.mxu1 %v1830_v6  ;;  %v1767_v0 = vsel %vm1639_vm10, %v1501_v56, %v1703_v52 }
 0x362   :  { %v1509_v5 = vadd.f32 %v1508_v22, %v3347_v44  ;;  %2032 = vmatmul.mubr.f32.gmra.mrb[88].mxu1 %v1829_v46  ;;  %v1768_v57 = vsel %vm1640_vm11, %v1503_v39, %v1704_v60  ;;  %v1831_v21 = vadd.f32 %v1767_v0, %v3158_v27 }
 0x363   :  { %vm1641_vm12 = vcmp.gt.f32.partialorder %v1507_v3, 0.0  ;;  %v1705_v11 = vmul.f32 0.01, %v1507_v3  ;;  %v1832_v19 = vadd.f32 %v1768_v57, %v3155_v26 }
 0x364   :  { %vm1642_vm13 = vcmp.gt.f32.partialorder %v1509_v5, 0.0  ;;  %v1706_v42 = vmul.f32 0.01, %v1509_v5  ;;  %v1512_v23 = vpop.f32.mrb[94].mxu0 }
 0x365   :  { %v1513_v17 = vadd.f32 %v1512_v23, %v3344_v33  ;;  %v1514_v30 = vpop.f32.mrb[95].mxu0  ;;  %2036 = vmatprep.mubr.f32.mxu1 %v1832_v19  ;;  %v1769_v62 = vsel %vm1641_vm12, %v1507_v3, %v1705_v11 }
 0x366   :  { %v1515_v14 = vadd.f32 %v1514_v30, %v3347_v44  ;;  %2037 = vmatmul.mubr.f32.gmra.mrb[90].mxu1 %v1831_v21  ;;  %v1770_v25 = vsel %vm1642_vm13, %v1509_v5, %v1706_v42  ;;  %v1833_v35 = vadd.f32 %v1769_v62, %v3168_v36 }
 0x367   :  { %vm1643_vm14 = vcmp.gt.f32.partialorder %v1513_v17, 0.0  ;;  %v1707_v41 = vmul.f32 0.01, %v1513_v17  ;;  %v1834_v32 = vadd.f32 %v1770_v25, %v3165_v2 }
 0x368   :  { %vm1644_vm15 = vcmp.gt.f32.partialorder %v1515_v14, 0.0  ;;  %v1708_v26 = vmul.f32 0.01, %v1515_v14  ;;  %v1518_v13 = vpop.f32.mrb[96].mxu0 }
 0x369   :  { %v1519_v27 = vadd.f32 %v1518_v13, %v3344_v33  ;;  %v1520_v59 = vpop.f32.mrb[97].mxu0  ;;  %2041 = vmatprep.mubr.f32.mxu1 %v1834_v32  ;;  %v1771_v38 = vsel %vm1643_vm14, %v1513_v17, %v1707_v41 }
 0x36a   :  { %v1521_v8 = vadd.f32 %v1520_v59, %v3347_v44  ;;  %2042 = vmatmul.mubr.f32.gmra.mrb[92].mxu1 %v1833_v35  ;;  %v1772_v24 = vsel %vm1644_vm15, %v1515_v14, %v1708_v26  ;;  %v1835_v20 = vadd.f32 %v1771_v38, %v3178_v48 }
 0x36b   :  { %vm1645_vm0 = vcmp.gt.f32.partialorder %v1519_v27, 0.0  ;;  %v1709_v53 = vmul.f32 0.01, %v1519_v27  ;;  %v1836_v34 = vadd.f32 %v1772_v24, %v3175_v47 }
 0x36c   :  { %vm1646_vm1 = vcmp.gt.f32.partialorder %v1521_v8, 0.0  ;;  %v1710_v2 = vmul.f32 0.01, %v1521_v8  ;;  %v1524_v45 = vpop.f32.mrb[98].mxu0 }
 0x36d   :  { %v1525_v36 = vadd.f32 %v1524_v45, %v3344_v33  ;;  %v1526_v4 = vpop.f32.mrb[99].mxu0  ;;  %2046 = vmatprep.mubr.f32.mxu1 %v1836_v34  ;;  %v1773_v1 = vsel %vm1645_vm0, %v1519_v27, %v1709_v53 }
 0x36e   :  { %v1527_v31 = vadd.f32 %v1526_v4, %v3347_v44  ;;  %2047 = vmatmul.mubr.f32.gmra.mrb[94].mxu1 %v1835_v20  ;;  %v1774_v12 = vsel %vm1646_vm1, %v1521_v8, %v1710_v2  ;;  %v1837_v29 = vadd.f32 %v1773_v1, %v3188_v61  ;;  %v3652_v8 = vld [vmem:[#allocation18_spill] sm:$0xff] }
 0x36f   :  { %vm1647_vm2 = vcmp.gt.f32.partialorder %v1525_v36, 0.0  ;;  %v1711_v7 = vmul.f32 0.01, %v1525_v36  ;;  %v1838_v18 = vadd.f32 %v1774_v12, %v3185_v49 }
 0x370   :  { %vm1648_vm3 = vcmp.gt.f32.partialorder %v1527_v31, 0.0  ;;  %v1712_v47 = vmul.f32 0.01, %v1527_v31  ;;  %v1530_v56 = vpop.f32.mrb[100].mxu0 }
 0x371   :  { %v1531_v48 = vadd.f32 %v1530_v56, %v3344_v33  ;;  %v1532_v50 = vpop.f32.mrb[101].mxu0  ;;  %2051 = vmatprep.mubr.f32.mxu1 %v1838_v18  ;;  %v1775_v39 = vsel %vm1647_vm2, %v1525_v36, %v1711_v7  ;;  %v3653_v36 = vld [vmem:[#allocation19_spill] sm:$0xff] }
 0x372   :  { %v1533_v15 = vadd.f32 %v1532_v50, %v3347_v44  ;;  %2052 = vmatmul.mubr.f32.gmra.mrb[96].mxu1 %v1837_v29  ;;  %v1776_v52 = vsel %vm1648_vm3, %v1527_v31, %v1712_v47  ;;  %v1839_v46 = vadd.f32 %v1775_v39, %v3198_v9  ;;  %v3654_v31 = vld [vmem:[#allocation20_spill] sm:$0xff] }
 0x373   :  { %vm1649_vm4 = vcmp.gt.f32.partialorder %v1531_v48, 0.0  ;;  %v1713_v6 = vmul.f32 0.01, %v1531_v48  ;;  %v1840_v60 = vadd.f32 %v1776_v52, %v3195_v54 }
 0x374   :  { %vm1650_vm5 = vcmp.gt.f32.partialorder %v1533_v15, 0.0  ;;  %v1714_v49 = vmul.f32 0.01, %v1533_v15  ;;  %v1536_v55 = vpop.f32.mrb[102].mxu0 }
 0x375   :  { %v1537_v61 = vadd.f32 %v1536_v55, %v3344_v33  ;;  %v1538_v3 = vpop.f32.mrb[103].mxu0  ;;  %2056 = vmatprep.mubr.f32.mxu1 %v1840_v60  ;;  %v1777_v22 = vsel %vm1649_vm4, %v1531_v48, %v1713_v6 }
 0x376   :  { %v1539_v0 = vadd.f32 %v1538_v3, %v3347_v44  ;;  %2057 = vmatmul.mubr.f32.gmra.mrb[98].mxu1 %v1839_v46  ;;  %v1778_v5 = vsel %vm1650_vm5, %v1533_v15, %v1714_v49  ;;  %v1841_v42 = vadd.f32 %v1777_v22, %v3208_v28  ;;  %v3655_v3 = vld [vmem:[#allocation21_spill] sm:$0xff] }
 0x377   :  { %vm1651_vm6 = vcmp.gt.f32.partialorder %v1537_v61, 0.0  ;;  %v1715_v57 = vmul.f32 0.01, %v1537_v61  ;;  %v1842_v11 = vadd.f32 %v1778_v5, %v3205_v37  ;;  %v3656_v5 = vld [vmem:[#allocation22_spill] sm:$0xff] }
 0x378   :  { %vm1652_vm7 = vcmp.gt.f32.partialorder %v1539_v0, 0.0  ;;  %v1716_v54 = vmul.f32 0.01, %v1539_v0  ;;  %v1542_v19 = vpop.f32.mrb[104].mxu0 }
 0x379   :  { %v1543_v9 = vadd.f32 %v1542_v19, %v3344_v33  ;;  %v1544_v23 = vpop.f32.mrb[105].mxu0  ;;  %2061 = vmatprep.mubr.f32.mxu1 %v1842_v11  ;;  %v1779_v21 = vsel %vm1651_vm6, %v1537_v61, %v1715_v57 }
 0x37a   :  { %v1545_v17 = vadd.f32 %v1544_v23, %v3347_v44  ;;  %2062 = vmatmul.mubr.f32.gmra.mrb[100].mxu1 %v1841_v42  ;;  %v1780_v30 = vsel %vm1652_vm7, %v1539_v0, %v1716_v54  ;;  %v1843_v41 = vadd.f32 %v1779_v21, %v3218_v43  ;;  %v3657_v23 = vld [vmem:[#allocation23_spill] sm:$0xff] }
 0x37b   :  { %vm1653_vm8 = vcmp.gt.f32.partialorder %v1543_v9, 0.0  ;;  %v1717_v62 = vmul.f32 0.01, %v1543_v9  ;;  %v1844_v14 = vadd.f32 %v1780_v30, %v3215_v40 }
 0x37c   :  { %vm1654_vm9 = vcmp.gt.f32.partialorder %v1545_v17, 0.0  ;;  %v1718_v37 = vmul.f32 0.01, %v1545_v17  ;;  %v1548_v25 = vpop.f32.mrb[106].mxu0 }
 0x37d   :  { %v1549_v28 = vadd.f32 %v1548_v25, %v3344_v33  ;;  %v1550_v32 = vpop.f32.mrb[107].mxu0  ;;  %2066 = vmatprep.mubr.f32.mxu1 %v1844_v14  ;;  %v1781_v26 = vsel %vm1653_vm8, %v1543_v9, %v1717_v62  ;;  %v3658_v62 = vld [vmem:[#allocation24_spill] sm:$0xff] }
 0x37e   :  { %v1551_v13 = vadd.f32 %v1550_v32, %v3347_v44  ;;  %2067 = vmatmul.mubr.f32.gmra.mrb[102].mxu1 %v1843_v41  ;;  %v1782_v35 = vsel %vm1654_vm9, %v1545_v17, %v1718_v37  ;;  %v1845_v24 = vadd.f32 %v1781_v26, %v3652_v8 }
 0x37f   :  { %vm1655_vm10 = vcmp.gt.f32.partialorder %v1549_v28, 0.0  ;;  %v1719_v27 = vmul.f32 0.01, %v1549_v28  ;;  %v1846_v59 = vadd.f32 %v1782_v35, %v3225_v51 }
 0x380   :  { %vm1656_vm11 = vcmp.gt.f32.partialorder %v1551_v13, 0.0  ;;  %v1720_v40 = vmul.f32 0.01, %v1551_v13  ;;  %v1554_v38 = vpop.f32.mrb[108].mxu0 }
 0x381   :  { %v1555_v43 = vadd.f32 %v1554_v38, %v3344_v33  ;;  %v1556_v53 = vpop.f32.mrb[109].mxu0  ;;  %2071 = vmatprep.mubr.f32.mxu1 %v1846_v59  ;;  %v1783_v34 = vsel %vm1655_vm10, %v1549_v28, %v1719_v27 }
 0x382   :  { %v1557_v2 = vadd.f32 %v1556_v53, %v3347_v44  ;;  %2072 = vmatmul.mubr.f32.gmra.mrb[104].mxu1 %v1845_v24  ;;  %v1784_v45 = vsel %vm1656_vm11, %v1551_v13, %v1720_v40  ;;  %v1847_v12 = vadd.f32 %v1783_v34, %v3654_v31  ;;  %v3659_v13 = vld [vmem:[#allocation25_spill] sm:$0xff]  ;;  %v3660_v40 = vld [vmem:[#allocation26_spill] sm:$0xff] }
 0x383   :  { %vm1657_vm12 = vcmp.gt.f32.partialorder %v1555_v43, 0.0  ;;  %v1721_v20 = vmul.f32 0.01, %v1555_v43  ;;  %v1848_v4 = vadd.f32 %v1784_v45, %v3653_v36  ;;  %v3661_v45 = vld [vmem:[#allocation27_spill] sm:$0xff] }
 0x384   :  { %vm1658_vm13 = vcmp.gt.f32.partialorder %v1557_v2, 0.0  ;;  %v1722_v51 = vmul.f32 0.01, %v1557_v2  ;;  %v1560_v1 = vpop.f32.mrb[110].mxu0 }
 0x385   :  { %v1561_v7 = vadd.f32 %v1560_v1, %v3344_v33  ;;  %v1562_v18 = vpop.f32.mrb[111].mxu0  ;;  %2076 = vmatprep.mubr.f32.mxu1 %v1848_v4  ;;  %v1785_v47 = vsel %vm1657_vm12, %v1555_v43, %v1721_v20 }
 0x386   :  { %v1563_v56 = vadd.f32 %v1562_v18, %v3347_v44  ;;  %2077 = vmatmul.mubr.f32.gmra.mrb[106].mxu1 %v1847_v12  ;;  %v1786_v29 = vsel %vm1658_vm13, %v1557_v2, %v1722_v51  ;;  %v1849_v52 = vadd.f32 %v1785_v47, %v3248_v10  ;;  %v3662_v51 = vld [vmem:[#allocation28_spill] sm:$0xff] }
 0x387   :  { %vm1659_vm14 = vcmp.gt.f32.partialorder %v1561_v7, 0.0  ;;  %v1723_v48 = vmul.f32 0.01, %v1561_v7  ;;  %v1850_v50 = vadd.f32 %v1786_v29, %v3245_v58  ;;  %v3663_v29 = vld [vmem:[#allocation29_spill] sm:$0xff] }
 0x388   :  { %vm1660_vm15 = vcmp.gt.f32.partialorder %v1563_v56, 0.0  ;;  %v1724_v39 = vmul.f32 0.01, %v1563_v56  ;;  %v1566_v15 = vpop.f32.mrb[112].mxu0 }
 0x389   :  { %v1567_v6 = vadd.f32 %v1566_v15, %v3344_v33  ;;  %v1568_v60 = vpop.f32.mrb[113].mxu0  ;;  %2081 = vmatprep.mubr.f32.mxu1 %v1850_v50  ;;  %v1787_v49 = vsel %vm1659_vm14, %v1561_v7, %v1723_v48  ;;  %v3664_v15 = vld [vmem:[#allocation30_spill] sm:$0xff] }
 0x38a   :  { %v1569_v55 = vadd.f32 %v1568_v60, %v3347_v44  ;;  %2082 = vmatmul.mubr.f32.gmra.mrb[108].mxu1 %v1849_v52  ;;  %v1788_v46 = vsel %vm1660_vm15, %v1563_v56, %v1724_v39  ;;  %v1851_v57 = vadd.f32 %v1787_v49, %v3656_v5 }
 0x38b   :  { %vm1661_vm0 = vcmp.gt.f32.partialorder %v1567_v6, 0.0  ;;  %v1725_v61 = vmul.f32 0.01, %v1567_v6  ;;  %v1852_v22 = vadd.f32 %v1788_v46, %v3655_v3  ;;  %v3665_v3 = vld [vmem:[#allocation31_spill] sm:$0xff] }
 0x38c   :  { %vm1662_vm1 = vcmp.gt.f32.partialorder %v1569_v55, 0.0  ;;  %v1726_v58 = vmul.f32 0.01, %v1569_v55  ;;  %v1572_v0 = vpop.f32.mrb[114].mxu0 }
 0x38d   :  { %v1573_v10 = vadd.f32 %v1572_v0, %v3344_v33  ;;  %v1574_v11 = vpop.f32.mrb[115].mxu0  ;;  %2086 = vmatprep.mubr.f32.mxu1 %v1852_v22  ;;  %v1789_v54 = vsel %vm1661_vm0, %v1567_v6, %v1725_v61 }
 0x38e   :  { %v1575_v19 = vadd.f32 %v1574_v11, %v3347_v44  ;;  %2087 = vmatmul.mubr.f32.gmra.mrb[110].mxu1 %v1851_v57  ;;  %v1790_v42 = vsel %vm1662_vm1, %v1569_v55, %v1726_v58  ;;  %v1853_v14 = vadd.f32 %v1789_v54, %v3658_v62 }
 0x38f   :  { %vm1663_vm2 = vcmp.gt.f32.partialorder %v1573_v10, 0.0  ;;  %v1727_v9 = vmul.f32 0.01, %v1573_v10  ;;  %v1854_v21 = vadd.f32 %v1790_v42, %v3657_v23 }
 0x390   :  { %vm1664_vm3 = vcmp.gt.f32.partialorder %v1575_v19, 0.0  ;;  %v1728_v17 = vmul.f32 0.01, %v1575_v19  ;;  %v1578_v30 = vpop.f32.mrb[116].mxu0 }
 0x391   :  { %v1579_v37 = vadd.f32 %v1578_v30, %v3344_v33  ;;  %v1580_v25 = vpop.f32.mrb[117].mxu0  ;;  %2091 = vmatprep.mubr.f32.mxu1 %v1854_v21  ;;  %v1791_v41 = vsel %vm1663_vm2, %v1573_v10, %v1727_v9 }
 0x392   :  { %v1581_v28 = vadd.f32 %v1580_v25, %v3347_v44  ;;  %2092 = vmatmul.mubr.f32.gmra.mrb[112].mxu1 %v1853_v14  ;;  %v1792_v32 = vsel %vm1664_vm3, %v1575_v19, %v1728_v17  ;;  %v1855_v38 = vadd.f32 %v1791_v41, %v3660_v40  ;;  %v3666_v17 = vld [vmem:[#allocation32_spill] sm:$0xff] }
 0x393   :  { %vm1665_vm4 = vcmp.gt.f32.partialorder %v1579_v37, 0.0  ;;  %v1729_v26 = vmul.f32 0.01, %v1579_v37  ;;  %v1856_v35 = vadd.f32 %v1792_v32, %v3659_v13  ;;  %v3670_v40 = vld [vmem:[#allocation36_spill] sm:$0xff] }
 0x394   :  { %vm1666_vm5 = vcmp.gt.f32.partialorder %v1581_v28, 0.0  ;;  %v1730_v27 = vmul.f32 0.01, %v1581_v28  ;;  %v1584_v59 = vpop.f32.mrb[118].mxu0 }
 0x395   :  { %v1585_v8 = vadd.f32 %v1584_v59, %v3344_v33  ;;  %v1586_v24 = vpop.f32.mrb[119].mxu0  ;;  %2096 = vmatprep.mubr.f32.mxu1 %v1856_v35  ;;  %v1793_v43 = vsel %vm1665_vm4, %v1579_v37, %v1729_v26  ;;  %v3668_v26 = vld [vmem:[#allocation34_spill] sm:$0xff] }
 0x396   :  { %v1587_v53 = vadd.f32 %v1586_v24, %v3347_v44  ;;  %2097 = vmatmul.mubr.f32.gmra.mrb[114].mxu1 %v1855_v38  ;;  %v1794_v34 = vsel %vm1666_vm5, %v1581_v28, %v1730_v27  ;;  %v1857_v1 = vadd.f32 %v1793_v43, %v3662_v51  ;;  %v3667_v28 = vld [vmem:[#allocation33_spill] sm:$0xff] }
 0x397   :  { %vm1667_vm6 = vcmp.gt.f32.partialorder %v1585_v8, 0.0  ;;  %v1731_v2 = vmul.f32 0.01, %v1585_v8  ;;  %v1858_v20 = vadd.f32 %v1794_v34, %v3661_v45 }
 0x398   :  { %vm1668_vm7 = vcmp.gt.f32.partialorder %v1587_v53, 0.0  ;;  %v1732_v36 = vmul.f32 0.01, %v1587_v53  ;;  %v1590_v4 = vpop.f32.mrb[120].mxu0 }
 0x399   :  { %v1591_v31 = vadd.f32 %v1590_v4, %v3344_v33  ;;  %v1592_v12 = vpop.f32.mrb[121].mxu0  ;;  %2101 = vmatprep.mubr.f32.mxu1 %v1858_v20  ;;  %v1795_v7 = vsel %vm1667_vm6, %v1585_v8, %v1731_v2 }
 0x39a   :  { %v1593_v18 = vadd.f32 %v1592_v12, %v3347_v44  ;;  %2102 = vmatmul.mubr.f32.gmra.mrb[116].mxu1 %v1857_v1  ;;  %v1796_v47 = vsel %vm1668_vm7, %v1587_v53, %v1732_v36  ;;  %v1859_v52 = vadd.f32 %v1795_v7, %v3664_v15 }
 0x39b   :  { %vm1669_vm8 = vcmp.gt.f32.partialorder %v1591_v31, 0.0  ;;  %v1733_v56 = vmul.f32 0.01, %v1591_v31  ;;  %v1860_v48 = vadd.f32 %v1796_v47, %v3663_v29 }
 0x39c   :  { %vm1670_vm9 = vcmp.gt.f32.partialorder %v1593_v18, 0.0  ;;  %v1734_v50 = vmul.f32 0.01, %v1593_v18  ;;  %v1596_v39 = vpop.f32.mrb[122].mxu0 }
 0x39d   :  { %v1597_v6 = vadd.f32 %v1596_v39, %v3344_v33  ;;  %v1598_v60 = vpop.f32.mrb[123].mxu0  ;;  %2106 = vmatprep.mubr.f32.mxu1 %v1860_v48  ;;  %v1797_v49 = vsel %vm1669_vm8, %v1591_v31, %v1733_v56 }
 0x39e   :  { %v1599_v55 = vadd.f32 %v1598_v60, %v3347_v44  ;;  %2107 = vmatmul.mubr.f32.gmra.mrb[118].mxu1 %v1859_v52  ;;  %v1798_v46 = vsel %vm1670_vm9, %v1593_v18, %v1734_v50  ;;  %v1861_v5 = vadd.f32 %v1797_v49, %v3308_v63 }
 0x39f   :  { %vm1671_vm10 = vcmp.gt.f32.partialorder %v1597_v6, 0.0  ;;  %v1735_v61 = vmul.f32 0.01, %v1597_v6  ;;  %v1862_v22 = vadd.f32 %v1798_v46, %v3665_v3 }
 0x3a0   :  { %vm1672_vm11 = vcmp.gt.f32.partialorder %v1599_v55, 0.0  ;;  %v1736_v58 = vmul.f32 0.01, %v1599_v55  ;;  %v1602_v0 = vpop.f32.mrb[124].mxu0 }
 0x3a1   :  { %v1603_v57 = vadd.f32 %v1602_v0, %v3344_v33  ;;  %v1604_v10 = vpop.f32.mrb[125].mxu0  ;;  %2111 = vmatprep.mubr.f32.mxu1 %v1862_v22  ;;  %v1799_v11 = vsel %vm1671_vm10, %v1597_v6, %v1735_v61 }
 0x3a2   :  { %v1605_v54 = vadd.f32 %v1604_v10, %v3347_v44  ;;  %2112 = vmatmul.mubr.f32.gmra.mrb[120].mxu1 %v1861_v5  ;;  %v1800_v19 = vsel %vm1672_vm11, %v1599_v55, %v1736_v58  ;;  %v1863_v30 = vadd.f32 %v1799_v11, %v3666_v17 }
 0x3a3   :  { %vm1673_vm12 = vcmp.gt.f32.partialorder %v1603_v57, 0.0  ;;  %v1737_v42 = vmul.f32 0.01, %v1603_v57  ;;  %v1864_v9 = vadd.f32 %v1800_v19, %v3315_v16 }
 0x3a4   :  { %vm1674_vm13 = vcmp.gt.f32.partialorder %v1605_v54, 0.0  ;;  %v1738_v23 = vmul.f32 0.01, %v1605_v54  ;;  %v1608_v21 = vpop.f32.mrb[126].mxu0 }
 0x3a5   :  { %v1609_v63 = vadd.f32 %v1608_v21, %v3344_v33  ;;  %v1610_v62 = vpop.f32.mrb[127].mxu0  ;;  %2116 = vmatprep.mubr.f32.mxu1 %v1864_v9  ;;  %v1801_v14 = vsel %vm1673_vm12, %v1603_v57, %v1737_v42  ;;  %v3669_v33 = vld [vmem:[#allocation35_spill] sm:$0xff] }
 0x3a6   :  { %v1611_v37 = vadd.f32 %v1610_v62, %v3347_v44  ;;  %2117 = vmatmul.mubr.f32.gmra.mrb[122].mxu1 %v1863_v30  ;;  %v1802_v25 = vsel %vm1674_vm13, %v1605_v54, %v1738_v23  ;;  %v1865_v13 = vadd.f32 %v1801_v14, %v3668_v26  ;;  %v3480_v44 = vld [vmem:[%s3537_s8] ss:$0 sm:$0xff]  ;;  %s2585_s8 = smov [#allocation11]  }
 0x3a7   :  { %vm1675_vm14 = vcmp.gt.f32.partialorder %v1609_v63, 0.0  ;;  %v1739_v41 = vmul.f32 0.01, %v1609_v63  ;;  %v1866_v32 = vadd.f32 %v1802_v25, %v3667_v28  ;;  %s2169_s11 = sshll.u32 %s2585_s8, 4  ;;  %s2170_s11 = int_to_ptr.vmem [resolvable:$true] %s2169_s11 }
 0x3a8   :  { %vm1676_vm15 = vcmp.gt.f32.partialorder %v1611_v37, 0.0  ;;  %v1740_v16 = vmul.f32 0.01, %v1611_v37  ;;  %s2545_s13 = scalar_lea.vmem %s2170_s11, 4096  ;;  %p2550_p13 = scmp.lt.s32.totalorder %s2170_s11, %s2170_s11 }
 0x3a9   :  { %2121 = vmatprep.mubr.f32.mxu1 %v1866_v32  ;;  %v1803_v35 = vsel %vm1675_vm14, %v1609_v63, %v1739_v41  ;;  %p2546_p12 = scmp.ne.s32.totalorder %s2170_s11, %s2545_s13  ;;  %p2551_p0 = scmp.lt.s32.totalorder %s2545_s13, %s2545_s13 }
 0x3aa   :  { %2122 = vmatmul.mubr.f32.gmra.mrb[124].mxu1 %v1865_v13  ;;  %v1804_v27 = vsel %vm1676_vm15, %v1611_v37, %v1740_v16  ;;  %v1867_v38 = vadd.f32 %v1803_v35, %v3670_v40 }
 0x3ab   :  { %v1868_v59 = vadd.f32 %v1804_v27, %v3669_v33  ;;  %p2552_p1 = por %p2551_p0, %p2550_p13 }
 0x3ad   :  { %2126 = vmatprep.mubr.f32.mxu1 %v1868_v59  ;;  %p2553_p2 = pnand %p2552_p1, %p2546_p12 }
 0x3ae   :  { %2127 = vmatmul.mubr.f32.gmra.mrb[126].mxu1 %v1867_v38 }
 0x405   :  { %v1973_v8 = vpop.f32.mrb[64].mxu1 }
 0x406   :  { %v1974_v24 = vadd.f32 %v3480_v44, %v1973_v8  ;;  %v1975_v43 = vpop.f32.mrb[65].mxu1 }
 0x408   :  { %2132 = vst [vmem:[#allocation11] sm:$0xff] %v1974_v24 }
 0x409   :  { %v1978_v53 = vpop.f32.mrb[66].mxu1 }
 0x40a   :  { %v1979_v34 = vadd.f32 %v3480_v44, %v1978_v53  ;;  %v1980_v2 = vpop.f32.mrb[67].mxu1 }
 0x40c   :  { %2133 = vst [vmem:[#allocation11 + $0x8] sm:$0xff] %v1979_v34 }
 0x40d   :  { %v1983_v45 = vpop.f32.mrb[68].mxu1 }
 0x40e   :  { %v1984_v20 = vadd.f32 %v3480_v44, %v1983_v45  ;;  %v1985_v36 = vpop.f32.mrb[69].mxu1 }
 0x410   :  { %2134 = vst [vmem:[#allocation11 + $0x10] sm:$0xff] %v1984_v20 }
 0x411   :  { %v1988_v4 = vpop.f32.mrb[70].mxu1 }
 0x412   :  { %v1989_v51 = vadd.f32 %v3480_v44, %v1988_v4  ;;  %v1990_v1 = vpop.f32.mrb[71].mxu1 }
 0x414   :  { %2135 = vst [vmem:[#allocation11 + $0x18] sm:$0xff] %v1989_v51 }
 0x415   :  { %v1993_v31 = vpop.f32.mrb[72].mxu1 }
 0x416   :  { %v1994_v12 = vadd.f32 %v3480_v44, %v1993_v31  ;;  %v1995_v7 = vpop.f32.mrb[73].mxu1 }
 0x418   :  { %2136 = vst [vmem:[#allocation11 + $0x20] sm:$0xff] %v1994_v12 }
 0x419   :  { %v1998_v18 = vpop.f32.mrb[74].mxu1 }
 0x41a   :  { %v1999_v47 = vadd.f32 %v3480_v44, %v1998_v18  ;;  %v2000_v56 = vpop.f32.mrb[75].mxu1 }
 0x41c   :  { %2137 = vst [vmem:[#allocation11 + $0x28] sm:$0xff] %v1999_v47 }
 0x41d   :  { %v2003_v29 = vpop.f32.mrb[76].mxu1 }
 0x41e   :  { %v2004_v48 = vadd.f32 %v3480_v44, %v2003_v29  ;;  %v2005_v50 = vpop.f32.mrb[77].mxu1 }
 0x420   :  { %2138 = vst [vmem:[#allocation11 + $0x30] sm:$0xff] %v2004_v48 }
 0x421   :  { %v2008_v39 = vpop.f32.mrb[78].mxu1 }
 0x422   :  { %v2009_v15 = vadd.f32 %v3480_v44, %v2008_v39  ;;  %v2010_v52 = vpop.f32.mrb[79].mxu1 }
 0x424   :  { %2139 = vst [vmem:[#allocation11 + $0x38] sm:$0xff] %v2009_v15 }
 0x425   :  { %v2013_v6 = vpop.f32.mrb[80].mxu1 }
 0x426   :  { %v2014_v60 = vadd.f32 %v3480_v44, %v2013_v6  ;;  %v2015_v49 = vpop.f32.mrb[81].mxu1 }
 0x428   :  { %2140 = vst [vmem:[#allocation11 + $0x40] sm:$0xff] %v2014_v60 }
 0x429   :  { %v2018_v55 = vpop.f32.mrb[82].mxu1 }
 0x42a   :  { %v2019_v46 = vadd.f32 %v3480_v44, %v2018_v55  ;;  %v2020_v61 = vpop.f32.mrb[83].mxu1 }
 0x42c   :  { %2141 = vst [vmem:[#allocation11 + $0x48] sm:$0xff] %v2019_v46 }
 0x42d   :  { %v2023_v3 = vpop.f32.mrb[84].mxu1 }
 0x42e   :  { %v2024_v22 = vadd.f32 %v3480_v44, %v2023_v3  ;;  %v2025_v58 = vpop.f32.mrb[85].mxu1 }
 0x430   :  { %2142 = vst [vmem:[#allocation11 + $0x50] sm:$0xff] %v2024_v22 }
 0x431   :  { %v2028_v0 = vpop.f32.mrb[86].mxu1 }
 0x432   :  { %v2029_v5 = vadd.f32 %v3480_v44, %v2028_v0  ;;  %v2030_v57 = vpop.f32.mrb[87].mxu1 }
 0x434   :  { %2143 = vst [vmem:[#allocation11 + $0x58] sm:$0xff] %v2029_v5 }
 0x435   :  { %v2033_v10 = vpop.f32.mrb[88].mxu1 }
 0x436   :  { %v2034_v11 = vadd.f32 %v3480_v44, %v2033_v10  ;;  %v2035_v54 = vpop.f32.mrb[89].mxu1 }
 0x438   :  { %2144 = vst [vmem:[#allocation11 + $0x60] sm:$0xff] %v2034_v11 }
 0x439   :  { %v2038_v19 = vpop.f32.mrb[90].mxu1 }
 0x43a   :  { %v2039_v42 = vadd.f32 %v3480_v44, %v2038_v19  ;;  %v2040_v9 = vpop.f32.mrb[91].mxu1 }
 0x43c   :  { %2145 = vst [vmem:[#allocation11 + $0x68] sm:$0xff] %v2039_v42 }
 0x43d   :  { %v2043_v23 = vpop.f32.mrb[92].mxu1 }
 0x43e   :  { %v2044_v21 = vadd.f32 %v3480_v44, %v2043_v23  ;;  %v2045_v17 = vpop.f32.mrb[93].mxu1 }
 0x440   :  { %2146 = vst [vmem:[#allocation11 + $0x70] sm:$0xff] %v2044_v21 }
 0x441   :  { %v2048_v30 = vpop.f32.mrb[94].mxu1 }
 0x442   :  { %v2049_v63 = vadd.f32 %v3480_v44, %v2048_v30  ;;  %v2050_v62 = vpop.f32.mrb[95].mxu1 }
 0x444   :  { %2147 = vst [vmem:[#allocation11 + $0x78] sm:$0xff] %v2049_v63 }
 0x445   :  { %v2053_v14 = vpop.f32.mrb[96].mxu1 }
 0x446   :  { %v2054_v37 = vadd.f32 %v3480_v44, %v2053_v14  ;;  %v2055_v25 = vpop.f32.mrb[97].mxu1 }
 0x448   :  { %2148 = vst [vmem:[#allocation11 + $0x80] sm:$0xff] %v2054_v37 }
 0x449   :  { %v2058_v41 = vpop.f32.mrb[98].mxu1 }
 0x44a   :  { %v2059_v28 = vadd.f32 %v3480_v44, %v2058_v41  ;;  %v2060_v32 = vpop.f32.mrb[99].mxu1 }
 0x44c   :  { %2149 = vst [vmem:[#allocation11 + $0x88] sm:$0xff] %v2059_v28 }
 0x44d   :  { %v2063_v16 = vpop.f32.mrb[100].mxu1 }
 0x44e   :  { %v2064_v26 = vadd.f32 %v3480_v44, %v2063_v16  ;;  %v2065_v13 = vpop.f32.mrb[101].mxu1 }
 0x450   :  { %2150 = vst [vmem:[#allocation11 + $0x90] sm:$0xff] %v2064_v26 }
 0x451   :  { %v2068_v35 = vpop.f32.mrb[102].mxu1 }
 0x452   :  { %v2069_v27 = vadd.f32 %v3480_v44, %v2068_v35  ;;  %v2070_v33 = vpop.f32.mrb[103].mxu1 }
 0x454   :  { %2151 = vst [vmem:[#allocation11 + $0x98] sm:$0xff] %v2069_v27 }
 0x455   :  { %v2073_v59 = vpop.f32.mrb[104].mxu1 }
 0x456   :  { %v2074_v40 = vadd.f32 %v3480_v44, %v2073_v59  ;;  %v2075_v38 = vpop.f32.mrb[105].mxu1 }
 0x458   :  { %2152 = vst [vmem:[#allocation11 + $0xa0] sm:$0xff] %v2074_v40 }
 0x459   :  { %v2078_v8 = vpop.f32.mrb[106].mxu1 }
 0x45a   :  { %v2079_v24 = vadd.f32 %v3480_v44, %v2078_v8  ;;  %v2080_v43 = vpop.f32.mrb[107].mxu1 }
 0x45c   :  { %2153 = vst [vmem:[#allocation11 + $0xa8] sm:$0xff] %v2079_v24 }
 0x45d   :  { %v2083_v53 = vpop.f32.mrb[108].mxu1 }
 0x45e   :  { %v2084_v34 = vadd.f32 %v3480_v44, %v2083_v53  ;;  %v2085_v2 = vpop.f32.mrb[109].mxu1 }
 0x460   :  { %2154 = vst [vmem:[#allocation11 + $0xb0] sm:$0xff] %v2084_v34 }
 0x461   :  { %v2088_v45 = vpop.f32.mrb[110].mxu1 }
 0x462   :  { %v2089_v20 = vadd.f32 %v3480_v44, %v2088_v45  ;;  %v2090_v36 = vpop.f32.mrb[111].mxu1 }
 0x464   :  { %2155 = vst [vmem:[#allocation11 + $0xb8] sm:$0xff] %v2089_v20 }
 0x465   :  { %v2093_v4 = vpop.f32.mrb[112].mxu1 }
 0x466   :  { %v2094_v51 = vadd.f32 %v3480_v44, %v2093_v4  ;;  %v2095_v1 = vpop.f32.mrb[113].mxu1 }
 0x468   :  { %2156 = vst [vmem:[#allocation11 + $0xc0] sm:$0xff] %v2094_v51 }
 0x469   :  { %v2098_v31 = vpop.f32.mrb[114].mxu1 }
 0x46a   :  { %v2099_v12 = vadd.f32 %v3480_v44, %v2098_v31  ;;  %v2100_v7 = vpop.f32.mrb[115].mxu1 }
 0x46c   :  { %2157 = vst [vmem:[#allocation11 + $0xc8] sm:$0xff] %v2099_v12 }
 0x46d   :  { %v2103_v18 = vpop.f32.mrb[116].mxu1 }
 0x46e   :  { %v2104_v47 = vadd.f32 %v3480_v44, %v2103_v18  ;;  %v2105_v56 = vpop.f32.mrb[117].mxu1 }
 0x470   :  { %2158 = vst [vmem:[#allocation11 + $0xd0] sm:$0xff] %v2104_v47 }
 0x471   :  { %v2108_v29 = vpop.f32.mrb[118].mxu1 }
 0x472   :  { %v2109_v48 = vadd.f32 %v3480_v44, %v2108_v29  ;;  %v2110_v50 = vpop.f32.mrb[119].mxu1 }
 0x474   :  { %2159 = vst [vmem:[#allocation11 + $0xd8] sm:$0xff] %v2109_v48 }
 0x475   :  { %v2113_v39 = vpop.f32.mrb[120].mxu1 }
 0x476   :  { %v2114_v15 = vadd.f32 %v3480_v44, %v2113_v39  ;;  %v2115_v52 = vpop.f32.mrb[121].mxu1 }
 0x478   :  { %2160 = vst [vmem:[#allocation11 + $0xe0] sm:$0xff] %v2114_v15 }
 0x479   :  { %v2118_v6 = vpop.f32.mrb[122].mxu1 }
 0x47a   :  { %v2119_v60 = vadd.f32 %v3480_v44, %v2118_v6  ;;  %v2120_v49 = vpop.f32.mrb[123].mxu1 }
 0x47c   :  { %2161 = vst [vmem:[#allocation11 + $0xe8] sm:$0xff] %v2119_v60 }
 0x47d   :  { %v2123_v55 = vpop.f32.mrb[124].mxu1 }
 0x47e   :  { %v2124_v46 = vadd.f32 %v3480_v44, %v2123_v55  ;;  %v2125_v61 = vpop.f32.mrb[125].mxu1 }
 0x480   :  { %2162 = vst [vmem:[#allocation11 + $0xf0] sm:$0xff] %v2124_v46 }
 0x481   :  { %v2128_v3 = vpop.f32.mrb[126].mxu1 }
 0x482   :  { %v2129_v22 = vadd.f32 %v3480_v44, %v2128_v3  ;;  %v2130_v58 = vpop.f32.mrb[127].mxu1 }
 0x484   :  { %2163 = vst [vmem:[#allocation11 + $0xf8] sm:$0xff] %v2129_v22 }
 0x485   :  { %2556 = shalt.err (!%p2553_p2)
}
 0x486   :  { %s2557_s14 = scalar_lea.hbm %s3538_s9, 4096 }
 0x487   :  { %p2558_p3 = scmp.ne.s32.totalorder %s3538_s9, %s2557_s14  ;;  %p2561_p4 = scmp.lt.u32.totalorder %s2557_s14, %s3538_s9 }
 0x489   :  { %p2563_p5 = pnand %p2561_p4, %p2558_p3 }
 0x48b   :  { %2566 = shalt.err (!%p2563_p5)
}
 0x48c   :  { %2175 = dma.vmem_to_hbm [thread:$0]  %s2170_s11, 4096, %s3538_s9, [#allocation4], %s2582_s3, %s2582_s3, %s2583_s21  }
 0x48d   :  { %2573 = dma.done.wait [#allocation4], 4096  }
 0x48e   :  { %2574 = vsyncadd [#allocation4], 4294963200 }
 0x48f   :  { %2179 = vsyncpa [#allocation3], 1 }
 0x490   :  { %2180 = vsyncpa [#allocation6], 1 }
 0x491   :  { %2181 = vsyncpa [#allocation9], 1 }
 0x492   :  { %2182 = vsyncpa [#allocation4], 1 }

</bundles_post_ra>
